<compile_context>
chip_gen: v7x
topology: tpu7x:2x2x1
jax: 0.10.0
libtpu: 0.0.40
codegen_flags: <defaults>
</compile_context>

<pallas_src>
import jax
import jax.numpy as jnp
from jax.experimental import pallas as pl
from jax.experimental.pallas import tpu as pltpu

C1 = 0.01 ** 2
C2 = 0.03 ** 2


def _pool3_reflect(a, first_r, last_r, first_c, last_c):
    """3x3 mean pool, stride 1, with fused 1-px reflection padding.

    `a` is (B, H, W).  Separable vertical-then-horizontal pass.  Interior taps
    come from pltpu.roll; the wrap-contaminated border rows / columns are
    overwritten with the exact reflected sums (row0 -> a0 + 2*a1, etc.), so
    correctness does not depend on the roll wrap direction.
    """
    H = a.shape[1]
    W = a.shape[2]

    # Vertical pass: v[i] = a[refl(i-1)] + a[i] + a[refl(i+1)]
    r_a = pltpu.roll(a, 1, 1)
    r_b = pltpu.roll(a, H - 1, 1)        # == roll by -1 (positive shift only)
    row1 = a[:, 1:2, :]                  # reflected neighbour of row 0
    rowm = a[:, H - 2:H - 1, :]          # reflected neighbour of row H-1
    v = jnp.where(first_r, a + 2.0 * row1,
                  jnp.where(last_r, a + 2.0 * rowm, a + r_a + r_b))

    # Horizontal pass: out[j] = v[refl(j-1)] + v[j] + v[refl(j+1)]
    c_a = pltpu.roll(v, 1, 2)
    c_b = pltpu.roll(v, W - 1, 2)
    col1 = v[:, :, 1:2]
    colm = v[:, :, W - 2:W - 1]
    out = jnp.where(first_c, v + 2.0 * col1,
                    jnp.where(last_c, v + 2.0 * colm, v + c_a + c_b))
    return out * (1.0 / 9.0)


def _ssim_kernel(x_ref, y_ref, o_ref):
    # x_ref / y_ref / o_ref: (B, H, W) blocks of unpadded planes in VMEM.
    x = x_ref[...].astype(jnp.float32)
    y = y_ref[...].astype(jnp.float32)
    shape = x.shape
    H, W = shape[1], shape[2]

    ri = jax.lax.broadcasted_iota(jnp.int32, shape, 1)
    ci = jax.lax.broadcasted_iota(jnp.int32, shape, 2)
    first_r = ri == 0
    last_r = ri == H - 1
    first_c = ci == 0
    last_c = ci == W - 1

    def pool(a):
        return _pool3_reflect(a, first_r, last_r, first_c, last_c)

    mu_x = pool(x)
    mu_y = pool(y)
    sigma_x = pool(x * x) - mu_x * mu_x
    sigma_y = pool(y * y) - mu_y * mu_y
    sigma_xy = pool(x * y) - mu_x * mu_y

    ssim_n = (2.0 * mu_x * mu_y + C1) * (2.0 * sigma_xy + C2)
    ssim_d = (mu_x * mu_x + mu_y * mu_y + C1) * (sigma_x + sigma_y + C2)
    # Exact divide: pl.reciprocal(approx=True) can exceed the 1e-5 tolerance.
    res = (1.0 - ssim_n / ssim_d) * 0.5
    o_ref[...] = jnp.clip(res, 0.0, 1.0).astype(o_ref.dtype)


def _choose_planes_per_block(nc, h, w, in_itemsize):
    """How many (N*C) planes to process per grid step, and per-plane bytes."""
    plane_in = h * w * in_itemsize
    plane_f32 = h * w * 4
    # 2 inputs + 1 output, double-buffered by the auto-pipeline (6 planes),
    # plus ~8 f32 temporaries live at the peak of the kernel body.
    per_plane = 6 * plane_in + 8 * plane_f32
    budget = 24 * 1024 * 1024            # headroom inside v7x's 64 MiB VMEM
    max_b = max(1, budget // per_plane)
    best = 1
    for b in range(1, nc + 1):
        if b > max_b or nc % b != 0:
            continue
        # Keep >= 2 grid steps so v7x's two TensorCores both get work.
        if nc // b >= 2 or nc <= 1:
            best = b
    return best, per_plane


@jax.jit
def ssim(x, y):
    """SSIM loss between two NCHW images; matches the PyTorch SSIM module."""
    N, C, H, W = x.shape
    assert y.shape == x.shape
    assert H >= 2 and W >= 2, "ReflectionPad2d(1) needs H, W >= 2"

    nc = N * C
    xf = x.reshape(nc, H, W)
    yf = y.reshape(nc, H, W)

    B, per_plane = _choose_planes_per_block(nc, H, W, jnp.dtype(x.dtype).itemsize)
    # TODO(synk): row-tile (with a 1-row halo) single planes whose working set
    # exceeds the VMEM budget — only needed for very large H*W on v7x (64 MiB).
    vmem_limit = int(min(64 * 1024 * 1024,
                         max(32 * 1024 * 1024, 2 * per_plane * B)))

    out = pl.pallas_call(
        _ssim_kernel,
        out_shape=jax.ShapeDtypeStruct((nc, H, W), x.dtype),
        grid_spec=pltpu.PrefetchScalarGridSpec(
            num_scalar_prefetch=0,
            grid=(nc // B,),
            in_specs=[
                pl.BlockSpec((B, H, W), lambda i: (i, 0, 0)),
                pl.BlockSpec((B, H, W), lambda i: (i, 0, 0)),
            ],
            out_specs=pl.BlockSpec((B, H, W), lambda i: (i, 0, 0)),
        ),
        compiler_params=pltpu.CompilerParams(
            dimension_semantics=("parallel",),
            vmem_limit_bytes=vmem_limit,
        ),
    )(xf, yf)

    return out.reshape(N, C, H, W)


def _ssim_ref(x, y):
    """Pure-JAX reference (pad + 9-tap pool) for correctness checking."""
    def pool(a):
        H = a.shape[2] - 2
        W = a.shape[3] - 2
        s = jnp.zeros(a.shape[:2] + (H, W), a.dtype)
        for di in range(3):
            for dj in range(3):
                s = s + a[:, :, di:di + H, dj:dj + W]
        return s / 9.0

    xp = jnp.pad(x, ((0, 0), (0, 0), (1, 1), (1, 1)), mode="reflect")
    yp = jnp.pad(y, ((0, 0), (0, 0), (1, 1), (1, 1)), mode="reflect")
    mu_x = pool(xp)
    mu_y = pool(yp)
    sigma_x = pool(xp * xp) - mu_x ** 2
    sigma_y = pool(yp * yp) - mu_y ** 2
    sigma_xy = pool(xp * yp) - mu_x * mu_y
    n = (2 * mu_x * mu_y + C1) * (2 * sigma_xy + C2)
    d = (mu_x ** 2 + mu_y ** 2 + C1) * (sigma_x + sigma_y + C2)
    return jnp.clip((1 - n / d) / 2, 0.0, 1.0)


if __name__ == "__main__":
    key = jax.random.PRNGKey(0)
    kx, ky = jax.random.split(key)
    N, C, H, W = 2, 4, 16, 16
    x = jax.random.uniform(kx, (N, C, H, W), dtype=jnp.float32)
    y = jax.random.uniform(ky, (N, C, H, W), dtype=jnp.float32)

    out = ssim(x, y)
    out = jax.block_until_ready(out)

    ref = _ssim_ref(x, y)
    assert out.shape == (N, C, H, W)
    assert jnp.allclose(out, ref, atol=1e-5, rtol=1e-5), (
        f"max abs err = {jnp.max(jnp.abs(out - ref))}"
    )
    print("KERNEL_OK")
</pallas_src>

<mosaic_0001>
module attributes {stable_mosaic.version = 11 : i64} {
  func.func @_ssim_kernel(%arg0: i32, %arg1: memref<4x16x16xf32, #tpu.memory_space<vmem>>, %arg2: memref<4x16x16xf32, #tpu.memory_space<vmem>>, %arg3: memref<4x16x16xf32, #tpu.memory_space<vmem>>) attributes {dimension_semantics = [#tpu.dimension_semantics<parallel>], iteration_bounds = array<i64: 2>, scalar_prefetch = 0 : i64, scratch_operands = 0 : i64, tpu.core_type = #tpu.core_type<tc>, window_params = [{transform_indices = @transform_0, window_bounds = array<i64: 4, 16, 16>}, {transform_indices = @transform_1, window_bounds = array<i64: 4, 16, 16>}, {transform_indices = @transform_2, window_bounds = array<i64: 4, 16, 16>}]} {
    %c0 = arith.constant 0 : index
    %c0_0 = arith.constant 0 : index
    %c0_1 = arith.constant 0 : index
    %0 = vector.load %arg1[%c0, %c0_0, %c0_1] : memref<4x16x16xf32, #tpu.memory_space<vmem>>, vector<4x16x16xf32>
    %c0_2 = arith.constant 0 : index
    %c0_3 = arith.constant 0 : index
    %c0_4 = arith.constant 0 : index
    %1 = vector.load %arg2[%c0_2, %c0_3, %c0_4] : memref<4x16x16xf32, #tpu.memory_space<vmem>>, vector<4x16x16xf32>
    %2 = tpu.iota {dimensions = array<i32: 1>} : vector<4x16x16xi32>
    %3 = tpu.iota {dimensions = array<i32: 2>} : vector<4x16x16xi32>
    %c0_i32 = arith.constant 0 : i32
    %4 = vector.broadcast %c0_i32 : i32 to vector<4x16x16xi32>
    %5 = arith.cmpi eq, %2, %4 : vector<4x16x16xi32>
    %c15_i32 = arith.constant 15 : i32
    %6 = vector.broadcast %c15_i32 : i32 to vector<4x16x16xi32>
    %7 = arith.cmpi eq, %2, %6 : vector<4x16x16xi32>
    %c0_i32_5 = arith.constant 0 : i32
    %8 = vector.broadcast %c0_i32_5 : i32 to vector<4x16x16xi32>
    %9 = arith.cmpi eq, %3, %8 : vector<4x16x16xi32>
    %c15_i32_6 = arith.constant 15 : i32
    %10 = vector.broadcast %c15_i32_6 : i32 to vector<4x16x16xi32>
    %11 = arith.cmpi eq, %3, %10 : vector<4x16x16xi32>
    %c1_i32 = arith.constant 1 : i32
    %12 = tpu.dynamic_rotate %0 by %c1_i32 dim 1 : vector<4x16x16xf32>, i32 -> vector<4x16x16xf32>
    %c15_i32_7 = arith.constant 15 : i32
    %13 = tpu.dynamic_rotate %0 by %c15_i32_7 dim 1 : vector<4x16x16xf32>, i32 -> vector<4x16x16xf32>
    %14 = vector.extract_strided_slice %0 {offsets = [0, 1, 0], sizes = [4, 1, 16], strides = [1, 1, 1]} : vector<4x16x16xf32> to vector<4x1x16xf32>
    %15 = vector.extract_strided_slice %0 {offsets = [0, 14, 0], sizes = [4, 1, 16], strides = [1, 1, 1]} : vector<4x16x16xf32> to vector<4x1x16xf32>
    %cst = arith.constant 2.000000e+00 : f32
    %16 = vector.broadcast %cst : f32 to vector<4x1x16xf32>
    %17 = arith.mulf %16, %14 : vector<4x1x16xf32>
    %18 = vector.broadcast %17 : vector<4x1x16xf32> to vector<4x16x16xf32>
    %19 = arith.addf %0, %18 : vector<4x16x16xf32>
    %cst_8 = arith.constant 2.000000e+00 : f32
    %20 = vector.broadcast %cst_8 : f32 to vector<4x1x16xf32>
    %21 = arith.mulf %20, %15 : vector<4x1x16xf32>
    %22 = vector.broadcast %21 : vector<4x1x16xf32> to vector<4x16x16xf32>
    %23 = arith.addf %0, %22 : vector<4x16x16xf32>
    %24 = arith.addf %0, %12 : vector<4x16x16xf32>
    %25 = arith.addf %24, %13 : vector<4x16x16xf32>
    %26 = arith.select %7, %23, %25 : vector<4x16x16xi1>, vector<4x16x16xf32>
    %27 = arith.select %5, %19, %26 : vector<4x16x16xi1>, vector<4x16x16xf32>
    %c1_i32_9 = arith.constant 1 : i32
    %28 = tpu.dynamic_rotate %27 by %c1_i32_9 dim 2 : vector<4x16x16xf32>, i32 -> vector<4x16x16xf32>
    %c15_i32_10 = arith.constant 15 : i32
    %29 = tpu.dynamic_rotate %27 by %c15_i32_10 dim 2 : vector<4x16x16xf32>, i32 -> vector<4x16x16xf32>
    %30 = vector.extract_strided_slice %27 {offsets = [0, 0, 1], sizes = [4, 16, 1], strides = [1, 1, 1]} : vector<4x16x16xf32> to vector<4x16x1xf32>
    %31 = vector.extract_strided_slice %27 {offsets = [0, 0, 14], sizes = [4, 16, 1], strides = [1, 1, 1]} : vector<4x16x16xf32> to vector<4x16x1xf32>
    %cst_11 = arith.constant 2.000000e+00 : f32
    %32 = vector.broadcast %cst_11 : f32 to vector<4x16x1xf32>
    %33 = arith.mulf %32, %30 : vector<4x16x1xf32>
    %34 = vector.broadcast %33 : vector<4x16x1xf32> to vector<4x16x16xf32>
    %35 = arith.addf %27, %34 : vector<4x16x16xf32>
    %cst_12 = arith.constant 2.000000e+00 : f32
    %36 = vector.broadcast %cst_12 : f32 to vector<4x16x1xf32>
    %37 = arith.mulf %36, %31 : vector<4x16x1xf32>
    %38 = vector.broadcast %37 : vector<4x16x1xf32> to vector<4x16x16xf32>
    %39 = arith.addf %27, %38 : vector<4x16x16xf32>
    %40 = arith.addf %27, %28 : vector<4x16x16xf32>
    %41 = arith.addf %40, %29 : vector<4x16x16xf32>
    %42 = arith.select %11, %39, %41 : vector<4x16x16xi1>, vector<4x16x16xf32>
    %43 = arith.select %9, %35, %42 : vector<4x16x16xi1>, vector<4x16x16xf32>
    %cst_13 = arith.constant 0.111111112 : f32
    %44 = vector.broadcast %cst_13 : f32 to vector<4x16x16xf32>
    %45 = arith.mulf %43, %44 : vector<4x16x16xf32>
    %c1_i32_14 = arith.constant 1 : i32
    %46 = tpu.dynamic_rotate %1 by %c1_i32_14 dim 1 : vector<4x16x16xf32>, i32 -> vector<4x16x16xf32>
    %c15_i32_15 = arith.constant 15 : i32
    %47 = tpu.dynamic_rotate %1 by %c15_i32_15 dim 1 : vector<4x16x16xf32>, i32 -> vector<4x16x16xf32>
    %48 = vector.extract_strided_slice %1 {offsets = [0, 1, 0], sizes = [4, 1, 16], strides = [1, 1, 1]} : vector<4x16x16xf32> to vector<4x1x16xf32>
    %49 = vector.extract_strided_slice %1 {offsets = [0, 14, 0], sizes = [4, 1, 16], strides = [1, 1, 1]} : vector<4x16x16xf32> to vector<4x1x16xf32>
    %cst_16 = arith.constant 2.000000e+00 : f32
    %50 = vector.broadcast %cst_16 : f32 to vector<4x1x16xf32>
    %51 = arith.mulf %50, %48 : vector<4x1x16xf32>
    %52 = vector.broadcast %51 : vector<4x1x16xf32> to vector<4x16x16xf32>
    %53 = arith.addf %1, %52 : vector<4x16x16xf32>
    %cst_17 = arith.constant 2.000000e+00 : f32
    %54 = vector.broadcast %cst_17 : f32 to vector<4x1x16xf32>
    %55 = arith.mulf %54, %49 : vector<4x1x16xf32>
    %56 = vector.broadcast %55 : vector<4x1x16xf32> to vector<4x16x16xf32>
    %57 = arith.addf %1, %56 : vector<4x16x16xf32>
    %58 = arith.addf %1, %46 : vector<4x16x16xf32>
    %59 = arith.addf %58, %47 : vector<4x16x16xf32>
    %60 = arith.select %7, %57, %59 : vector<4x16x16xi1>, vector<4x16x16xf32>
    %61 = arith.select %5, %53, %60 : vector<4x16x16xi1>, vector<4x16x16xf32>
    %c1_i32_18 = arith.constant 1 : i32
    %62 = tpu.dynamic_rotate %61 by %c1_i32_18 dim 2 : vector<4x16x16xf32>, i32 -> vector<4x16x16xf32>
    %c15_i32_19 = arith.constant 15 : i32
    %63 = tpu.dynamic_rotate %61 by %c15_i32_19 dim 2 : vector<4x16x16xf32>, i32 -> vector<4x16x16xf32>
    %64 = vector.extract_strided_slice %61 {offsets = [0, 0, 1], sizes = [4, 16, 1], strides = [1, 1, 1]} : vector<4x16x16xf32> to vector<4x16x1xf32>
    %65 = vector.extract_strided_slice %61 {offsets = [0, 0, 14], sizes = [4, 16, 1], strides = [1, 1, 1]} : vector<4x16x16xf32> to vector<4x16x1xf32>
    %cst_20 = arith.constant 2.000000e+00 : f32
    %66 = vector.broadcast %cst_20 : f32 to vector<4x16x1xf32>
    %67 = arith.mulf %66, %64 : vector<4x16x1xf32>
    %68 = vector.broadcast %67 : vector<4x16x1xf32> to vector<4x16x16xf32>
    %69 = arith.addf %61, %68 : vector<4x16x16xf32>
    %cst_21 = arith.constant 2.000000e+00 : f32
    %70 = vector.broadcast %cst_21 : f32 to vector<4x16x1xf32>
    %71 = arith.mulf %70, %65 : vector<4x16x1xf32>
    %72 = vector.broadcast %71 : vector<4x16x1xf32> to vector<4x16x16xf32>
    %73 = arith.addf %61, %72 : vector<4x16x16xf32>
    %74 = arith.addf %61, %62 : vector<4x16x16xf32>
    %75 = arith.addf %74, %63 : vector<4x16x16xf32>
    %76 = arith.select %11, %73, %75 : vector<4x16x16xi1>, vector<4x16x16xf32>
    %77 = arith.select %9, %69, %76 : vector<4x16x16xi1>, vector<4x16x16xf32>
    %cst_22 = arith.constant 0.111111112 : f32
    %78 = vector.broadcast %cst_22 : f32 to vector<4x16x16xf32>
    %79 = arith.mulf %77, %78 : vector<4x16x16xf32>
    %80 = arith.mulf %0, %0 : vector<4x16x16xf32>
    %c1_i32_23 = arith.constant 1 : i32
    %81 = tpu.dynamic_rotate %80 by %c1_i32_23 dim 1 : vector<4x16x16xf32>, i32 -> vector<4x16x16xf32>
    %c15_i32_24 = arith.constant 15 : i32
    %82 = tpu.dynamic_rotate %80 by %c15_i32_24 dim 1 : vector<4x16x16xf32>, i32 -> vector<4x16x16xf32>
    %83 = vector.extract_strided_slice %80 {offsets = [0, 1, 0], sizes = [4, 1, 16], strides = [1, 1, 1]} : vector<4x16x16xf32> to vector<4x1x16xf32>
    %84 = vector.extract_strided_slice %80 {offsets = [0, 14, 0], sizes = [4, 1, 16], strides = [1, 1, 1]} : vector<4x16x16xf32> to vector<4x1x16xf32>
    %cst_25 = arith.constant 2.000000e+00 : f32
    %85 = vector.broadcast %cst_25 : f32 to vector<4x1x16xf32>
    %86 = arith.mulf %85, %83 : vector<4x1x16xf32>
    %87 = vector.broadcast %86 : vector<4x1x16xf32> to vector<4x16x16xf32>
    %88 = arith.addf %80, %87 : vector<4x16x16xf32>
    %cst_26 = arith.constant 2.000000e+00 : f32
    %89 = vector.broadcast %cst_26 : f32 to vector<4x1x16xf32>
    %90 = arith.mulf %89, %84 : vector<4x1x16xf32>
    %91 = vector.broadcast %90 : vector<4x1x16xf32> to vector<4x16x16xf32>
    %92 = arith.addf %80, %91 : vector<4x16x16xf32>
    %93 = arith.addf %80, %81 : vector<4x16x16xf32>
    %94 = arith.addf %93, %82 : vector<4x16x16xf32>
    %95 = arith.select %7, %92, %94 : vector<4x16x16xi1>, vector<4x16x16xf32>
    %96 = arith.select %5, %88, %95 : vector<4x16x16xi1>, vector<4x16x16xf32>
    %c1_i32_27 = arith.constant 1 : i32
    %97 = tpu.dynamic_rotate %96 by %c1_i32_27 dim 2 : vector<4x16x16xf32>, i32 -> vector<4x16x16xf32>
    %c15_i32_28 = arith.constant 15 : i32
    %98 = tpu.dynamic_rotate %96 by %c15_i32_28 dim 2 : vector<4x16x16xf32>, i32 -> vector<4x16x16xf32>
    %99 = vector.extract_strided_slice %96 {offsets = [0, 0, 1], sizes = [4, 16, 1], strides = [1, 1, 1]} : vector<4x16x16xf32> to vector<4x16x1xf32>
    %100 = vector.extract_strided_slice %96 {offsets = [0, 0, 14], sizes = [4, 16, 1], strides = [1, 1, 1]} : vector<4x16x16xf32> to vector<4x16x1xf32>
    %cst_29 = arith.constant 2.000000e+00 : f32
    %101 = vector.broadcast %cst_29 : f32 to vector<4x16x1xf32>
    %102 = arith.mulf %101, %99 : vector<4x16x1xf32>
    %103 = vector.broadcast %102 : vector<4x16x1xf32> to vector<4x16x16xf32>
    %104 = arith.addf %96, %103 : vector<4x16x16xf32>
    %cst_30 = arith.constant 2.000000e+00 : f32
    %105 = vector.broadcast %cst_30 : f32 to vector<4x16x1xf32>
    %106 = arith.mulf %105, %100 : vector<4x16x1xf32>
    %107 = vector.broadcast %106 : vector<4x16x1xf32> to vector<4x16x16xf32>
    %108 = arith.addf %96, %107 : vector<4x16x16xf32>
    %109 = arith.addf %96, %97 : vector<4x16x16xf32>
    %110 = arith.addf %109, %98 : vector<4x16x16xf32>
    %111 = arith.select %11, %108, %110 : vector<4x16x16xi1>, vector<4x16x16xf32>
    %112 = arith.select %9, %104, %111 : vector<4x16x16xi1>, vector<4x16x16xf32>
    %cst_31 = arith.constant 0.111111112 : f32
    %113 = vector.broadcast %cst_31 : f32 to vector<4x16x16xf32>
    %114 = arith.mulf %112, %113 : vector<4x16x16xf32>
    %115 = arith.mulf %45, %45 : vector<4x16x16xf32>
    %116 = arith.subf %114, %115 : vector<4x16x16xf32>
    %117 = arith.mulf %1, %1 : vector<4x16x16xf32>
    %c1_i32_32 = arith.constant 1 : i32
    %118 = tpu.dynamic_rotate %117 by %c1_i32_32 dim 1 : vector<4x16x16xf32>, i32 -> vector<4x16x16xf32>
    %c15_i32_33 = arith.constant 15 : i32
    %119 = tpu.dynamic_rotate %117 by %c15_i32_33 dim 1 : vector<4x16x16xf32>, i32 -> vector<4x16x16xf32>
    %120 = vector.extract_strided_slice %117 {offsets = [0, 1, 0], sizes = [4, 1, 16], strides = [1, 1, 1]} : vector<4x16x16xf32> to vector<4x1x16xf32>
    %121 = vector.extract_strided_slice %117 {offsets = [0, 14, 0], sizes = [4, 1, 16], strides = [1, 1, 1]} : vector<4x16x16xf32> to vector<4x1x16xf32>
    %cst_34 = arith.constant 2.000000e+00 : f32
    %122 = vector.broadcast %cst_34 : f32 to vector<4x1x16xf32>
    %123 = arith.mulf %122, %120 : vector<4x1x16xf32>
    %124 = vector.broadcast %123 : vector<4x1x16xf32> to vector<4x16x16xf32>
    %125 = arith.addf %117, %124 : vector<4x16x16xf32>
    %cst_35 = arith.constant 2.000000e+00 : f32
    %126 = vector.broadcast %cst_35 : f32 to vector<4x1x16xf32>
    %127 = arith.mulf %126, %121 : vector<4x1x16xf32>
    %128 = vector.broadcast %127 : vector<4x1x16xf32> to vector<4x16x16xf32>
    %129 = arith.addf %117, %128 : vector<4x16x16xf32>
    %130 = arith.addf %117, %118 : vector<4x16x16xf32>
    %131 = arith.addf %130, %119 : vector<4x16x16xf32>
    %132 = arith.select %7, %129, %131 : vector<4x16x16xi1>, vector<4x16x16xf32>
    %133 = arith.select %5, %125, %132 : vector<4x16x16xi1>, vector<4x16x16xf32>
    %c1_i32_36 = arith.constant 1 : i32
    %134 = tpu.dynamic_rotate %133 by %c1_i32_36 dim 2 : vector<4x16x16xf32>, i32 -> vector<4x16x16xf32>
    %c15_i32_37 = arith.constant 15 : i32
    %135 = tpu.dynamic_rotate %133 by %c15_i32_37 dim 2 : vector<4x16x16xf32>, i32 -> vector<4x16x16xf32>
    %136 = vector.extract_strided_slice %133 {offsets = [0, 0, 1], sizes = [4, 16, 1], strides = [1, 1, 1]} : vector<4x16x16xf32> to vector<4x16x1xf32>
    %137 = vector.extract_strided_slice %133 {offsets = [0, 0, 14], sizes = [4, 16, 1], strides = [1, 1, 1]} : vector<4x16x16xf32> to vector<4x16x1xf32>
    %cst_38 = arith.constant 2.000000e+00 : f32
    %138 = vector.broadcast %cst_38 : f32 to vector<4x16x1xf32>
    %139 = arith.mulf %138, %136 : vector<4x16x1xf32>
    %140 = vector.broadcast %139 : vector<4x16x1xf32> to vector<4x16x16xf32>
    %141 = arith.addf %133, %140 : vector<4x16x16xf32>
    %cst_39 = arith.constant 2.000000e+00 : f32
    %142 = vector.broadcast %cst_39 : f32 to vector<4x16x1xf32>
    %143 = arith.mulf %142, %137 : vector<4x16x1xf32>
    %144 = vector.broadcast %143 : vector<4x16x1xf32> to vector<4x16x16xf32>
    %145 = arith.addf %133, %144 : vector<4x16x16xf32>
    %146 = arith.addf %133, %134 : vector<4x16x16xf32>
    %147 = arith.addf %146, %135 : vector<4x16x16xf32>
    %148 = arith.select %11, %145, %147 : vector<4x16x16xi1>, vector<4x16x16xf32>
    %149 = arith.select %9, %141, %148 : vector<4x16x16xi1>, vector<4x16x16xf32>
    %cst_40 = arith.constant 0.111111112 : f32
    %150 = vector.broadcast %cst_40 : f32 to vector<4x16x16xf32>
    %151 = arith.mulf %149, %150 : vector<4x16x16xf32>
    %152 = arith.mulf %79, %79 : vector<4x16x16xf32>
    %153 = arith.subf %151, %152 : vector<4x16x16xf32>
    %154 = arith.mulf %0, %1 : vector<4x16x16xf32>
    %c1_i32_41 = arith.constant 1 : i32
    %155 = tpu.dynamic_rotate %154 by %c1_i32_41 dim 1 : vector<4x16x16xf32>, i32 -> vector<4x16x16xf32>
    %c15_i32_42 = arith.constant 15 : i32
    %156 = tpu.dynamic_rotate %154 by %c15_i32_42 dim 1 : vector<4x16x16xf32>, i32 -> vector<4x16x16xf32>
    %157 = vector.extract_strided_slice %154 {offsets = [0, 1, 0], sizes = [4, 1, 16], strides = [1, 1, 1]} : vector<4x16x16xf32> to vector<4x1x16xf32>
    %158 = vector.extract_strided_slice %154 {offsets = [0, 14, 0], sizes = [4, 1, 16], strides = [1, 1, 1]} : vector<4x16x16xf32> to vector<4x1x16xf32>
    %cst_43 = arith.constant 2.000000e+00 : f32
    %159 = vector.broadcast %cst_43 : f32 to vector<4x1x16xf32>
    %160 = arith.mulf %159, %157 : vector<4x1x16xf32>
    %161 = vector.broadcast %160 : vector<4x1x16xf32> to vector<4x16x16xf32>
    %162 = arith.addf %154, %161 : vector<4x16x16xf32>
    %cst_44 = arith.constant 2.000000e+00 : f32
    %163 = vector.broadcast %cst_44 : f32 to vector<4x1x16xf32>
    %164 = arith.mulf %163, %158 : vector<4x1x16xf32>
    %165 = vector.broadcast %164 : vector<4x1x16xf32> to vector<4x16x16xf32>
    %166 = arith.addf %154, %165 : vector<4x16x16xf32>
    %167 = arith.addf %154, %155 : vector<4x16x16xf32>
    %168 = arith.addf %167, %156 : vector<4x16x16xf32>
    %169 = arith.select %7, %166, %168 : vector<4x16x16xi1>, vector<4x16x16xf32>
    %170 = arith.select %5, %162, %169 : vector<4x16x16xi1>, vector<4x16x16xf32>
    %c1_i32_45 = arith.constant 1 : i32
    %171 = tpu.dynamic_rotate %170 by %c1_i32_45 dim 2 : vector<4x16x16xf32>, i32 -> vector<4x16x16xf32>
    %c15_i32_46 = arith.constant 15 : i32
    %172 = tpu.dynamic_rotate %170 by %c15_i32_46 dim 2 : vector<4x16x16xf32>, i32 -> vector<4x16x16xf32>
    %173 = vector.extract_strided_slice %170 {offsets = [0, 0, 1], sizes = [4, 16, 1], strides = [1, 1, 1]} : vector<4x16x16xf32> to vector<4x16x1xf32>
    %174 = vector.extract_strided_slice %170 {offsets = [0, 0, 14], sizes = [4, 16, 1], strides = [1, 1, 1]} : vector<4x16x16xf32> to vector<4x16x1xf32>
    %cst_47 = arith.constant 2.000000e+00 : f32
    %175 = vector.broadcast %cst_47 : f32 to vector<4x16x1xf32>
    %176 = arith.mulf %175, %173 : vector<4x16x1xf32>
    %177 = vector.broadcast %176 : vector<4x16x1xf32> to vector<4x16x16xf32>
    %178 = arith.addf %170, %177 : vector<4x16x16xf32>
    %cst_48 = arith.constant 2.000000e+00 : f32
    %179 = vector.broadcast %cst_48 : f32 to vector<4x16x1xf32>
    %180 = arith.mulf %179, %174 : vector<4x16x1xf32>
    %181 = vector.broadcast %180 : vector<4x16x1xf32> to vector<4x16x16xf32>
    %182 = arith.addf %170, %181 : vector<4x16x16xf32>
    %183 = arith.addf %170, %171 : vector<4x16x16xf32>
    %184 = arith.addf %183, %172 : vector<4x16x16xf32>
    %185 = arith.select %11, %182, %184 : vector<4x16x16xi1>, vector<4x16x16xf32>
    %186 = arith.select %9, %178, %185 : vector<4x16x16xi1>, vector<4x16x16xf32>
    %cst_49 = arith.constant 0.111111112 : f32
    %187 = vector.broadcast %cst_49 : f32 to vector<4x16x16xf32>
    %188 = arith.mulf %186, %187 : vector<4x16x16xf32>
    %189 = arith.mulf %45, %79 : vector<4x16x16xf32>
    %190 = arith.subf %188, %189 : vector<4x16x16xf32>
    %cst_50 = arith.constant 2.000000e+00 : f32
    %191 = vector.broadcast %cst_50 : f32 to vector<4x16x16xf32>
    %192 = arith.mulf %191, %45 : vector<4x16x16xf32>
    %193 = arith.mulf %192, %79 : vector<4x16x16xf32>
    %cst_51 = arith.constant 9.99999974E-5 : f32
    %194 = vector.broadcast %cst_51 : f32 to vector<4x16x16xf32>
    %195 = arith.addf %193, %194 : vector<4x16x16xf32>
    %cst_52 = arith.constant 2.000000e+00 : f32
    %196 = vector.broadcast %cst_52 : f32 to vector<4x16x16xf32>
    %197 = arith.mulf %196, %190 : vector<4x16x16xf32>
    %cst_53 = arith.constant 8.99999984E-4 : f32
    %198 = vector.broadcast %cst_53 : f32 to vector<4x16x16xf32>
    %199 = arith.addf %197, %198 : vector<4x16x16xf32>
    %200 = arith.mulf %195, %199 : vector<4x16x16xf32>
    %201 = arith.mulf %45, %45 : vector<4x16x16xf32>
    %202 = arith.mulf %79, %79 : vector<4x16x16xf32>
    %203 = arith.addf %201, %202 : vector<4x16x16xf32>
    %cst_54 = arith.constant 9.99999974E-5 : f32
    %204 = vector.broadcast %cst_54 : f32 to vector<4x16x16xf32>
    %205 = arith.addf %203, %204 : vector<4x16x16xf32>
    %206 = arith.addf %116, %153 : vector<4x16x16xf32>
    %cst_55 = arith.constant 8.99999984E-4 : f32
    %207 = vector.broadcast %cst_55 : f32 to vector<4x16x16xf32>
    %208 = arith.addf %206, %207 : vector<4x16x16xf32>
    %209 = arith.mulf %205, %208 : vector<4x16x16xf32>
    %210 = arith.divf %200, %209 : vector<4x16x16xf32>
    %cst_56 = arith.constant 1.000000e+00 : f32
    %211 = vector.broadcast %cst_56 : f32 to vector<4x16x16xf32>
    %212 = arith.subf %211, %210 : vector<4x16x16xf32>
    %cst_57 = arith.constant 5.000000e-01 : f32
    %213 = vector.broadcast %cst_57 : f32 to vector<4x16x16xf32>
    %214 = arith.mulf %212, %213 : vector<4x16x16xf32>
    %cst_58 = arith.constant 0.000000e+00 : f32
    %cst_59 = arith.constant 1.000000e+00 : f32
    %215 = vector.broadcast %cst_58 : f32 to vector<4x16x16xf32>
    %216 = arith.maximumf %215, %214 : vector<4x16x16xf32>
    %217 = vector.broadcast %cst_59 : f32 to vector<4x16x16xf32>
    %218 = arith.minimumf %217, %216 : vector<4x16x16xf32>
    %c0_60 = arith.constant 0 : index
    %c0_61 = arith.constant 0 : index
    %c0_62 = arith.constant 0 : index
    %219 = vector.load %arg3[%c0_60, %c0_61, %c0_62] : memref<4x16x16xf32, #tpu.memory_space<vmem>>, vector<4x16x16xf32>
    tpu.vector_store %arg3[%c0_60, %c0_61, %c0_62], %218 {strides = array<i32>} : memref<4x16x16xf32, #tpu.memory_space<vmem>>, vector<4x16x16xf32>,
    return
  }
  func.func @transform_0(%arg0: i32) -> (i32, i32, i32) {
    %c0_i32 = arith.constant 0 : i32
    %c0_i32_0 = arith.constant 0 : i32
    %c0_i32_1 = arith.constant 0 : i32
    return %arg0, %c0_i32, %c0_i32_0 : i32, i32, i32
  }
  func.func @transform_1(%arg0: i32) -> (i32, i32, i32) {
    %c0_i32 = arith.constant 0 : i32
    %c0_i32_0 = arith.constant 0 : i32
    %c0_i32_1 = arith.constant 0 : i32
    return %arg0, %c0_i32, %c0_i32_0 : i32, i32, i32
  }
  func.func @transform_2(%arg0: i32) -> (i32, i32, i32) {
    %c0_i32 = arith.constant 0 : i32
    %c0_i32_0 = arith.constant 0 : i32
    %c0_i32_1 = arith.constant 0 : i32
    return %arg0, %c0_i32, %c0_i32_0 : i32, i32, i32
  }
}

</mosaic_0001>

<bundles_post_ra>
// kernel: ssim.1
= control target key start
LH: loop header
LB: loop body
LE: loop exit
PB: predicated region body
PF: predicated region fallthrough
CT: control target
= control target key end

     0   :  { %7 = vsyncpa [#allocation3], 0  ;;  %s5216_s0 = inlined_call_operand.hbm [shape: f32[8,16,16], index: 0, kind: input, shape index: {}]   ;;  %s5217_s1 = inlined_call_operand.hbm [shape: f32[8,16,16], index: 1, kind: input, shape index: {}]   ;;  %s5218_s2 = inlined_call_operand.hbm [shape: f32[8,16,16], index: 2, kind: output, shape index: {}]  }
   0x1   :  { %9 = vsyncpa [#allocation3 + $0x1], 0 }
   0x2   :  { %10 = vsyncpa [#allocation6], 0 }
   0x3   :  { %12 = vsyncpa [#allocation6 + $0x1], 0 }
   0x4   :  { %13 = vsyncpa [#allocation4], 0 }
   0x5   :  { %15 = vsyncpa [#allocation4 + $0x1], 0  ;;  %s2657_s9 = smov 0   ;;  %s2659_s10 = smov 0  }
   0x6   :  { %s2661_s11 = smov 0   ;;  %s2663_s12 = smov 0  }
   0x7 LB: > { %s2678_s13 = sadd.s32 4294967295, %s2628_s12   ;;  %s2365_s14 = sadd.s32 4294967294, %s2628_s12   ;;  %s2628_s12 = sphi %s2663_s12, %s5635_s12   ;;  %s2624_s11 = sphi %s2661_s11, %s5634_s11   ;;  %s2620_s10 = sphi %s2659_s10, %s5633_s10   ;;  %s2616_s9 = sphi %s2657_s9, %s5632_s9  }
   0x8   : > { %s2682_s15 = sadd.s32 1, %s2628_s12   ;;  %s28_s16 = sadd.s32 1, %s2624_s11 }
   0x9   : > { %s25_s17 = ssub.s32 %s2628_s12, %s2682_s15  ;;  %p35_p0 = scmp.ne.s32.totalorder %s2624_s11, %s2620_s10 }
   0xa   : > { %p26_p1 = scmp.eq.s32.totalorder %s25_s17, 0  ;;  %p36_p2 = scmp.eq.s32.totalorder %s2628_s12, 0 }
   0xb   : > { %p41_p3 = scmp.ne.s32.totalorder %s2620_s10, %s2616_s9  ;;  %p42_p4 = scmp.eq.s32.totalorder %s2678_s13, 0 }
   0xc   : > { %s2694_s18 = scalar_select %p26_p1, %s2624_s11, %s28_s16  }
   0xd   : > { %p2696_p5 = por %p36_p2, %p35_p0  ;;  %p2700_p6 = por %p42_p4, %p41_p3 }
   0xe   : > { %p91_p7 = scmp.eq.s32.totalorder %s2678_s13, 1  ;;  %p97_p8 = scmp.eq.s32.totalorder %s2365_s14, 1 }
   0xf   : > { %s5311_s20 = scalar_select %p2700_p6, 1, 0 }
  0x10   : > { %p2409_p10 = scmp.lt.s32.totalorder %s2628_s12, 2  ;;  %p2707_p11 = por %p91_p7, %p35_p0 }
  0x11   : > { %p2711_p12 = por %p97_p8, %p41_p3  ;;  %s2716_s23 = sand.u32 1, %s2624_s11  }
  0x12   : > { %s5312_s21 = scalar_select %p2707_p11, 1, 0 }
  0x13   : > { %s5313_s22 = scalar_select %p2711_p12, 1, 0 }
  0x14   : > { %s2387_s24 = sshll.u32 %s2628_s12, 10  ;;  %s2368_s25 = sshll.u32 %s2716_s23, 6 }
  0x15   : > { %s2725_s28 = scalar_lea.hbm %s5216_s0, %s2387_s24  ;;  %s121_s29 = scalar_lea.vmem [#allocation2], %s2368_s25 }
  0x16   : > { %s129_s30 = sshll.u32 %s121_s29, 4  ;;  %p2731_p13 = pnand %p2409_p10, %p2696_p5  ;;  %s2735_s30 = int_to_ptr.vmem [resolvable:$true] %s129_s30 }
  0x17   : > { %s118_s4 = scalar_lea.sflag [#allocation3], %s2716_s23  ;;  %s2498_s5 = scalar_lea.hbm %s2725_s28, 1024 }
  0x18   : > { %p2499_p0 = scmp.ne.s32.totalorder %s2725_s28, %s2498_s5  ;;  %p2500_p1 = pneg %p2731_p13 }
  0x19   : > { %s2503_s8 = scalar_lea.hbm %s5216_s0, 2048  ;;  %p2504_p4 = scmp.lt.u32.totalorder %s2725_s28, %s5216_s0 }
  0x1a   : > { %p2501_p2 = pnand %p2500_p1, %p2499_p0  ;;  %p2505_p5 = scmp.lt.u32.totalorder %s2503_s8, %s2498_s5 }
  0x1b   : > { %p2507_p8 = scmp.lt.u32.totalorder %s2498_s5, %s2725_s28 }
  0x1c   : > { %p2502_p3 = pneg %p2501_p2  ;;  %p2506_p7 = por %p2505_p5, %p2504_p4 }
  0x1e   : > { %p2508_p10 = por %p2507_p8, %p2506_p7 }
  0x20   : > { %p2509_p9 = pnand %p2508_p10, %p2502_p3 }
  0x22   : > { %2512 = shalt.err (!%p2509_p9)
}
  0x23   : > { %s2513_s17 = scalar_lea.vmem %s2735_s30, 1024  ;;  %s2630_s19 = smov [#allocation2]  }
  0x24   : > { %p2514_p0 = scmp.ne.s32.totalorder %s2735_s30, %s2513_s17  ;;  %s2518_s26 = sshll.u32 %s2630_s19, 4  ;;  %s2519_s26 = int_to_ptr.vmem [resolvable:$false] %s2518_s26 }
  0x25   : > { %s2520_s27 = scalar_lea.vmem %s2519_s26, 2048  ;;  %p2521_p11 = scmp.lt.s32.totalorder %s2735_s30, %s2519_s26 }
  0x26   : > { %p2516_p2 = pnand %p2514_p0, %p2500_p1  ;;  %p2522_p4 = scmp.lt.s32.totalorder %s2520_s27, %s2513_s17 }
  0x28   : > { %p2517_p12 = pneg %p2516_p2  ;;  %p2523_p5 = por %p2522_p4, %p2521_p11 }
  0x2a   : > { %p2524_p7 = pnand %p2523_p5, %p2517_p12 }
  0x2c   : > { %2527 = shalt.err (!%p2524_p7)
}
  0x2d   : > { %s2631_s29 = smov 128   ;;  %s2632_s5 = smov 8  }
  0x2e   : > { %2401 = dma.hbm_to_vmem [thread:$0]  (!%p2731_p13), %s2725_s28, 1024, %s2735_s30, %s118_s4, %s2631_s29, %s2631_s29, %s2632_s5  }
  0x2f   : > { %p2376_p9 = scmp.ge.s32.totalorder %s2628_s12, 1  ;;  %p159_p11 = scmp.lt.s32.totalorder %s2628_s12, 3 }
  0x30   : > { %s2779_s14 = scalar_lea.hbm %s5217_s1, %s2387_s24  ;;  %s143_s16 = scalar_lea.vmem [#allocation5], %s2368_s25 }
  0x31   : > { %p2770_p12 = pnand %p2376_p9, %p159_p11  ;;  %s151_s17 = sshll.u32 %s143_s16, 4  ;;  %s2783_s17 = int_to_ptr.vmem [resolvable:$true] %s151_s17 }
  0x32   : > { %s140_s28 = scalar_lea.sflag [#allocation6], %s2716_s23  ;;  %s2528_s30 = scalar_lea.hbm %s2779_s14, 1024 }
  0x33   : > { %p2529_p3 = scmp.ne.s32.totalorder %s2779_s14, %s2528_s30  ;;  %s2533_s24 = scalar_lea.hbm %s5217_s1, 2048 }
  0x34   : > { %p2534_p0 = scmp.lt.u32.totalorder %s2779_s14, %s5217_s1  ;;  %p2535_p2 = scmp.lt.u32.totalorder %s2533_s24, %s2528_s30 }
  0x35   : > { %p2531_p8 = pnand %p2529_p3, %p2500_p1  ;;  %p2537_p5 = scmp.lt.u32.totalorder %s2528_s30, %s2779_s14 }
  0x36   : > { %p2536_p4 = por %p2535_p2, %p2534_p0 }
  0x37   : > { %p2532_p10 = pneg %p2531_p8 }
  0x38   : > { %p2538_p7 = por %p2537_p5, %p2536_p4 }
  0x3a   : > { %p2539_p9 = pnand %p2538_p7, %p2532_p10 }
  0x3c   : > { %2542 = shalt.err (!%p2539_p9)
}
  0x3d   : > { %s2543_s25 = scalar_lea.vmem %s2783_s17, 1024  ;;  %s2633_s7 = smov [#allocation5]  }
  0x3e   : > { %p2544_p11 = scmp.ne.s32.totalorder %s2783_s17, %s2543_s25  ;;  %s2548_s8 = sshll.u32 %s2633_s7, 4  ;;  %s2549_s8 = int_to_ptr.vmem [resolvable:$false] %s2548_s8 }
  0x3f   : > { %s2550_s16 = scalar_lea.vmem %s2549_s8, 2048  ;;  %p2551_p6 = scmp.lt.s32.totalorder %s2783_s17, %s2549_s8 }
  0x40   : > { %p2546_p3 = pnand %p2544_p11, %p2500_p1  ;;  %p2552_p0 = scmp.lt.s32.totalorder %s2550_s16, %s2543_s25 }
  0x42   : > { %p2547_p8 = pneg %p2546_p3  ;;  %p2553_p2 = por %p2552_p0, %p2551_p6 }
  0x44   : > { %p2554_p4 = pnand %p2553_p2, %p2547_p8 }
  0x46   : > { %2557 = shalt.err (!%p2554_p4)
}
  0x47   : > { %2404 = dma.hbm_to_vmem [thread:$0]  (!%p2731_p13), %s2779_s14, 1024, %s2783_s17, %s140_s28, %s2631_s29, %s2631_s29, %s2632_s5  }
  0x48   : > { %163 = sbr.rel (%p2770_p12) target bundleno = 1183 (0x49f), region = 28 }
  0x4f   : > { %s2817_s30 = sand.u32 1, %s2620_s10   ;;  %p5316_p6 = scmp.ne.s32.totalorder %s5311_s20, 0 }
  0x50   : > { %s2820_s4 = sshll.u32 %s2817_s30, 6  ;;  %s166_s3 = scalar_lea.sflag [#allocation3], %s2817_s30 }
  0x51   : > { %s2824_s19 = scalar_lea.vmem [#allocation2], %s2820_s4 }
  0x52   : > { %2603 = dma.done.wait (%p5316_p6), %s166_s3, 1024  }
  0x53   : > { %2605 = vsyncadd (%p5316_p6), %s166_s3, 4294966272  ;;  %s175_s23 = scalar_lea.sflag [#allocation6], %s2817_s30  ;;  %s2832_s29 = scalar_lea.vmem [#allocation5], %s2820_s4 }
  0x54   : > { %2607 = dma.done.wait (%p5316_p6), %s175_s23, 1024  }
  0x55   : > { %2609 = vsyncadd (%p5316_p6), %s175_s23, 4294966272  ;;  %v5221_v0 = vlaneseq  ;;  %v5222_v1 = vmov 14   ;;  %v5226_v2 = vmov 1   ;;  %v2849_v5 = vld [vmem:[%s2824_s19 + $0x10] sm:$0xff]  ;;  %v2852_v6 = vld [vmem:[%s2824_s19 + $0x18] sm:$0xff]  ;;  %s2636_s20 = smov 16  }
  0x56   : > { %2454 = vset.pattern.permute.xlu0 %v5222_v1  ;;  %2452 = vset.pattern.permute.xlu1 %v5226_v2  ;;  %v2862_v9 = vld [vmem:[%s2824_s19] sm:$0xff]  ;;  %v235_v10 = vrot.slane %v2849_v5, 7  ;;  %v239_v11 = vrot.slane %v2852_v6, 7  ;;  %v252_v12 = vrot.slane %v2849_v5, 1  ;;  %v256_v13 = vrot.slane %v2852_v6, 1  ;;  %v2869_v14 = vld [vmem:[%s2824_s19 + $0x8] sm:$0xff] }
  0x57   : > { %v2841_v3 = vshrl.u32 %v5221_v0, 7  ;;  %v269_v15 = vmul.f32 2.0, %v2849_v5  ;;  %v234_v16 = vrot.slane %v2862_v9, 7  ;;  %v238_v17 = vrot.slane %v2869_v14, 7  ;;  %v2898_v35 = vld [vmem:[%s2824_s19 + $0x20] sm:$0xff]  ;;  %v2901_v36 = vld [vmem:[%s2824_s19 + $0x28] sm:$0xff] }
  0x58   : > { %v251_v18 = vrot.slane %v2862_v9, 1  ;;  %v255_v21 = vrot.slane %v2869_v14, 1  ;;  %v268_v22 = vmul.f32 2.0, %v2862_v9  ;;  %v297_v33 = vmul.f32 2.0, %v2852_v6  ;;  %v2935_v57 = vld [vmem:[%s2824_s19 + $0x30] sm:$0xff]  ;;  %v2938_v58 = vld [vmem:[%s2824_s19 + $0x38] sm:$0xff] }
  0x59   : > { %v2844_v4 = vadd.s32 8, %v2841_v3  ;;  %vm228_vm0 = vcmp.eq.s32.totalorder %v2841_v3, 0  ;;  %vm242_vm1 = vcmp.lt.s32.totalorder %v2841_v3, 1  ;;  %vm259_vm2 = vcmp.lt.s32.totalorder %v2841_v3, 7  ;;  %s2637_s5 = smov 113   ;;  %s2638_s6 = smov 127  }
  0x5a   : > { %v2856_v7 = vsub.s32 1, %v2841_v3  ;;  %v2859_v8 = vsub.s32 6, %v2841_v3  ;;  %v248_v19 = vsel %vm242_vm1, %v239_v11, %v235_v10  ;;  %v261_v20 = vsel %vm259_vm2, %v252_v12, %v256_v13  ;;  %s5097_s14 = scalar_lea.vmem [#allocation7], %s2820_s4  ;;  %s2391_s17 = sshll.u32 %s2678_s13, 10 }
  0x5b   : > { %vm231_vm3 = vcmp.eq.s32.totalorder %v2844_v4, 15  ;;  %v326_v24 = vadd.f32 %v248_v19, %v2849_v5  ;;  %v247_v25 = vsel %vm242_vm1, %v238_v17, %v234_v16  ;;  %v244_v26 = vsel %vm242_vm1, %v235_v10, %v239_v11  ;;  %s2269_s28 = sshll.u32 %s5097_s14, 4  ;;  %s5168_s27 = scalar_lea.hbm %s5218_s2, %s2391_s17  ;;  %s5170_s28 = int_to_ptr.vmem [resolvable:$true] %s2269_s28 }
  0x5c   : > { %v279_v23 = vrot.slane %v269_v15, %v2856_v7  ;;  %v260_v27 = vsel %vm259_vm2, %v251_v18, %v255_v21  ;;  %v275_v28 = vrot.slane %v268_v22, %v2856_v7  ;;  %v324_v29 = vadd.f32 %v247_v25, %v2862_v9  ;;  %s2255_s25 = scalar_lea.sflag [#allocation4], %s2817_s30  ;;  %s2558_s7 = scalar_lea.vmem %s5170_s28, 1024 }
  0x5d   : > { %v265_v30 = vsel %vm259_vm2, %v256_v13, %v252_v12  ;;  %v334_v32 = vadd.f32 %v326_v24, %v261_v20  ;;  %v327_v34 = vadd.f32 %v244_v26, %v2852_v6  ;;  %v243_v39 = vsel %vm242_vm1, %v234_v16, %v238_v17  ;;  %p2559_p13 = scmp.ne.s32.totalorder %s5170_s28, %s2558_s7  ;;  %p5629_p1 = scmp.ne.s32.totalorder %s5312_s21, 0 }
  0x5e   : > { %v290_v31 = vadd.f32 %v279_v23, %v2849_v5  ;;  %v288_v37 = vadd.f32 %v275_v28, %v2862_v9  ;;  %v332_v38 = vadd.f32 %v324_v29, %v260_v27  ;;  %v264_v40 = vsel %vm259_vm2, %v255_v21, %v251_v18  ;;  %s2639_s13 = smov [#allocation7]  }
  0x5f   : > { %v307_v42 = vrot.slane %v297_v33, %v2859_v8  ;;  %v335_v43 = vadd.f32 %v327_v34, %v265_v30  ;;  %v296_v44 = vmul.f32 2.0, %v2869_v14  ;;  %v325_v46 = vadd.f32 %v243_v39, %v2869_v14  ;;  %v2988_v34 = vld [vmem:[%s2832_s29] sm:$0xff]  ;;  %p2560_p12 = pnand %p2559_p13, %p5629_p1  ;;  %s2562_s8 = sshll.u32 %s2639_s13, 4  ;;  %s2563_s8 = int_to_ptr.vmem [resolvable:$false] %s2562_s8 }
  0x60   : > { %v2910_v41 = vsel %vm228_vm0, %v290_v31, %v334_v32  ;;  %v2918_v45 = vsel %vm228_vm0, %v288_v37, %v332_v38  ;;  %v236_v47 = vrot.slane %v2898_v35, 7  ;;  %v240_v48 = vrot.slane %v2901_v36, 7  ;;  %v2991_v37 = vld [vmem:[%s2832_s29 + $0x8] sm:$0xff]  ;;  %s2564_s16 = scalar_lea.vmem %s2563_s8, 2048  ;;  %p2565_p5 = scmp.lt.s32.totalorder %s5170_s28, %s2563_s8 }
  0x61   : > { %363 = vrot.lane.b32.xlu1 %v2910_v41, %s2636_s20  ;;  %5317 = vst [vmem:[#allocation11_spill] sm:$0xff] %v2918_v45  ;;  %357 = vrot.lane.b32.xlu0 %v2918_v45, %s2636_s20  ;;  %v319_v49 = vadd.f32 %v307_v42, %v2852_v6  ;;  %v303_v50 = vrot.slane %v296_v44, %v2859_v8  ;;  %v253_v51 = vrot.slane %v2898_v35, 1  ;;  %v257_v52 = vrot.slane %v2901_v36, 1  ;;  %p2561_p10 = pneg %p2560_p12  ;;  %p2566_p7 = scmp.lt.s32.totalorder %s2564_s16, %s2558_s7 }
  0x62   : > { %v333_v53 = vadd.f32 %v325_v46, %v264_v40  ;;  %v245_v54 = vsel %vm242_vm1, %v236_v47, %v240_v48  ;;  %v298_v55 = vmul.f32 2.0, %v2901_v36  ;;  %v249_v56 = vsel %vm242_vm1, %v240_v48, %v236_v47 }
  0x63   : > { %v2942_v59 = vsel %vm231_vm3, %v319_v49, %v335_v43  ;;  %v317_v60 = vadd.f32 %v303_v50, %v2869_v14  ;;  %v266_v61 = vsel %vm259_vm2, %v257_v52, %v253_v51  ;;  %v329_v62 = vadd.f32 %v245_v54, %v2901_v36  ;;  %v3009_v49 = vld [vmem:[%s2832_s29 + $0x10] sm:$0xff]  ;;  %v3012_v50 = vld [vmem:[%s2832_s29 + $0x18] sm:$0xff]  ;;  %p2567_p9 = por %p2566_p7, %p2565_p5 }
  0x64   : > { %5318 = vst [vmem:[#allocation12_spill] sm:$0xff] %v2942_v59  ;;  %v311_v63 = vrot.slane %v298_v55, %v2859_v8  ;;  %v262_v10 = vsel %vm259_vm2, %v253_v51, %v257_v52  ;;  %v270_v11 = vmul.f32 2.0, %v2898_v35  ;;  %v328_v12 = vadd.f32 %v249_v56, %v2898_v35 }
  0x65   : > { %366 = vrot.lane.b32.xlu1 %v2942_v59, %s2636_s20  ;;  %v2957_v13 = vsel %vm231_vm3, %v317_v60, %v333_v53  ;;  %v337_v15 = vadd.f32 %v329_v62, %v266_v61  ;;  %v237_v16 = vrot.slane %v2935_v57, 7  ;;  %v241_v17 = vrot.slane %v2938_v58, 7  ;;  %v3035_v62 = vld [vmem:[%s2832_s29 + $0x20] sm:$0xff]  ;;  %p2568_p11 = pnand %p2567_p9, %p2561_p10 }
  0x66   : > { %360 = vrot.lane.b32.xlu0 %v2957_v13, %s2636_s20  ;;  %v321_v18 = vadd.f32 %v311_v63, %v2901_v36  ;;  %v283_v19 = vrot.slane %v270_v11, %v2856_v7  ;;  %v336_v20 = vadd.f32 %v328_v12, %v262_v10  ;;  %v254_v21 = vrot.slane %v2935_v57, 1  ;;  %v3038_v63 = vld [vmem:[%s2832_s29 + $0x28] sm:$0xff] }
  0x67   : > { %v246_v22 = vsel %vm242_vm1, %v237_v16, %v241_v17  ;;  %v258_v23 = vrot.slane %v2938_v58, 1  ;;  %v299_v24 = vmul.f32 2.0, %v2938_v58  ;;  %v250_v25 = vsel %vm242_vm1, %v241_v17, %v237_v16 }
  0x68   : > { %v2974_v26 = vsel %vm231_vm3, %v321_v18, %v337_v15  ;;  %v292_v27 = vadd.f32 %v283_v19, %v2898_v35  ;;  %v331_v28 = vadd.f32 %v246_v22, %v2938_v58  ;;  %v271_v29 = vmul.f32 2.0, %v2935_v57 }
  0x69   : > { %5319 = vst [vmem:[#allocation13_spill] sm:$0xff] %v2974_v26  ;;  %372 = vrot.lane.b32.xlu1 %v2974_v26, %s2636_s20  ;;  %v267_v30 = vsel %vm259_vm2, %v258_v23, %v254_v21  ;;  %v315_v31 = vrot.slane %v299_v24, %v2859_v8  ;;  %v263_v32 = vsel %vm259_vm2, %v254_v21, %v258_v23  ;;  %v597_v46 = vrot.slane %v2988_v34, 7 }
  0x6a   : > { %v330_v33 = vadd.f32 %v250_v25, %v2935_v57  ;;  %v2995_v38 = vsel %vm228_vm0, %v292_v27, %v336_v20  ;;  %v339_v39 = vadd.f32 %v331_v28, %v267_v30  ;;  %v287_v40 = vrot.slane %v271_v29, %v2856_v7  ;;  %v3064_v25 = vld [vmem:[%s2832_s29 + $0x30] sm:$0xff]  ;;  %v3067_v27 = vld [vmem:[%s2832_s29 + $0x38] sm:$0xff] }
  0x6b   : > { %5320 = vst [vmem:[#allocation14_spill] sm:$0xff] %v2995_v38  ;;  %369 = vrot.lane.b32.xlu0 %v2995_v38, %s2636_s20  ;;  %v323_v42 = vadd.f32 %v315_v31, %v2938_v58  ;;  %v601_v47 = vrot.slane %v2991_v37, 7  ;;  %v406_v52 = vmul.f32 2.0, %v2957_v13  ;;  %v629_v53 = vmul.f32 2.0, %v2988_v34 }
  0x6c   : > { %v338_v43 = vadd.f32 %v330_v33, %v263_v32  ;;  %v294_v44 = vadd.f32 %v287_v40, %v2935_v57  ;;  %v613_v54 = vrot.slane %v2988_v34, 1  ;;  %v617_v56 = vrot.slane %v2991_v37, 1 }
  0x6d   : > { %v3006_v48 = vsel %vm231_vm3, %v323_v42, %v339_v39  ;;  %v609_v55 = vsel %vm242_vm1, %v601_v47, %v597_v46  ;;  %v598_v60 = vrot.slane %v3009_v49, 7  ;;  %v602_v61 = vrot.slane %v3012_v50, 7 }
  0x6e   : > { %5321 = vst [vmem:[#allocation15_spill] sm:$0xff] %v3006_v48  ;;  %378 = vrot.lane.b32.xlu1 %v3006_v48, %s2636_s20  ;;  %v3018_v51 = vsel %vm228_vm0, %v294_v44, %v338_v43  ;;  %v409_v10 = vmul.f32 2.0, %v2995_v38  ;;  %v407_v11 = vmul.f32 2.0, %v2910_v41  ;;  %v636_v12 = vrot.slane %v629_v53, %v2856_v7 }
  0x6f   : > { %5322 = vst [vmem:[#allocation16_spill] sm:$0xff] %v3018_v51  ;;  %375 = vrot.lane.b32.xlu0 %v3018_v51, %s2636_s20  ;;  %v685_v15 = vadd.f32 %v609_v55, %v2988_v34  ;;  %v614_v16 = vrot.slane %v3009_v49, 1  ;;  %v618_v17 = vrot.slane %v3012_v50, 1  ;;  %v630_v18 = vmul.f32 2.0, %v3009_v49 }
  0x70   : > { %v621_v19 = vsel %vm259_vm2, %v613_v54, %v617_v56  ;;  %v610_v20 = vsel %vm242_vm1, %v602_v61, %v598_v60  ;;  %v599_v21 = vrot.slane %v3035_v62, 7  ;;  %v603_v22 = vrot.slane %v3038_v63, 7 }
  0x71   : > { %v411_v23 = vmul.f32 2.0, %v3018_v51  ;;  %v649_v24 = vadd.f32 %v636_v12, %v2988_v34  ;;  %v693_v28 = vadd.f32 %v685_v15, %v621_v19  ;;  %v622_v29 = vsel %vm259_vm2, %v614_v16, %v618_v17 }
  0x72   : > { %420 = vperm.xlu1 %2452, %v406_v52   ;;  %v640_v30 = vrot.slane %v630_v18, %v2856_v7  ;;  %v687_v31 = vadd.f32 %v610_v20, %v3009_v49  ;;  %v611_v32 = vsel %vm242_vm1, %v603_v22, %v599_v21  ;;  %v615_v33 = vrot.slane %v3035_v62, 1 }
  0x73   : > { %466 = vperm.xlu0 %2454, %v406_v52   ;;  %v619_v39 = vrot.slane %v3038_v63, 1  ;;  %v631_v40 = vmul.f32 2.0, %v3035_v62  ;;  %v600_v42 = vrot.slane %v3064_v25, 7  ;;  %v604_v43 = vrot.slane %v3067_v27, 7 }
  0x74   : > { %v651_v44 = vadd.f32 %v640_v30, %v3009_v49  ;;  %v695_v52 = vadd.f32 %v687_v31, %v622_v29  ;;  %v689_v53 = vadd.f32 %v611_v32, %v3035_v62  ;;  %v3092_v55 = vsel %vm228_vm0, %v649_v24, %v693_v28 }
  0x75   : > { %5323 = vst [vmem:[#allocation17_spill] sm:$0xff] %v3092_v55  ;;  %v623_v12 = vsel %vm259_vm2, %v615_v33, %v619_v39  ;;  %v644_v15 = vrot.slane %v631_v40, %v2856_v7  ;;  %v612_v18 = vsel %vm242_vm1, %v604_v43, %v600_v42  ;;  %v5225_v19 = vrot.slane %v3064_v25, 1 }
  0x76   : > { %425 = vperm.xlu1 %2452, %v407_v11   ;;  %v5224_v20 = vrot.slane %v3067_v27, 1  ;;  %v3111_v24 = vmul.f32 2.0, %v2918_v45  ;;  %v3117_v28 = vsel %vm228_vm0, %v651_v44, %v695_v52  ;;  %v697_v29 = vadd.f32 %v689_v53, %v623_v12 }
  0x77   : > { %478 = vperm.xlu0 %2454, %v409_v10   ;;  %5324 = vst [vmem:[#allocation18_spill] sm:$0xff] %v3117_v28  ;;  %v605_v30 = vsel %vm242_vm1, %v597_v46, %v601_v47  ;;  %v691_v32 = vadd.f32 %v612_v18, %v3064_v25  ;;  %v657_v40 = vmul.f32 2.0, %v2991_v37  ;;  %v3158_v18 = vmul.f32 %v2869_v14, %v2869_v14 }
  0x78   : > { %v624_v44 = vsel %vm259_vm2, %v5225_v19, %v5224_v20  ;;  %v686_v46 = vadd.f32 %v605_v30, %v2991_v37  ;;  %v3174_v14 = vmul.f32 2.0, %v2974_v26  ;;  %vm356_vm4 = vcmask 1047680  }
  0x79   : > { %v699_v53 = vadd.f32 %v691_v32, %v624_v44  ;;  %v664_v12 = vrot.slane %v657_v40, %v2859_v8  ;;  %v606_v32 = vsel %vm242_vm1, %v598_v60, %v602_v61  ;;  %v626_v60 = vsel %vm259_vm2, %v618_v17, %v614_v16 }
  0x7a   : > { %435 = vperm.xlu1 %2452, %v409_v10   ;;  %v632_v10 = vmul.f32 2.0, %v3064_v25  ;;  %vm2245_vm7 = vcmask 130048  }
  0x7b   : > { %486 = vperm.xlu0 %2454, %v411_v23  }
  0x7c   : > { %v648_v31 = vrot.slane %v632_v10, %v2856_v7  ;;  %v3154_v10 = vmul.f32 %v2862_v9, %v2862_v9 }
  0x7e   : > { %445 = vperm.xlu1 %2452, %v411_v23   ;;  %v653_v23 = vadd.f32 %v644_v15, %v3035_v62  ;;  %v655_v52 = vadd.f32 %v648_v31, %v3064_v25  ;;  %v625_v15 = vsel %vm259_vm2, %v617_v56, %v613_v54  ;;  %v678_v54 = vadd.f32 %v664_v12, %v2991_v37 }
  0x7f   : > { %717 = vrot.lane.b32.xlu0 %v3092_v55, %s2636_s20  ;;  %v694_v56 = vadd.f32 %v686_v46, %v625_v15  ;;  %v965_v9 = vrot.slane %v3154_v10, 7  ;;  %v997_v40 = vmul.f32 2.0, %v3154_v10  ;;  %v3197_v12 = vmul.f32 2.0, %v3006_v48 }
  0x80   : > { %v3142_v47 = vsel %vm228_vm0, %v653_v23, %v697_v29  ;;  %v3161_v29 = vmul.f32 2.0, %v2942_v59  ;;  %v3167_v30 = vsel %vm228_vm0, %v655_v52, %v699_v53  ;;  %v969_v23 = vrot.slane %v3158_v18, 7 }
  0x81   : > { %5325 = vst [vmem:[#allocation19_spill] sm:$0xff] %v3142_v47  ;;  %5326 = vst [vmem:[#allocation20_spill] sm:$0xff] %v3167_v30  ;;  %v3181_v31 = vsel %vm231_vm3, %v678_v54, %v694_v56  ;;  %v981_v52 = vrot.slane %v3154_v10, 1  ;;  %v985_v53 = vrot.slane %v3158_v18, 1  ;;  %v688_v15 = vadd.f32 %v606_v32, %v3012_v50 }
  0x82   : > { %2453 = vset.pattern.permute.xlu1 %v5222_v1  ;;  %v766_v44 = vmul.f32 2.0, %v3181_v31  ;;  %v977_v46 = vsel %vm242_vm1, %v969_v23, %v965_v9  ;;  %v607_v54 = vsel %vm242_vm1, %v599_v21, %v603_v22  ;;  %v659_v56 = vmul.f32 2.0, %v3038_v63 }
  0x83   : > { %462 = vperm.xlu1 %2453, %v3111_v24   ;;  %723 = vrot.lane.b32.xlu0 %v3117_v28, %s2636_s20  ;;  %v1004_v0 = vrot.slane %v997_v40, %v2856_v7  ;;  %v1053_v1 = vadd.f32 %v977_v46, %v3154_v10  ;;  %v769_v16 = vmul.f32 2.0, %v3142_v47  ;;  %v989_v17 = vsel %vm259_vm2, %v981_v52, %v985_v53 }
  0x84   : > { %v696_v22 = vadd.f32 %v688_v15, %v626_v60  ;;  %v690_v32 = vadd.f32 %v607_v54, %v3038_v63  ;;  %v672_v40 = vrot.slane %v659_v56, %v2859_v8  ;;  %v660_v46 = vmul.f32 2.0, %v3067_v27 }
  0x85   : > { %v1017_v20 = vadd.f32 %v1004_v0, %v3154_v10  ;;  %v1061_v19 = vadd.f32 %v1053_v1, %v989_v17  ;;  %v5330_v15 = vrot.slane %v3067_v27, 1 }
  0x86   : > { %v682_v0 = vadd.f32 %v672_v40, %v3038_v63  ;;  %v676_v1 = vrot.slane %v660_v46, %v2859_v8 }
  0x87   : > { %470 = vperm.xlu1 %2453, %v407_v11   ;;  %729 = vrot.lane.b32.xlu0 %v3142_v47, %s2636_s20  ;;  %v658_v11 = vmul.f32 2.0, %v3012_v50 }
  0x89   : > { %v668_v61 = vrot.slane %v658_v11, %v2859_v8  ;;  %v627_v11 = vsel %vm259_vm2, %v619_v39, %v615_v33  ;;  %v608_v33 = vsel %vm242_vm1, %v600_v42, %v604_v43  ;;  %v771_v39 = vmul.f32 2.0, %v3167_v30 }
  0x8a   : > { %v692_v10 = vadd.f32 %v608_v33, %v3067_v27  ;;  %v3250_v42 = vsel %vm228_vm0, %v1017_v20, %v1061_v19  ;;  %v5329_v43 = vrot.slane %v3064_v25, 1  ;;  %v684_v19 = vadd.f32 %v676_v1, %v3067_v27 }
  0x8b   : > { %474 = vperm.xlu1 %2453, %v3161_v29   ;;  %735 = vrot.lane.b32.xlu0 %v3167_v30, %s2636_s20  ;;  %v680_v21 = vadd.f32 %v668_v61, %v3012_v50  ;;  %v698_v61 = vadd.f32 %v690_v32, %v627_v11  ;;  %5328 = vst [vmem:[#allocation22_spill] sm:$0xff] %v3250_v42  ;;  %v1025_v11 = vmul.f32 2.0, %v3158_v18 }
  0x8c   : > { %v628_v54 = vsel %vm259_vm2, %v5330_v15, %v5329_v43 }
  0x8d   : > { %v3242_v60 = vsel %vm231_vm3, %v680_v21, %v696_v22  ;;  %v3264_v56 = vsel %vm231_vm3, %v682_v0, %v698_v61  ;;  %v700_v20 = vadd.f32 %v692_v10, %v628_v54  ;;  %v973_v21 = vsel %vm242_vm1, %v965_v9, %v969_v23 }
  0x8e   : > { %5327 = vst [vmem:[#allocation21_spill] sm:$0xff] %v3242_v60  ;;  %5331 = vst [vmem:[#allocation23_spill] sm:$0xff] %v3264_v56  ;;  %v993_v22 = vsel %vm259_vm2, %v985_v53, %v981_v52  ;;  %v1032_v32 = vrot.slane %v1025_v11, %v2859_v8  ;;  %v1054_v40 = vadd.f32 %v973_v21, %v3158_v18  ;;  %v767_v61 = vmul.f32 2.0, %v3117_v28 }
  0x8f   : > { %482 = vperm.xlu1 %2453, %v3174_v14   ;;  %826 = vperm.xlu0 %2454, %v766_v44   ;;  %v3271_v17 = vsel %vm231_vm3, %v684_v19, %v700_v20  ;;  %v3289_v9 = vmul.f32 2.0, %v3092_v55  ;;  %v5333_v23 = vmov 14  }
  0x90   : > { %5332 = vst [vmem:[#allocation24_spill] sm:$0xff] %v3271_v17  ;;  %v1046_v46 = vadd.f32 %v1032_v32, %v3158_v18  ;;  %v1062_v33 = vadd.f32 %v1054_v40, %v993_v22  ;;  %v3294_v18 = vmul.f32 2.0, %v3242_v60  ;;  %v3302_v52 = vmul.f32 2.0, %v3271_v17 }
  0x92   : > { %v3286_v0 = vsel %vm231_vm3, %v1046_v46, %v1062_v33  ;;  %5334 = vst [vmem:[#allocation25_spill] sm:$0xff] %v3294_v18  ;;  %5336 = vst [vmem:[#allocation27_spill] sm:$0xff] %v3302_v52 }
  0x93   : > { %490 = vperm.xlu1 %2453, %v3197_v12   ;;  %838 = vperm.xlu0 %2454, %v769_v16  }
  0x97   : > { %720 = vrot.lane.b32.xlu1 %v3181_v31, %s2636_s20  ;;  %846 = vperm.xlu0 %2454, %v771_v39  }
  0x98   : > { %2455 = vset.pattern.permute.xlu1 %v5226_v2 }
  0x9b   : > { %726 = vrot.lane.b32.xlu1 %v3242_v60, %s2636_s20  ;;  %1085 = vrot.lane.b32.xlu0 %v3250_v42, %s2636_s20 }
  0x9f   : > { %732 = vrot.lane.b32.xlu1 %v3264_v56, %s2636_s20 }
  0xa3   : > { %738 = vrot.lane.b32.xlu1 %v3271_v17, %s2636_s20 }
  0xa7   : > { %780 = vperm.xlu1 %2455, %v766_v44   ;;  %v3298_v44 = vmul.f32 2.0, %v3264_v56 }
  0xa9   : > { %5335 = vst [vmem:[#allocation26_spill] sm:$0xff] %v3298_v44 }
  0xab   : > { %785 = vperm.xlu1 %2455, %v767_v61  }
  0xaf   : > { %795 = vperm.xlu1 %2455, %v769_v16  }
  0xb3   : > { %805 = vperm.xlu1 %2455, %v771_v39  }
  0xb7   : > { %2456 = vset.pattern.permute.xlu1 %v5333_v23 }
  0xb8   : > { %822 = vperm.xlu1 %2456, %v3289_v9  }
  0xbc   : > { %830 = vperm.xlu1 %2456, %v767_v61  }
  0xc0   : > { %834 = vperm.xlu1 %2456, %v3294_v18  }
  0xc4   : > { %842 = vperm.xlu1 %2456, %v3298_v44  }
  0xc8   : > { %850 = vperm.xlu1 %2456, %v3302_v52  }
  0xcc   : > { %2457 = vset.pattern.permute.xlu1 %v5226_v2  ;;  %v3384_v2 = vmul.f32 %v2938_v58, %v2938_v58 }
  0xd3   : > { %v364_v53 = vpop.permute.xlu1 %363  ;;  %v358_v16 = vpop.permute.xlu0 %357 }
  0xd4   : > { %v359_v39 = vsel %vm356_vm4, %v358_v16, %v2918_v45  ;;  %v365_v43 = vsel %vm356_vm4, %v364_v53, %v2910_v41 }
  0xd5   : > { %381 = vrot.lane.b32.xlu0 %v359_v39, %s2636_s20 }
  0xd7   : > { %v367_v1 = vpop.permute.xlu1 %366 }
  0xd8   : > { %v361_v10 = vpop.permute.xlu0 %360  ;;  %v368_v19 = vsel %vm356_vm4, %v367_v1, %v2942_v59  ;;  %v3342_v1 = vmul.f32 %v2849_v5, %v2849_v5  ;;  %v3360_v5 = vmul.f32 %v2901_v36, %v2901_v36 }
  0xd9   : > { %385 = vrot.lane.b32.xlu0 %v365_v43, %s2636_s20  ;;  %v362_v15 = vsel %vm356_vm4, %v361_v10, %v2957_v13  ;;  %v3346_v10 = vmul.f32 %v2852_v6, %v2852_v6 }
  0xda   : > { %383 = vrot.lane.b32.xlu1 %v362_v15, %s2636_s20  ;;  %v5369_v18 = vrot.slane %v3360_v5, 1 }
  0xdb   : > { %v373_v54 = vpop.permute.xlu1 %372 }
  0xdc   : > { %v374_v21 = vsel %vm356_vm4, %v373_v54, %v2974_v26  ;;  %v5228_v54 = vrot.slane %v3342_v1, 7 }
  0xdd   : > { %v370_v20 = vpop.permute.xlu0 %369 }
  0xde   : > { %387 = vrot.lane.b32.xlu1 %v368_v19, %s2636_s20  ;;  %v371_v11 = vsel %vm356_vm4, %v370_v20, %v2995_v38  ;;  %v5229_v19 = vrot.slane %v3346_v10, 7 }
  0xdf   : > { %389 = vrot.lane.b32.xlu0 %v371_v11, %s2636_s20  ;;  %v3356_v11 = vmul.f32 %v2898_v35, %v2898_v35 }
  0xe0   : > { %v379_v32 = vpop.permute.xlu1 %378 }
  0xe1   : > { %v376_v22 = vpop.permute.xlu0 %375  ;;  %v380_v46 = vsel %vm356_vm4, %v379_v32, %v3006_v48  ;;  %v5230_v32 = vrot.slane %v3346_v10, 1  ;;  %v999_v58 = vmul.f32 2.0, %v3356_v11 }
  0xe2   : > { %391 = vrot.lane.b32.xlu1 %v374_v21, %s2636_s20  ;;  %v377_v40 = vsel %vm356_vm4, %v376_v22, %v3018_v51  ;;  %v998_v21 = vmul.f32 2.0, %v3342_v1  ;;  %v978_v22 = vsel %vm242_vm1, %v5229_v19, %v5228_v54 }
  0xe3   : > { %393 = vrot.lane.b32.xlu0 %v377_v40, %s2636_s20  ;;  %v1055_v35 = vadd.f32 %v978_v22, %v3342_v1 }
  0xe4   : > { %v1008_v19 = vrot.slane %v998_v21, %v2856_v7  ;;  %v5348_v21 = vrot.slane %v3360_v5, 7 }
  0xe6   : > { %395 = vrot.lane.b32.xlu1 %v380_v46, %s2636_s20  ;;  %v1019_v46 = vadd.f32 %v1008_v19, %v3342_v1  ;;  %v5353_v19 = vrot.slane %v3384_v2, 7 }
  0xf1   : > { %v3330_v33 = vpop.permute.xlu1 %420 }
  0xf2   : > { %5337 = vst [vmem:[#allocation28_spill] sm:$0xff] %v3330_v33  ;;  %v3332_v61 = vpop.permute.xlu0 %466  ;;  %v5368_v33 = vrot.slane %v3356_v11, 1 }
  0xf3   : > { %5338 = vst [vmem:[#allocation29_spill] sm:$0xff] %v3332_v61 }
  0xf5   : > { %v3334_v53 = vpop.permute.xlu1 %425 }
  0xf6   : > { %5339 = vst [vmem:[#allocation30_spill] sm:$0xff] %v3334_v53  ;;  %v3336_v16 = vpop.permute.xlu0 %478  ;;  %v1012_v53 = vrot.slane %v999_v58, %v2856_v7  ;;  %v988_v58 = vrot.slane %v3384_v2, 1 }
  0xf7   : > { %5340 = vst [vmem:[#allocation31_spill] sm:$0xff] %v3336_v16 }
  0xf9   : > { %v3338_v39 = vpop.permute.xlu1 %435 }
  0xfa   : > { %5341 = vst [vmem:[#allocation32_spill] sm:$0xff] %v3338_v39  ;;  %v3348_v43 = vpop.permute.xlu0 %486 }
  0xfb   : > { %5342 = vst [vmem:[#allocation33_spill] sm:$0xff] %v3348_v43  ;;  %v5350_v43 = vrot.slane %v3360_v5, 1 }
  0xfd   : > { %v3350_v15 = vpop.permute.xlu1 %445 }
  0xfe   : > { %5343 = vst [vmem:[#allocation34_spill] sm:$0xff] %v3350_v15  ;;  %v718_v20 = vpop.permute.xlu0 %717 }
  0xff   : > { %v719_v6 = vsel %vm356_vm4, %v718_v20, %v3092_v55  ;;  %v5345_v20 = vrot.slane %v3342_v1, 1 }
 0x100   : > { %741 = vrot.lane.b32.xlu0 %v719_v6, %s2636_s20  ;;  %v3380_v6 = vmul.f32 %v2935_v57, %v2935_v57 }
 0x101   : > { %v990_v57 = vsel %vm259_vm2, %v5345_v20, %v5230_v32  ;;  %v5351_v20 = vrot.slane %v3356_v11, 1 }
 0x102   : > { %v724_v36 = vpop.permute.xlu0 %723  ;;  %v3374_v40 = vpop.permute.xlu1 %462  ;;  %v1063_v39 = vadd.f32 %v1055_v35, %v990_v57  ;;  %v984_v57 = vrot.slane %v3380_v6, 1 }
 0x103   : > { %5344 = vst [vmem:[#allocation35_spill] sm:$0xff] %v3374_v40  ;;  %v725_v54 = vsel %vm356_vm4, %v724_v36, %v3117_v28 }
 0x104   : > { %745 = vrot.lane.b32.xlu0 %v725_v54, %s2636_s20  ;;  %v5347_v54 = vrot.slane %v3356_v11, 7  ;;  %v992_v52 = vsel %vm259_vm2, %v984_v57, %v988_v58 }
 0x106   : > { %v730_v40 = vpop.permute.xlu0 %729  ;;  %v3399_v15 = vpop.permute.xlu1 %470  ;;  %v979_v22 = vsel %vm242_vm1, %v5348_v21, %v5347_v54  ;;  %v1000_v54 = vmul.f32 2.0, %v3380_v6 }
 0x107   : > { %5346 = vst [vmem:[#allocation36_spill] sm:$0xff] %v3399_v15  ;;  %v731_v32 = vsel %vm356_vm4, %v730_v40, %v3142_v47  ;;  %v1057_v16 = vadd.f32 %v979_v22, %v3356_v11  ;;  %v991_v40 = vsel %vm259_vm2, %v5351_v20, %v5350_v43  ;;  %v1021_v43 = vadd.f32 %v1012_v53, %v3356_v11 }
 0x108   : > { %749 = vrot.lane.b32.xlu0 %v731_v32, %s2636_s20  ;;  %v5352_v32 = vrot.slane %v3380_v6, 7  ;;  %v1016_v15 = vrot.slane %v1000_v54, %v2856_v7 }
 0x109   : > { %v1065_v20 = vadd.f32 %v1057_v16, %v991_v40 }
 0x10a   : > { %v736_v21 = vpop.permute.xlu0 %735  ;;  %v3417_v36 = vpop.permute.xlu1 %474  ;;  %v980_v35 = vsel %vm242_vm1, %v5353_v19, %v5352_v32  ;;  %v1023_v53 = vadd.f32 %v1016_v15, %v3380_v6 }
 0x10b   : > { %5349 = vst [vmem:[#allocation37_spill] sm:$0xff] %v3417_v36  ;;  %v737_v22 = vsel %vm356_vm4, %v736_v21, %v3167_v30  ;;  %v3438_v36 = vsel %vm228_vm0, %v1019_v46, %v1063_v39  ;;  %v1059_v32 = vadd.f32 %v980_v35, %v3380_v6  ;;  %v3453_v39 = vsel %vm228_vm0, %v1021_v43, %v1065_v20 }
 0x10c   : > { %753 = vrot.lane.b32.xlu0 %v737_v22, %s2636_s20  ;;  %5354 = vst [vmem:[#allocation38_spill] sm:$0xff] %v3438_v36  ;;  %5357 = vst [vmem:[#allocation41_spill] sm:$0xff] %v3453_v39 }
 0x10d   : > { %v1067_v16 = vadd.f32 %v1059_v32, %v992_v52  ;;  %v1026_v32 = vmul.f32 2.0, %v3346_v10 }
 0x10e   : > { %v3443_v19 = vpop.permute.xlu1 %482  ;;  %v3447_v44 = vpop.permute.xlu0 %826 }
 0x10f   : > { %5355 = vst [vmem:[#allocation39_spill] sm:$0xff] %v3443_v19  ;;  %5356 = vst [vmem:[#allocation40_spill] sm:$0xff] %v3447_v44  ;;  %v3464_v21 = vsel %vm228_vm0, %v1023_v53, %v1067_v16  ;;  %v5362_v53 = vrot.slane %v3346_v10, 7  ;;  %v5363_v16 = vrot.slane %v3342_v1, 7 }
 0x110   : > { %1091 = vrot.lane.b32.xlu0 %v3438_v36, %s2636_s20  ;;  %5360 = vst [vmem:[#allocation44_spill] sm:$0xff] %v3464_v21 }
 0x112   : > { %v3456_v46 = vpop.permute.xlu1 %490  ;;  %v3458_v54 = vpop.permute.xlu0 %838 }
 0x113   : > { %5358 = vst [vmem:[#allocation42_spill] sm:$0xff] %v3456_v46  ;;  %5359 = vst [vmem:[#allocation43_spill] sm:$0xff] %v3458_v54  ;;  %v5364_v46 = vrot.slane %v3342_v1, 1  ;;  %v1028_v54 = vmul.f32 2.0, %v3384_v2 }
 0x114   : > { %1097 = vrot.lane.b32.xlu0 %v3453_v39, %s2636_s20 }
 0x116   : > { %v721_v40 = vpop.permute.xlu1 %720  ;;  %v3466_v35 = vpop.permute.xlu0 %846 }
 0x117   : > { %5361 = vst [vmem:[#allocation45_spill] sm:$0xff] %v3466_v35  ;;  %v722_v22 = vsel %vm356_vm4, %v721_v40, %v3181_v31  ;;  %v974_v40 = vsel %vm242_vm1, %v5363_v16, %v5362_v53  ;;  %v1027_v35 = vmul.f32 2.0, %v3360_v5  ;;  %v5366_v16 = vrot.slane %v3360_v5, 7 }
 0x118   : > { %1103 = vrot.lane.b32.xlu0 %v3464_v21, %s2636_s20  ;;  %743 = vrot.lane.b32.xlu1 %v722_v22, %s2636_s20 }
 0x11a   : > { %v727_v52 = vpop.permute.xlu1 %726  ;;  %v1086_v15 = vpop.permute.xlu0 %1085 }
 0x11b   : > { %v728_v43 = vsel %vm356_vm4, %v727_v52, %v3242_v60  ;;  %v1087_v20 = vsel %vm356_vm4, %v1086_v15, %v3250_v42  ;;  %v1036_v15 = vrot.slane %v1026_v32, %v2859_v8 }
 0x11c   : > { %747 = vrot.lane.b32.xlu1 %v728_v43, %s2636_s20  ;;  %1109 = vrot.lane.b32.xlu0 %v1087_v20, %s2636_s20  ;;  %v1056_v43 = vadd.f32 %v974_v40, %v3346_v10  ;;  %v5365_v20 = vrot.slane %v3346_v10, 1 }
 0x11d   : > { %v1048_v1 = vadd.f32 %v1036_v15, %v3346_v10  ;;  %v1044_v15 = vrot.slane %v1028_v54, %v2859_v8 }
 0x11e   : > { %v733_v22 = vpop.permute.xlu1 %732  ;;  %v994_v19 = vsel %vm259_vm2, %v5365_v20, %v5364_v46  ;;  %v1040_v46 = vrot.slane %v1027_v35, %v2859_v8 }
 0x11f   : > { %v734_v52 = vsel %vm356_vm4, %v733_v22, %v3264_v56  ;;  %v5367_v22 = vrot.slane %v3356_v11, 7  ;;  %v1064_v40 = vadd.f32 %v1056_v43, %v994_v19  ;;  %v1052_v43 = vadd.f32 %v1044_v15, %v3384_v2 }
 0x120   : > { %751 = vrot.lane.b32.xlu1 %v734_v52, %s2636_s20  ;;  %v1050_v11 = vadd.f32 %v1040_v46, %v3360_v5 }
 0x121   : > { %v975_v52 = vsel %vm242_vm1, %v5367_v22, %v5366_v16  ;;  %v995_v16 = vsel %vm259_vm2, %v5369_v18, %v5368_v33  ;;  %v5371_v22 = vrot.slane %v3380_v6, 7  ;;  %v3527_v19 = vsel %vm231_vm3, %v1048_v1, %v1064_v40 }
 0x122   : > { %v739_v53 = vpop.permute.xlu1 %738  ;;  %v1058_v20 = vadd.f32 %v975_v52, %v3360_v5  ;;  %5372 = vst [vmem:[#allocation46_spill] sm:$0xff] %v3527_v19  ;;  %v996_v33 = vsel %vm259_vm2, %v988_v58, %v984_v57 }
 0x123   : > { %v740_v32 = vsel %vm356_vm4, %v739_v53, %v3271_v17  ;;  %v5370_v53 = vrot.slane %v3384_v2, 7 }
 0x124   : > { %755 = vrot.lane.b32.xlu1 %v740_v32, %s2636_s20  ;;  %v1066_v35 = vadd.f32 %v1058_v20, %v995_v16 }
 0x125   : > { %v976_v10 = vsel %vm242_vm1, %v5371_v22, %v5370_v53 }
 0x126   : > { %v1060_v18 = vadd.f32 %v976_v10, %v3384_v2  ;;  %v3538_v6 = vsel %vm231_vm3, %v1050_v11, %v1066_v35  ;;  %v3549_v57 = vpop.permute.xlu1 %780 }
 0x127   : > { %5373 = vst [vmem:[#allocation47_spill] sm:$0xff] %v3538_v6  ;;  %5375 = vst [vmem:[#allocation49_spill] sm:$0xff] %v3549_v57 }
 0x128   : > { %1088 = vrot.lane.b32.xlu1 %v3286_v0, %s2636_s20  ;;  %v1068_v52 = vadd.f32 %v1060_v18, %v996_v33 }
 0x12a   : > { %v3545_v5 = vsel %vm231_vm3, %v1052_v43, %v1068_v52  ;;  %v3551_v58 = vpop.permute.xlu1 %785 }
 0x12b   : > { %5374 = vst [vmem:[#allocation48_spill] sm:$0xff] %v3545_v5  ;;  %5376 = vst [vmem:[#allocation50_spill] sm:$0xff] %v3551_v58 }
 0x12c   : > { %1094 = vrot.lane.b32.xlu1 %v3527_v19, %s2636_s20 }
 0x12e   : > { %v3553_v54 = vpop.permute.xlu1 %795 }
 0x12f   : > { %5377 = vst [vmem:[#allocation51_spill] sm:$0xff] %v3553_v54 }
 0x130   : > { %1100 = vrot.lane.b32.xlu1 %v3538_v6, %s2636_s20 }
 0x132   : > { %v3555_v32 = vpop.permute.xlu1 %805 }
 0x133   : > { %5378 = vst [vmem:[#allocation52_spill] sm:$0xff] %v3555_v32 }
 0x134   : > { %1106 = vrot.lane.b32.xlu1 %v3545_v5, %s2636_s20 }
 0x137   : > { %v3557_v2 = vpop.permute.xlu1 %822 }
 0x138   : > { %5379 = vst [vmem:[#allocation53_spill] sm:$0xff] %v3557_v2 }
 0x13b   : > { %v3559_v1 = vpop.permute.xlu1 %830 }
 0x13c   : > { %5380 = vst [vmem:[#allocation54_spill] sm:$0xff] %v3559_v1 }
 0x13f   : > { %v3561_v46 = vpop.permute.xlu1 %834 }
 0x140   : > { %5381 = vst [vmem:[#allocation55_spill] sm:$0xff] %v3561_v46 }
 0x143   : > { %v3563_v53 = vpop.permute.xlu1 %842 }
 0x144   : > { %5382 = vst [vmem:[#allocation56_spill] sm:$0xff] %v3563_v53 }
 0x147   : > { %v382_v40 = vpop.permute.xlu0 %381  ;;  %v3565_v10 = vpop.permute.xlu1 %850 }
 0x148   : > { %5383 = vst [vmem:[#allocation57_spill] sm:$0xff] %v3565_v10 }
 0x14b   : > { %v386_v20 = vpop.permute.xlu0 %385 }
 0x14c   : > { %v3567_v35 = vpop.permute.xlu1 %383 }
 0x150   : > { %v3569_v18 = vpop.permute.xlu1 %387 }
 0x151   : > { %v390_v16 = vpop.permute.xlu0 %389 }
 0x154   : > { %v3571_v52 = vpop.permute.xlu1 %391 }
 0x155   : > { %v394_v22 = vpop.permute.xlu0 %393 }
 0x158   : > { %v3576_v53 = vpop.permute.xlu1 %395 }
 0x172   : > { %v742_v11 = vpop.permute.xlu0 %741 }
 0x176   : > { %v746_v15 = vpop.permute.xlu0 %745 }
 0x17a   : > { %v750_v33 = vpop.permute.xlu0 %749 }
 0x17e   : > { %v754_v43 = vpop.permute.xlu0 %753 }
 0x182   : > { %v1092_v2 = vpop.permute.xlu0 %1091 }
 0x183   : > { %v1093_v46 = vsel %vm356_vm4, %v1092_v2, %v3438_v36  ;;  %v1134_v2 = vmul.f32 2.0, %v3286_v0 }
 0x184   : > { %1113 = vrot.lane.b32.xlu0 %v1093_v46, %s2636_s20 }
 0x186   : > { %v1098_v32 = vpop.permute.xlu0 %1097 }
 0x187   : > { %v1099_v10 = vsel %vm356_vm4, %v1098_v32, %v3453_v39  ;;  %v397_v32 = vsel %vm356_vm4, %v382_v40, %v2918_v45  ;;  %v403_v40 = vsel %vm356_vm4, %v394_v22, %v3018_v51  ;;  %v757_v22 = vsel %vm356_vm4, %v742_v11, %v3092_v55 }
 0x188   : > { %1117 = vrot.lane.b32.xlu0 %v1099_v10, %s2636_s20  ;;  %v763_v11 = vsel %vm356_vm4, %v754_v43, %v3167_v30  ;;  %v402_v43 = vsel %vm356_vm4, %v3571_v52, %v2974_v26  ;;  %v2493_v30 = vld [vmem:[%s2832_s29 + $0x28] sm:$0xff] }
 0x18a   : > { %v1104_v54 = vpop.permute.xlu0 %1103  ;;  %v3581_v58 = vpop.permute.xlu1 %743 }
 0x18b   : > { %v1105_v1 = vsel %vm356_vm4, %v1104_v54, %v3464_v21  ;;  %v399_v54 = vsel %vm356_vm4, %v386_v20, %v2910_v41 }
 0x18c   : > { %1121 = vrot.lane.b32.xlu0 %v1105_v1, %s2636_s20  ;;  %v401_v1 = vsel %vm356_vm4, %v390_v16, %v2995_v38 }
 0x18e   : > { %v3587_v57 = vpop.permute.xlu1 %747 }
 0x190   : > { %1194 = vperm.xlu0 %2454, %v1134_v2  }
 0x192   : > { %v3589_v46 = vpop.permute.xlu1 %751 }
 0x194   : > { %509 = vrot.lane.b32.xlu0 %v397_v32, %s2637_s5 }
 0x196   : > { %v3594_v10 = vpop.permute.xlu1 %755 }
 0x198   : > { %513 = vrot.lane.b32.xlu0 %v399_v54, %s2637_s5 }
 0x19a   : > { %v1089_v61 = vpop.permute.xlu1 %1088 }
 0x19b   : > { %v1090_v44 = vsel %vm356_vm4, %v1089_v61, %v3286_v0 }
 0x19c   : > { %517 = vrot.lane.b32.xlu0 %v401_v1, %s2637_s5  ;;  %1111 = vrot.lane.b32.xlu1 %v1090_v44, %s2636_s20 }
 0x19e   : > { %v1095_v45 = vpop.permute.xlu1 %1094 }
 0x19f   : > { %v1096_v20 = vsel %vm356_vm4, %v1095_v45, %v3527_v19  ;;  %v3621_v45 = vmul.f32 2.0, %v3438_v36 }
 0x1a0   : > { %521 = vrot.lane.b32.xlu0 %v403_v40, %s2637_s5  ;;  %1115 = vrot.lane.b32.xlu1 %v1096_v20, %s2636_s20  ;;  %v762_v20 = vsel %vm356_vm4, %v3589_v46, %v3264_v56 }
 0x1a2   : > { %v1101_v16 = vpop.permute.xlu1 %1100 }
 0x1a3   : > { %v1102_v38 = vsel %vm356_vm4, %v1101_v16, %v3538_v6  ;;  %v764_v16 = vsel %vm356_vm4, %v3594_v10, %v3271_v17  ;;  %v3698_v10 = vmul.f32 %v2988_v34, %v2988_v34  ;;  %v3712_v34 = vmul.f32 2.0, %v3527_v19 }
 0x1a4   : > { %541 = vrot.lane.b32.xlu0 %v397_v32, %s2638_s6  ;;  %1119 = vrot.lane.b32.xlu1 %v1102_v38, %s2636_s20  ;;  %v1137_v38 = vmul.f32 2.0, %v3453_v39  ;;  %v1139_v32 = vmul.f32 2.0, %v3464_v21 }
 0x1a6   : > { %v1107_v44 = vpop.permute.xlu1 %1106 }
 0x1a7   : > { %v1108_v61 = vsel %vm356_vm4, %v1107_v44, %v3545_v5 }
 0x1a8   : > { %545 = vrot.lane.b32.xlu0 %v399_v54, %s2638_s6  ;;  %1123 = vrot.lane.b32.xlu1 %v1108_v61, %s2636_s20  ;;  %v761_v54 = vsel %vm356_vm4, %v750_v33, %v3142_v47  ;;  %v400_v33 = vsel %vm356_vm4, %v3569_v18, %v2942_v59  ;;  %v1110_v18 = vpop.permute.xlu0 %1109  ;;  %v3702_v61 = vmul.f32 %v2991_v37, %v2991_v37 }
 0x1a9   : > { %v1125_v52 = vsel %vm356_vm4, %v1110_v18, %v3250_v42  ;;  %v3716_v37 = vmul.f32 %v3009_v49, %v3009_v49  ;;  %v5239_v49 = vrot.slane %v3698_v10, 1  ;;  %v3744_v18 = vmul.f32 %v3038_v63, %v3038_v63 }
 0x1ab   : > { %v1411_v17 = vmul.f32 2.0, %v3744_v18 }
 0x1ac   : > { %549 = vrot.lane.b32.xlu0 %v401_v1, %s2638_s6  ;;  %1148 = vperm.xlu1 %2457, %v1134_v2   ;;  %v759_v2 = vsel %vm356_vm4, %v746_v15, %v3117_v28  ;;  %v3636_v1 = vmul.f32 2.0, %v3250_v42  ;;  %v398_v15 = vsel %vm356_vm4, %v3567_v35, %v2957_v13  ;;  %v404_v35 = vsel %vm356_vm4, %v3576_v53, %v3006_v48 }
 0x1ad   : > { %v758_v53 = vsel %vm356_vm4, %v3581_v58, %v3181_v31 }
 0x1b0   : > { %553 = vrot.lane.b32.xlu0 %v403_v40, %s2638_s6  ;;  %1153 = vperm.xlu1 %2457, %v3621_v45   ;;  %v760_v40 = vsel %vm356_vm4, %v3587_v57, %v3242_v60 }
 0x1b4   : > { %869 = vrot.lane.b32.xlu0 %v757_v22, %s2637_s5  ;;  %1163 = vperm.xlu1 %2457, %v1137_v38  }
 0x1b8   : > { %873 = vrot.lane.b32.xlu0 %v759_v2, %s2637_s5  ;;  %1173 = vperm.xlu1 %2457, %v1139_v32  }
 0x1bc   : > { %877 = vrot.lane.b32.xlu0 %v761_v54, %s2637_s5  ;;  %2458 = vset.pattern.permute.xlu1 %v5333_v23 }
 0x1bd   : > { %1190 = vperm.xlu1 %2458, %v3636_v1  }
 0x1c0   : > { %881 = vrot.lane.b32.xlu0 %v763_v11, %s2637_s5 }
 0x1c1   : > { %511 = vrot.lane.b32.xlu1 %v398_v15, %s2637_s5 }
 0x1c4   : > { %901 = vrot.lane.b32.xlu0 %v757_v22, %s2638_s6 }
 0x1c5   : > { %515 = vrot.lane.b32.xlu1 %v400_v33, %s2637_s5 }
 0x1c8   : > { %905 = vrot.lane.b32.xlu0 %v759_v2, %s2638_s6  ;;  %v5247_v2 = vrot.slane %v3702_v61, 7 }
 0x1c9   : > { %519 = vrot.lane.b32.xlu1 %v402_v43, %s2637_s5 }
 0x1cc   : > { %909 = vrot.lane.b32.xlu0 %v761_v54, %s2638_s6  ;;  %v3720_v54 = vmul.f32 %v3012_v50, %v3012_v50  ;;  %v5238_v50 = vrot.slane %v3702_v61, 1 }
 0x1cd   : > { %523 = vrot.lane.b32.xlu1 %v404_v35, %s2637_s5 }
 0x1d0   : > { %913 = vrot.lane.b32.xlu0 %v763_v11, %s2638_s6  ;;  %v3724_v11 = vmul.f32 2.0, %v3538_v6 }
 0x1d1   : > { %543 = vrot.lane.b32.xlu1 %v398_v15, %s2638_s6  ;;  %v1381_v15 = vmul.f32 2.0, %v3698_v10 }
 0x1d4   : > { %1206 = vperm.xlu0 %2454, %v1137_v38  }
 0x1d5   : > { %547 = vrot.lane.b32.xlu1 %v400_v33, %s2638_s6  ;;  %v5240_v33 = vrot.slane %v3716_v37, 7 }
 0x1d8   : > { %1214 = vperm.xlu0 %2454, %v1139_v32   ;;  %v5244_v32 = vrot.slane %v3698_v10, 7 }
 0x1d9   : > { %551 = vrot.lane.b32.xlu1 %v402_v43, %s2638_s6  ;;  %v5241_v43 = vrot.slane %v3720_v54, 7 }
 0x1db   : > { %v1362_v63 = vsel %vm242_vm1, %v5241_v43, %v5240_v33 }
 0x1dc   : > { %1237 = vrot.lane.b32.xlu0 %v1125_v52, %s2637_s5 }
 0x1dd   : > { %555 = vrot.lane.b32.xlu1 %v404_v35, %s2638_s6  ;;  %v3740_v35 = vmul.f32 %v3035_v62, %v3035_v62  ;;  %v1373_v62 = vsel %vm259_vm2, %v5239_v49, %v5238_v50  ;;  %v1439_v49 = vadd.f32 %v1362_v63, %v3716_v37 }
 0x1e1   : > { %871 = vrot.lane.b32.xlu1 %v758_v53, %s2637_s5 }
 0x1e5   : > { %875 = vrot.lane.b32.xlu1 %v760_v40, %s2637_s5 }
 0x1e9   : > { %879 = vrot.lane.b32.xlu1 %v762_v20, %s2637_s5 }
 0x1ed   : > { %883 = vrot.lane.b32.xlu1 %v764_v16, %s2637_s5 }
 0x1f1   : > { %903 = vrot.lane.b32.xlu1 %v758_v53, %s2638_s6  ;;  %v1388_v53 = vrot.slane %v1381_v15, %v2856_v7 }
 0x1f3   : > { %v1401_v15 = vadd.f32 %v1388_v53, %v3698_v10 }
 0x1f5   : > { %907 = vrot.lane.b32.xlu1 %v760_v40, %s2638_s6 }
 0x1f6   : > { %v1114_v58 = vpop.permute.xlu0 %1113 }
 0x1f7   : > { %v1127_v57 = vsel %vm356_vm4, %v1114_v58, %v3438_v36  ;;  %v5242_v58 = vrot.slane %v3720_v54, 1  ;;  %v2495_v36 = vld [vmem:[%s2832_s29 + $0x30] sm:$0xff] }
 0x1f8   : > { %1241 = vrot.lane.b32.xlu0 %v1127_v57, %s2637_s5 }
 0x1f9   : > { %911 = vrot.lane.b32.xlu1 %v762_v20, %s2638_s6  ;;  %v1382_v20 = vmul.f32 2.0, %v3716_v37 }
 0x1fa   : > { %v1118_v46 = vpop.permute.xlu0 %1117 }
 0x1fb   : > { %v1129_v44 = vsel %vm356_vm4, %v1118_v46, %v3453_v39  ;;  %v5246_v46 = vrot.slane %v3744_v18, 7  ;;  %v1392_v50 = vrot.slane %v1382_v20, %v2856_v7  ;;  %v2490_v39 = vld [vmem:[%s2824_s19 + $0x20] sm:$0xff] }
 0x1fc   : > { %1245 = vrot.lane.b32.xlu0 %v1129_v44, %s2637_s5 }
 0x1fd   : > { %915 = vrot.lane.b32.xlu1 %v764_v16, %s2638_s6  ;;  %v5243_v16 = vrot.slane %v3716_v37, 1 }
 0x1fe   : > { %v1122_v38 = vpop.permute.xlu0 %1121 }
 0x1ff   : > { %v1131_v22 = vsel %vm356_vm4, %v1122_v38, %v3464_v21  ;;  %v3772_v38 = vmul.f32 %v3064_v25, %v3064_v25  ;;  %v1374_v25 = vsel %vm259_vm2, %v5243_v16, %v5242_v58  ;;  %v1403_v16 = vadd.f32 %v1392_v50, %v3716_v37 }
 0x200   : > { %1249 = vrot.lane.b32.xlu0 %v1131_v22, %s2637_s5 }
 0x201   : > { %1198 = vperm.xlu1 %2458, %v3621_v45   ;;  %v1361_v45 = vsel %vm242_vm1, %v5247_v2, %v5244_v32  ;;  %v1447_v32 = vadd.f32 %v1439_v49, %v1374_v25  ;;  %v5384_v49 = vrot.slane %v3772_v38, 7  ;;  %v5386_v25 = vmov 1  }
 0x202   : > { %v1437_v40 = vadd.f32 %v1361_v45, %v3698_v10  ;;  %v3776_v45 = vmul.f32 %v3067_v27, %v3067_v27  ;;  %v5249_v27 = vrot.slane %v3740_v35, 1 }
 0x204   : > { %1269 = vrot.lane.b32.xlu0 %v1125_v52, %s2638_s6  ;;  %v3748_v52 = vmul.f32 2.0, %v3545_v5  ;;  %v1445_v33 = vadd.f32 %v1437_v40, %v1373_v62  ;;  %v5248_v40 = vrot.slane %v3744_v18, 1  ;;  %v1384_v62 = vmul.f32 2.0, %v3772_v38 }
 0x205   : > { %1202 = vperm.xlu1 %2458, %v3712_v34   ;;  %v5385_v50 = vrot.slane %v3776_v45, 7  ;;  %v5388_v42 = vrot.slane %v3776_v45, 1 }
 0x208   : > { %1273 = vrot.lane.b32.xlu0 %v1127_v57, %s2638_s6  ;;  %v5245_v57 = vrot.slane %v3740_v35, 7 }
 0x209   : > { %1210 = vperm.xlu1 %2458, %v3724_v11  }
 0x20a   : > { %v1363_v53 = vsel %vm242_vm1, %v5246_v46, %v5245_v57  ;;  %v3809_v57 = vsel %vm228_vm0, %v1401_v15, %v1445_v33  ;;  %v1364_v33 = vsel %vm242_vm1, %v5385_v50, %v5384_v49 }
 0x20b   : > { %v1441_v2 = vadd.f32 %v1363_v53, %v3740_v35 }
 0x20c   : > { %1277 = vrot.lane.b32.xlu0 %v1129_v44, %s2638_s6  ;;  %v1383_v44 = vmul.f32 2.0, %v3740_v35 }
 0x20d   : > { %1218 = vperm.xlu1 %2458, %v3748_v52  }
 0x20e   : > { %v1112_v43 = vpop.permute.xlu1 %1111  ;;  %v1396_v46 = vrot.slane %v1383_v44, %v2856_v7 }
 0x20f   : > { %v3800_v63 = vpop.permute.xlu0 %1194  ;;  %v1126_v58 = vsel %vm356_vm4, %v1112_v43, %v3286_v0  ;;  %v1443_v43 = vadd.f32 %v1364_v33, %v3772_v38 }
 0x210   : > { %1281 = vrot.lane.b32.xlu0 %v1131_v22, %s2638_s6  ;;  %v1375_v22 = vsel %vm259_vm2, %v5249_v27, %v5248_v40  ;;  %v3837_v40 = vsel %vm228_vm0, %v1403_v16, %v1447_v32  ;;  %v1405_v49 = vadd.f32 %v1396_v46, %v3740_v35  ;;  %v1400_v27 = vrot.slane %v1384_v62, %v2856_v7 }
 0x211   : > { %1239 = vrot.lane.b32.xlu1 %v1126_v58, %s2637_s5  ;;  %v1449_v50 = vadd.f32 %v1441_v2, %v1375_v22 }
 0x212   : > { %v1116_v20 = vpop.permute.xlu1 %1115  ;;  %2459 = vset.pattern.permute.xlu1 %v5386_v25  ;;  %v1407_v16 = vadd.f32 %v1400_v27, %v3772_v38  ;;  %v1409_v27 = vmul.f32 2.0, %v3702_v61 }
 0x213   : > { %v3829_v44 = vpop.permute.xlu0 %509  ;;  %v1128_v53 = vsel %vm356_vm4, %v1116_v20, %v3527_v19  ;;  %v5389_v20 = vrot.slane %v3772_v38, 1  ;;  %v3858_v2 = vsel %vm228_vm0, %v1405_v49, %v1449_v50  ;;  %v5396_v49 = vrot.slane %v3698_v10, 7 }
 0x214   : > { %5387 = vst [vmem:[#allocation58_spill] sm:$0xff] %v3829_v44  ;;  %1469 = vrot.lane.b32.xlu0 %v3809_v57, %s2636_s20  ;;  %5390 = vst [vmem:[#allocation59_spill] sm:$0xff] %v3858_v2 }
 0x215   : > { %1243 = vrot.lane.b32.xlu1 %v1128_v53, %s2637_s5  ;;  %v1376_v44 = vsel %vm259_vm2, %v5389_v20, %v5388_v42  ;;  %v1410_v20 = vmul.f32 2.0, %v3720_v54 }
 0x216   : > { %v1120_v15 = vpop.permute.xlu1 %1119  ;;  %v1451_v46 = vadd.f32 %v1443_v43, %v1376_v44  ;;  %v5395_v44 = vrot.slane %v3702_v61, 7 }
 0x217   : > { %v3849_v55 = vpop.permute.xlu0 %513  ;;  %v1130_v32 = vsel %vm356_vm4, %v1120_v15, %v3538_v6  ;;  %v5400_v6 = vrot.slane %v3698_v10, 1 }
 0x218   : > { %1475 = vrot.lane.b32.xlu0 %v3837_v40, %s2636_s20  ;;  %v3870_v33 = vsel %vm228_vm0, %v1407_v16, %v1451_v46  ;;  %v1357_v50 = vsel %vm242_vm1, %v5396_v49, %v5395_v44  ;;  %v1416_v16 = vrot.slane %v1409_v27, %v2859_v8  ;;  %v5401_v44 = vrot.slane %v3702_v61, 1 }
 0x219   : > { %1247 = vrot.lane.b32.xlu1 %v1130_v32, %s2637_s5  ;;  %5392 = vst [vmem:[#allocation61_spill] sm:$0xff] %v3870_v33  ;;  %v1438_v46 = vadd.f32 %v1357_v50, %v3702_v61  ;;  %v1420_v27 = vrot.slane %v1410_v20, %v2859_v8 }
 0x21a   : > { %v1124_v62 = vpop.permute.xlu1 %1123  ;;  %v1430_v50 = vadd.f32 %v1416_v16, %v3702_v61 }
 0x21b   : > { %v3861_v22 = vpop.permute.xlu0 %517  ;;  %v1132_v42 = vsel %vm356_vm4, %v1124_v62, %v3545_v5  ;;  %v5398_v62 = vrot.slane %v3716_v37, 7 }
 0x21c   : > { %5391 = vst [vmem:[#allocation60_spill] sm:$0xff] %v3861_v22  ;;  %1481 = vrot.lane.b32.xlu0 %v3858_v2, %s2636_s20 }
 0x21d   : > { %1251 = vrot.lane.b32.xlu1 %v1132_v42, %s2637_s5 }
 0x21f   : > { %v3872_v15 = vpop.permute.xlu0 %521 }
 0x220   : > { %5393 = vst [vmem:[#allocation62_spill] sm:$0xff] %v3872_v15  ;;  %1487 = vrot.lane.b32.xlu0 %v3870_v33, %s2636_s20 }
 0x221   : > { %1271 = vrot.lane.b32.xlu1 %v1126_v58, %s2638_s6  ;;  %v5397_v58 = vrot.slane %v3720_v54, 7 }
 0x223   : > { %v3878_v43 = vpop.permute.xlu0 %541  ;;  %v1358_v5 = vsel %vm242_vm1, %v5398_v62, %v5397_v58  ;;  %v5402_v58 = vrot.slane %v3716_v37, 1  ;;  %v5403_v62 = vrot.slane %v3720_v54, 1  ;;  %v1432_v37 = vadd.f32 %v1420_v27, %v3720_v54 }
 0x224   : > { %5394 = vst [vmem:[#allocation63_spill] sm:$0xff] %v3878_v43  ;;  %v1440_v49 = vadd.f32 %v1358_v5, %v3720_v54  ;;  %v5406_v5 = vrot.slane %v3740_v35, 7  ;;  %v5412_v27 = vrot.slane %v3772_v38, 7 }
 0x225   : > { %1275 = vrot.lane.b32.xlu1 %v1128_v53, %s2638_s6  ;;  %v1377_v53 = vsel %vm259_vm2, %v5401_v44, %v5400_v6  ;;  %v1378_v10 = vsel %vm259_vm2, %v5403_v62, %v5402_v58 }
 0x226   : > { %v1446_v19 = vadd.f32 %v1438_v46, %v1377_v53  ;;  %v1448_v20 = vadd.f32 %v1440_v49, %v1378_v10  ;;  %v1424_v46 = vrot.slane %v1411_v17, %v2859_v8  ;;  %v1412_v53 = vmul.f32 2.0, %v3776_v45 }
 0x227   : > { %v3896_v43 = vpop.permute.xlu0 %545 }
 0x228   : > { %5399 = vst [vmem:[#allocation64_spill] sm:$0xff] %v3896_v43  ;;  %v3929_v16 = vsel %vm231_vm3, %v1430_v50, %v1446_v19  ;;  %v5411_v19 = vrot.slane %v3776_v45, 7  ;;  %v3954_v49 = vsel %vm231_vm3, %v1432_v37, %v1448_v20  ;;  %v1428_v10 = vrot.slane %v1412_v53, %v2859_v8 }
 0x229   : > { %1279 = vrot.lane.b32.xlu1 %v1130_v32, %s2638_s6  ;;  %v5405_v32 = vrot.slane %v3744_v18, 7 }
 0x22a   : > { %v1360_v17 = vsel %vm242_vm1, %v5412_v27, %v5411_v19  ;;  %v5416_v19 = vrot.slane %v3776_v45, 1  ;;  %v1436_v37 = vadd.f32 %v1428_v10, %v3776_v45 }
 0x22b   : > { %v3915_v56 = vpop.permute.xlu0 %549  ;;  %v3917_v6 = vpop.permute.xlu1 %1148  ;;  %v1359_v61 = vsel %vm242_vm1, %v5406_v5, %v5405_v32  ;;  %v5409_v32 = vrot.slane %v3740_v35, 1  ;;  %v1434_v35 = vadd.f32 %v1424_v46, %v3744_v18  ;;  %v1444_v5 = vadd.f32 %v1360_v17, %v3776_v45 }
 0x22c   : > { %5404 = vst [vmem:[#allocation65_spill] sm:$0xff] %v3915_v56  ;;  %v1442_v44 = vadd.f32 %v1359_v61, %v3744_v18 }
 0x22d   : > { %1283 = vrot.lane.b32.xlu1 %v1132_v42, %s2638_s6  ;;  %v5410_v42 = vrot.slane %v3744_v18, 1 }
 0x22f   : > { %v3934_v58 = vpop.permute.xlu0 %553  ;;  %v3936_v62 = vpop.permute.xlu1 %1153  ;;  %v1379_v54 = vsel %vm259_vm2, %v5410_v42, %v5409_v32  ;;  %v5415_v42 = vrot.slane %v3772_v38, 1 }
 0x230   : > { %5407 = vst [vmem:[#allocation66_spill] sm:$0xff] %v3934_v58  ;;  %5408 = vst [vmem:[#allocation67_spill] sm:$0xff] %v3936_v62  ;;  %v1450_v50 = vadd.f32 %v1442_v44, %v1379_v54  ;;  %v2483_v62 = vld [vmem:[%s2832_s29] sm:$0xff] }
 0x231   : > { %1472 = vrot.lane.b32.xlu1 %v3929_v16, %s2636_s20  ;;  %v1380_v27 = vsel %vm259_vm2, %v5416_v19, %v5415_v42 }
 0x232   : > { %v3973_v18 = vsel %vm231_vm3, %v1434_v35, %v1450_v50  ;;  %v1452_v20 = vadd.f32 %v1444_v5, %v1380_v27 }
 0x233   : > { %v3959_v61 = vpop.permute.xlu0 %869  ;;  %v3961_v32 = vpop.permute.xlu1 %1163  ;;  %v4340_v3 = vmul.f32 2.0, %v3973_v18 }
 0x234   : > { %5413 = vst [vmem:[#allocation68_spill] sm:$0xff] %v3959_v61  ;;  %5414 = vst [vmem:[#allocation69_spill] sm:$0xff] %v3961_v32  ;;  %v3984_v38 = vsel %vm231_vm3, %v1436_v37, %v1452_v20 }
 0x235   : > { %1478 = vrot.lane.b32.xlu1 %v3954_v49, %s2636_s20 }
 0x237   : > { %v3976_v46 = vpop.permute.xlu0 %873  ;;  %v3978_v44 = vpop.permute.xlu1 %1173 }
 0x238   : > { %5417 = vst [vmem:[#allocation70_spill] sm:$0xff] %v3976_v46  ;;  %5418 = vst [vmem:[#allocation71_spill] sm:$0xff] %v3978_v44 }
 0x239   : > { %1484 = vrot.lane.b32.xlu1 %v3973_v18, %s2636_s20 }
 0x23b   : > { %v3986_v53 = vpop.permute.xlu0 %877 }
 0x23c   : > { %5419 = vst [vmem:[#allocation72_spill] sm:$0xff] %v3986_v53  ;;  %v3988_v54 = vpop.permute.xlu1 %1190 }
 0x23d   : > { %5420 = vst [vmem:[#allocation73_spill] sm:$0xff] %v3988_v54  ;;  %1490 = vrot.lane.b32.xlu1 %v3984_v38, %s2636_s20 }
 0x23f   : > { %v3992_v45 = vpop.permute.xlu0 %881 }
 0x240   : > { %5421 = vst [vmem:[#allocation74_spill] sm:$0xff] %v3992_v45  ;;  %v3994_v17 = vpop.permute.xlu1 %511  ;;  %v2492_v45 = vld [vmem:[%s2824_s19 + $0x28] sm:$0xff] }
 0x243   : > { %v3996_v35 = vpop.permute.xlu0 %901 }
 0x244   : > { %5422 = vst [vmem:[#allocation75_spill] sm:$0xff] %v3996_v35  ;;  %v3998_v50 = vpop.permute.xlu1 %515 }
 0x245   : > { %5423 = vst [vmem:[#allocation76_spill] sm:$0xff] %v3998_v50 }
 0x247   : > { %v4000_v10 = vpop.permute.xlu0 %905 }
 0x248   : > { %5424 = vst [vmem:[#allocation77_spill] sm:$0xff] %v4000_v10  ;;  %v4002_v5 = vpop.permute.xlu1 %519 }
 0x249   : > { %5425 = vst [vmem:[#allocation78_spill] sm:$0xff] %v4002_v5 }
 0x24b   : > { %v4006_v19 = vpop.permute.xlu0 %909 }
 0x24c   : > { %v4004_v42 = vpop.permute.xlu1 %523  ;;  %5427 = vst [vmem:[#allocation80_spill] sm:$0xff] %v4006_v19 }
 0x24d   : > { %5426 = vst [vmem:[#allocation79_spill] sm:$0xff] %v4004_v42 }
 0x24f   : > { %v4010_v37 = vpop.permute.xlu0 %913 }
 0x250   : > { %v4008_v27 = vpop.permute.xlu1 %543  ;;  %5428 = vst [vmem:[#allocation81_spill] sm:$0xff] %v4010_v37 }
 0x253   : > { %v4016_v61 = vpop.permute.xlu0 %1206 }
 0x254   : > { %v4012_v20 = vpop.permute.xlu1 %547  ;;  %5431 = vst [vmem:[#allocation84_spill] sm:$0xff] %v4016_v61  ;;  %v2482_v61 = vld [vmem:[%s2824_s19] sm:$0xff] }
 0x255   : > { %5429 = vst [vmem:[#allocation82_spill] sm:$0xff] %v4012_v20 }
 0x257   : > { %v4020_v60 = vpop.permute.xlu0 %1214 }
 0x258   : > { %v4014_v54 = vpop.permute.xlu1 %551  ;;  %5433 = vst [vmem:[#allocation86_spill] sm:$0xff] %v4020_v60 }
 0x259   : > { %5430 = vst [vmem:[#allocation83_spill] sm:$0xff] %v4014_v54 }
 0x25b   : > { %v4026_v5 = vpop.permute.xlu0 %1237 }
 0x25c   : > { %v4018_v35 = vpop.permute.xlu1 %555  ;;  %5435 = vst [vmem:[#allocation88_spill] sm:$0xff] %v4026_v5 }
 0x25d   : > { %5432 = vst [vmem:[#allocation85_spill] sm:$0xff] %v4018_v35 }
 0x260   : > { %v4022_v48 = vpop.permute.xlu1 %871 }
 0x264   : > { %v4024_v42 = vpop.permute.xlu1 %875 }
 0x265   : > { %5434 = vst [vmem:[#allocation87_spill] sm:$0xff] %v4024_v42 }
 0x268   : > { %v4028_v26 = vpop.permute.xlu1 %879 }
 0x269   : > { %5436 = vst [vmem:[#allocation89_spill] sm:$0xff] %v4028_v26 }
 0x26a   : > { %v4030_v20 = vpop.permute.xlu0 %1241 }
 0x26b   : > { %5437 = vst [vmem:[#allocation90_spill] sm:$0xff] %v4030_v20  ;;  %v2494_v20 = vld [vmem:[%s2824_s19 + $0x30] sm:$0xff] }
 0x26c   : > { %v4032_v54 = vpop.permute.xlu1 %883  ;;  %v4126_v53 = vmul.f32 %v2495_v36, %v2494_v20 }
 0x26d   : > { %5438 = vst [vmem:[#allocation91_spill] sm:$0xff] %v4032_v54 }
 0x26e   : > { %v4034_v50 = vpop.permute.xlu0 %1245 }
 0x26f   : > { %5439 = vst [vmem:[#allocation92_spill] sm:$0xff] %v4034_v50 }
 0x270   : > { %v4036_v35 = vpop.permute.xlu1 %903 }
 0x272   : > { %v4038_v59 = vpop.permute.xlu0 %1249 }
 0x273   : > { %5440 = vst [vmem:[#allocation93_spill] sm:$0xff] %v4038_v59  ;;  %v4056_v59 = vmul.f32 %v2483_v62, %v2482_v61  ;;  %v2488_v62 = vld [vmem:[%s2824_s19 + $0x18] sm:$0xff] }
 0x274   : > { %v4040_v44 = vpop.permute.xlu1 %907  ;;  %v2489_v61 = vld [vmem:[%s2832_s29 + $0x18] sm:$0xff] }
 0x275   : > { %5441 = vst [vmem:[#allocation94_spill] sm:$0xff] %v4040_v44  ;;  %v2484_v44 = vld [vmem:[%s2824_s19 + $0x8] sm:$0xff]  ;;  %v4074_v50 = vmul.f32 %v2489_v61, %v2488_v62  ;;  %v5283_v62 = vrot.slane %v4056_v59, 1 }
 0x276   : > { %v4042_v42 = vpop.permute.xlu0 %1269 }
 0x277   : > { %5442 = vst [vmem:[#allocation95_spill] sm:$0xff] %v4042_v42  ;;  %v2485_v42 = vld [vmem:[%s2832_s29 + $0x8] sm:$0xff]  ;;  %v5456_v20 = vrot.slane %v4074_v50, 1  ;;  %v5478_v43 = vrot.slane %v4074_v50, 1 }
 0x278   : > { %v4044_v5 = vpop.permute.xlu1 %911  ;;  %v4060_v21 = vmul.f32 %v2485_v42, %v2484_v44 }
 0x279   : > { %5443 = vst [vmem:[#allocation96_spill] sm:$0xff] %v4044_v5 }
 0x27a   : > { %v4046_v26 = vpop.permute.xlu0 %1273  ;;  %v5278_v58 = vrot.slane %v4060_v21, 7  ;;  %v5284_v61 = vrot.slane %v4060_v21, 1 }
 0x27b   : > { %5444 = vst [vmem:[#allocation97_spill] sm:$0xff] %v4046_v26  ;;  %v2487_v26 = vld [vmem:[%s2832_s29 + $0x10] sm:$0xff] }
 0x27c   : > { %v4048_v60 = vpop.permute.xlu1 %915 }
 0x27d   : > { %5445 = vst [vmem:[#allocation98_spill] sm:$0xff] %v4048_v60 }
 0x27e   : > { %v4050_v54 = vpop.permute.xlu0 %1277 }
 0x27f   : > { %5446 = vst [vmem:[#allocation99_spill] sm:$0xff] %v4050_v54  ;;  %v2486_v54 = vld [vmem:[%s2824_s19 + $0x10] sm:$0xff] }
 0x280   : > { %v4052_v32 = vpop.permute.xlu1 %1198 }
 0x281   : > { %5447 = vst [vmem:[#allocation100_spill] sm:$0xff] %v4052_v32  ;;  %v4070_v32 = vmul.f32 %v2487_v26, %v2486_v54  ;;  %v5451_v26 = vrot.slane %v4056_v59, 7 }
 0x282   : > { %v4062_v5 = vpop.permute.xlu0 %1281 }
 0x283   : > { %5448 = vst [vmem:[#allocation101_spill] sm:$0xff] %v4062_v5  ;;  %v1741_v54 = vsel %vm242_vm1, %v5451_v26, %v5278_v58  ;;  %v4098_v26 = vmul.f32 %v2493_v30, %v2492_v45  ;;  %v1761_v30 = vsel %vm259_vm2, %v5284_v61, %v5283_v62  ;;  %v5453_v45 = vrot.slane %v4074_v50, 7  ;;  %v2496_v62 = vld [vmem:[%s2824_s19 + $0x38] sm:$0xff] }
 0x284   : > { %v4064_v37 = vpop.permute.xlu1 %1202  ;;  %v2497_v61 = vld [vmem:[%s2832_s29 + $0x38] sm:$0xff]  ;;  %v5455_v36 = vrot.slane %v4070_v32, 1  ;;  %v5479_v22 = vrot.slane %v4070_v32, 1 }
 0x285   : > { %5449 = vst [vmem:[#allocation102_spill] sm:$0xff] %v4064_v37  ;;  %v1793_v37 = vmul.f32 2.0, %v4060_v21  ;;  %v4130_v47 = vmul.f32 %v2497_v61, %v2496_v62  ;;  %v1795_v61 = vmul.f32 2.0, %v4098_v26  ;;  %v5457_v10 = vrot.slane %v4098_v26, 7 }
 0x286   : > { %v1470_v44 = vpop.permute.xlu0 %1469  ;;  %v1762_v62 = vsel %vm259_vm2, %v5456_v20, %v5455_v36 }
 0x287   : > { %v1471_v42 = vsel %vm356_vm4, %v1470_v44, %v3809_v57  ;;  %v1800_v44 = vrot.slane %v1793_v37, %v2859_v8 }
 0x288   : > { %1493 = vrot.lane.b32.xlu0 %v1471_v42, %s2636_s20  ;;  %v4079_v60 = vpop.permute.xlu1 %1210 }
 0x289   : > { %5450 = vst [vmem:[#allocation103_spill] sm:$0xff] %v4079_v60  ;;  %v2491_v60 = vld [vmem:[%s2832_s29 + $0x20] sm:$0xff] }
 0x28a   : > { %v1476_v42 = vpop.permute.xlu0 %1475  ;;  %v4094_v19 = vmul.f32 %v2491_v60, %v2490_v39  ;;  %v1822_v60 = vadd.f32 %v1741_v54, %v4060_v21  ;;  %v1794_v39 = vmul.f32 2.0, %v4074_v50  ;;  %v1814_v54 = vadd.f32 %v1800_v44, %v4060_v21 }
 0x28b   : > { %v1477_v58 = vsel %vm356_vm4, %v1476_v42, %v3837_v40 }
 0x28c   : > { %1497 = vrot.lane.b32.xlu0 %v1477_v58, %s2636_s20  ;;  %v4103_v5 = vpop.permute.xlu1 %1218  ;;  %v5454_v58 = vrot.slane %v4070_v32, 7  ;;  %v1804_v15 = vrot.slane %v1794_v39, %v2859_v8  ;;  %v1830_v37 = vadd.f32 %v1822_v60, %v1761_v30  ;;  %v5458_v44 = vrot.slane %v4094_v19, 7 }
 0x28d   : > { %5452 = vst [vmem:[#allocation104_spill] sm:$0xff] %v4103_v5  ;;  %v5287_v60 = vrot.slane %v4098_v26, 1  ;;  %v1796_v30 = vmul.f32 2.0, %v4130_v47 }
 0x28e   : > { %v1742_v42 = vsel %vm242_vm1, %v5454_v58, %v5453_v45  ;;  %v1482_v5 = vpop.permute.xlu0 %1481  ;;  %v1743_v39 = vsel %vm242_vm1, %v5458_v44, %v5457_v10  ;;  %v4165_v46 = vsel %vm231_vm3, %v1814_v54, %v1830_v37  ;;  %v1808_v10 = vrot.slane %v1795_v61, %v2859_v8 }
 0x28f   : > { %v1483_v45 = vsel %vm356_vm4, %v1482_v5, %v3858_v2  ;;  %v1824_v51 = vadd.f32 %v1742_v42, %v4074_v50  ;;  %v1816_v5 = vadd.f32 %v1804_v15, %v4074_v50  ;;  %5460 = vst [vmem:[#allocation106_spill] sm:$0xff] %v4165_v46  ;;  %v1826_v44 = vadd.f32 %v1743_v39, %v4098_v26 }
 0x290   : > { %1501 = vrot.lane.b32.xlu0 %v1483_v45, %s2636_s20  ;;  %v4135_v58 = vpop.permute.xlu1 %1239  ;;  %v5461_v42 = vrot.slane %v4094_v19, 1  ;;  %v5462_v15 = vrot.slane %v4130_v47, 7  ;;  %v5288_v54 = vrot.slane %v4126_v53, 1 }
 0x291   : > { %v1832_v56 = vadd.f32 %v1824_v51, %v1762_v62  ;;  %v5463_v51 = vrot.slane %v4126_v53, 7  ;;  %v5289_v62 = vrot.slane %v4130_v47, 1 }
 0x292   : > { %v1488_v45 = vpop.permute.xlu0 %1487 }
 0x293   : > { %v1489_v36 = vsel %vm356_vm4, %v1488_v45, %v3870_v33  ;;  %v1763_v45 = vsel %vm259_vm2, %v5287_v60, %v5461_v42  ;;  %v1744_v37 = vsel %vm242_vm1, %v5463_v51, %v5462_v15  ;;  %v4190_v39 = vsel %vm231_vm3, %v1816_v5, %v1832_v56 }
 0x294   : > { %1505 = vrot.lane.b32.xlu0 %v1489_v36, %s2636_s20  ;;  %v4160_v20 = vpop.permute.xlu1 %1243  ;;  %5465 = vst [vmem:[#allocation108_spill] sm:$0xff] %v4190_v39  ;;  %v1818_v42 = vadd.f32 %v1808_v10, %v4098_v26  ;;  %v1834_v36 = vadd.f32 %v1826_v44, %v1763_v45  ;;  %v1812_v60 = vrot.slane %v1796_v30, %v2859_v8  ;;  %v1518_v45 = vmul.f32 2.0, %v3929_v16 }
 0x295   : > { %5459 = vst [vmem:[#allocation105_spill] sm:$0xff] %v4160_v20  ;;  %v1828_v15 = vadd.f32 %v1744_v37, %v4130_v47  ;;  %v1764_v51 = vsel %vm259_vm2, %v5289_v62, %v5288_v54  ;;  %v5476_v20 = vrot.slane %v4060_v21, 1 }
 0x296   : > { %v4207_v56 = vsel %vm231_vm3, %v1818_v42, %v1834_v36  ;;  %v1820_v8 = vadd.f32 %v1812_v60, %v4130_v47  ;;  %v1521_v60 = vmul.f32 2.0, %v3858_v2  ;;  %v1523_v36 = vmul.f32 2.0, %v3870_v33 }
 0x297   : > { %5467 = vst [vmem:[#allocation110_spill] sm:$0xff] %v4207_v56  ;;  %v1836_v5 = vadd.f32 %v1828_v15, %v1764_v51 }
 0x298   : > { %1856 = vrot.lane.b32.xlu0 %v4165_v46, %s2636_s20  ;;  %v4186_v61 = vpop.permute.xlu1 %1247 }
 0x299   : > { %5464 = vst [vmem:[#allocation107_spill] sm:$0xff] %v4186_v61  ;;  %v4216_v10 = vsel %vm231_vm3, %v1820_v8, %v1836_v5 }
 0x29a   : > { %5468 = vst [vmem:[#allocation111_spill] sm:$0xff] %v4216_v10 }
 0x29c   : > { %1862 = vrot.lane.b32.xlu0 %v4190_v39, %s2636_s20  ;;  %v4203_v61 = vpop.permute.xlu1 %1251 }
 0x29d   : > { %5466 = vst [vmem:[#allocation109_spill] sm:$0xff] %v4203_v61 }
 0x2a0   : > { %1868 = vrot.lane.b32.xlu0 %v4207_v56, %s2636_s20  ;;  %v4212_v30 = vpop.permute.xlu1 %1271 }
 0x2a4   : > { %1874 = vrot.lane.b32.xlu0 %v4216_v10, %s2636_s20  ;;  %v4220_v44 = vpop.permute.xlu1 %1275 }
 0x2a5   : > { %5469 = vst [vmem:[#allocation112_spill] sm:$0xff] %v4220_v44 }
 0x2a8   : > { %1578 = vperm.xlu0 %2454, %v1518_v45   ;;  %v4223_v37 = vpop.permute.xlu1 %1279 }
 0x2a9   : > { %5470 = vst [vmem:[#allocation113_spill] sm:$0xff] %v4223_v37  ;;  %v5475_v37 = vrot.slane %v4074_v50, 7 }
 0x2ac   : > { %1590 = vperm.xlu0 %2454, %v1521_v60   ;;  %v4226_v42 = vpop.permute.xlu1 %1283 }
 0x2ad   : > { %5471 = vst [vmem:[#allocation114_spill] sm:$0xff] %v4226_v42 }
 0x2b0   : > { %1598 = vperm.xlu0 %2454, %v1523_v36   ;;  %v1473_v4 = vpop.permute.xlu1 %1472 }
 0x2b1   : > { %v1474_v15 = vsel %vm356_vm4, %v1473_v4, %v3929_v16  ;;  %v1765_v4 = vmul.f32 2.0, %v4056_v59 }
 0x2b2   : > { %1495 = vrot.lane.b32.xlu1 %v1474_v15, %s2636_s20  ;;  %v5472_v15 = vrot.slane %v4056_v59, 7 }
 0x2b3   : > { %v1772_v61 = vrot.slane %v1765_v4, %v2856_v7 }
 0x2b4   : > { %v1479_v51 = vpop.permute.xlu1 %1478 }
 0x2b5   : > { %v1480_v8 = vsel %vm356_vm4, %v1479_v51, %v3954_v49  ;;  %v5473_v51 = vrot.slane %v4060_v21, 7  ;;  %v1758_v21 = vsel %vm259_vm2, %v5479_v22, %v5478_v43  ;;  %v1768_v43 = vmul.f32 2.0, %v4126_v53 }
 0x2b6   : > { %1499 = vrot.lane.b32.xlu1 %v1480_v8, %s2636_s20 }
 0x2b7   : > { %v1745_v8 = vsel %vm242_vm1, %v5473_v51, %v5472_v15  ;;  %v5477_v15 = vrot.slane %v4056_v59, 1 }
 0x2b8   : > { %v1485_v5 = vpop.permute.xlu1 %1484 }
 0x2b9   : > { %v1486_v54 = vsel %vm356_vm4, %v1485_v5, %v3973_v18  ;;  %v1519_v5 = vmul.f32 2.0, %v3837_v40 }
 0x2ba   : > { %1503 = vrot.lane.b32.xlu1 %v1486_v54, %s2636_s20  ;;  %v1766_v54 = vmul.f32 2.0, %v4070_v32 }
 0x2bc   : > { %v1491_v62 = vpop.permute.xlu1 %1490  ;;  %v1776_v51 = vrot.slane %v1766_v54, %v2856_v7 }
 0x2bd   : > { %v1492_v42 = vsel %vm356_vm4, %v1491_v62, %v3984_v38  ;;  %v1821_v62 = vadd.f32 %v1745_v8, %v4056_v59  ;;  %v1785_v8 = vadd.f32 %v1772_v61, %v4056_v59 }
 0x2be   : > { %1507 = vrot.lane.b32.xlu1 %v1492_v42, %s2636_s20  ;;  %v5474_v42 = vrot.slane %v4070_v32, 7  ;;  %v1787_v59 = vadd.f32 %v1776_v51, %v4070_v32 }
 0x2c0   : > { %v1746_v44 = vsel %vm242_vm1, %v5475_v37, %v5474_v42  ;;  %v1767_v37 = vmul.f32 2.0, %v4094_v19  ;;  %v5480_v42 = vrot.slane %v4094_v19, 7 }
 0x2c1   : > { %v1823_v4 = vadd.f32 %v1746_v44, %v4070_v32  ;;  %v5484_v32 = vrot.slane %v4126_v53, 7 }
 0x2c2   : > { %1532 = vperm.xlu1 %2459, %v1518_v45   ;;  %v1757_v45 = vsel %vm259_vm2, %v5477_v15, %v5476_v20  ;;  %v5481_v20 = vrot.slane %v4098_v26, 7  ;;  %v1780_v44 = vrot.slane %v1767_v37, %v2856_v7  ;;  %v5483_v15 = vrot.slane %v4094_v19, 1 }
 0x2c3   : > { %v1829_v28 = vadd.f32 %v1821_v62, %v1757_v45  ;;  %v1831_v61 = vadd.f32 %v1823_v4, %v1758_v21  ;;  %v5482_v62 = vrot.slane %v4098_v26, 1  ;;  %v5485_v45 = vrot.slane %v4130_v47, 7 }
 0x2c4   : > { %v1747_v54 = vsel %vm242_vm1, %v5481_v20, %v5480_v42  ;;  %v1789_v26 = vadd.f32 %v1780_v44, %v4094_v19  ;;  %v5486_v37 = vrot.slane %v4130_v47, 1  ;;  %v5487_v42 = vrot.slane %v4126_v53, 1 }
 0x2c5   : > { %v4283_v50 = vsel %vm228_vm0, %v1785_v8, %v1829_v28  ;;  %v1825_v22 = vadd.f32 %v1747_v54, %v4094_v19  ;;  %v1748_v28 = vsel %vm242_vm1, %v5485_v45, %v5484_v32  ;;  %v4304_v51 = vsel %vm228_vm0, %v1787_v59, %v1831_v61 }
 0x2c6   : > { %1537 = vperm.xlu1 %2459, %v1519_v5   ;;  %v1784_v8 = vrot.slane %v1768_v43, %v2856_v7  ;;  %v1827_v21 = vadd.f32 %v1748_v28, %v4126_v53  ;;  %v1760_v20 = vsel %vm259_vm2, %v5487_v42, %v5486_v37  ;;  %v4331_v47 = vmul.f32 2.0, %v3809_v57 }
 0x2c8   : > { %v1791_v19 = vadd.f32 %v1784_v8, %v4126_v53  ;;  %v1835_v59 = vadd.f32 %v1827_v21, %v1760_v20  ;;  %v4336_v53 = vmul.f32 2.0, %v3954_v49 }
 0x2ca   : > { %1547 = vperm.xlu1 %2459, %v1521_v60   ;;  %v1759_v60 = vsel %vm259_vm2, %v5483_v15, %v5482_v62  ;;  %v4326_v7 = vsel %vm228_vm0, %v1791_v19, %v1835_v59 }
 0x2cb   : > { %v1833_v4 = vadd.f32 %v1825_v22, %v1759_v60 }
 0x2cd   : > { %v4319_v54 = vsel %vm228_vm0, %v1789_v26, %v1833_v4 }
 0x2ce   : > { %1853 = vrot.lane.b32.xlu1 %v4283_v50, %s2636_s20 }
 0x2d2   : > { %1859 = vrot.lane.b32.xlu1 %v4304_v51, %s2636_s20 }
 0x2d6   : > { %1865 = vrot.lane.b32.xlu1 %v4319_v54, %s2636_s20 }
 0x2da   : > { %1871 = vrot.lane.b32.xlu1 %v4326_v7, %s2636_s20 }
 0x2de   : > { %1557 = vperm.xlu1 %2459, %v1523_v36   ;;  %v4344_v36 = vmul.f32 2.0, %v3984_v38 }
 0x2e2   : > { %2460 = vset.pattern.permute.xlu1 %v5333_v23 }
 0x2e3   : > { %1574 = vperm.xlu1 %2460, %v4331_v47  }
 0x2e7   : > { %1582 = vperm.xlu1 %2460, %v1519_v5  }
 0x2eb   : > { %1586 = vperm.xlu1 %2460, %v4336_v53  }
 0x2ef   : > { %1594 = vperm.xlu1 %2460, %v4340_v3  }
 0x2f3   : > { %1602 = vperm.xlu1 %2460, %v4344_v36  }
 0x2f7   : > { %2461 = vset.pattern.permute.xlu1 %v5386_v25 }
 0x2fa   : > { %v1494_v61 = vpop.permute.xlu0 %1493 }
 0x2fe   : > { %v4348_v44 = vpop.permute.xlu0 %1497 }
 0x302   : > { %v4350_v5 = vpop.permute.xlu0 %1501 }
 0x306   : > { %v4352_v22 = vpop.permute.xlu0 %1505 }
 0x30a   : > { %v1857_v43 = vpop.permute.xlu0 %1856 }
 0x30b   : > { %v1858_v62 = vsel %vm356_vm4, %v1857_v43, %v4165_v46 }
 0x30c   : > { %1879 = vrot.lane.b32.xlu1 %v1858_v62, %s2636_s20  ;;  %v1902_v62 = vmul.f32 2.0, %v4165_v46 }
 0x30e   : > { %v1863_v15 = vpop.permute.xlu0 %1862 }
 0x30f   : > { %v1864_v60 = vsel %vm356_vm4, %v1863_v15, %v4190_v39 }
 0x310   : > { %1883 = vrot.lane.b32.xlu1 %v1864_v60, %s2636_s20  ;;  %v4388_v60 = vmul.f32 2.0, %v4283_v50 }
 0x312   : > { %v1869_v32 = vpop.permute.xlu0 %1868 }
 0x313   : > { %v1870_v45 = vsel %vm356_vm4, %v1869_v32, %v4207_v56 }
 0x314   : > { %1887 = vrot.lane.b32.xlu1 %v1870_v45, %s2636_s20  ;;  %v4395_v45 = vmul.f32 2.0, %v4304_v51 }
 0x316   : > { %v1875_v28 = vpop.permute.xlu0 %1874 }
 0x317   : > { %v1876_v26 = vsel %vm356_vm4, %v1875_v28, %v4216_v10 }
 0x318   : > { %1891 = vrot.lane.b32.xlu1 %v1876_v26, %s2636_s20 }
 0x324   : > { %v1496_v4 = vpop.permute.xlu1 %1495 }
 0x325   : > { %v1510_v8 = vsel %vm356_vm4, %v1496_v4, %v3929_v16  ;;  %v1904_v4 = vmul.f32 2.0, %v4190_v39 }
 0x326   : > { %1623 = vrot.lane.b32.xlu1 %v1510_v8, %s2637_s5 }
 0x328   : > { %v1500_v21 = vpop.permute.xlu1 %1499 }
 0x329   : > { %v1512_v37 = vsel %vm356_vm4, %v1500_v21, %v3954_v49 }
 0x32a   : > { %1627 = vrot.lane.b32.xlu1 %v1512_v37, %s2637_s5 }
 0x32c   : > { %v1504_v42 = vpop.permute.xlu1 %1503 }
 0x32d   : > { %v1514_v20 = vsel %vm356_vm4, %v1504_v42, %v3973_v18 }
 0x32e   : > { %1631 = vrot.lane.b32.xlu1 %v1514_v20, %s2637_s5 }
 0x330   : > { %v1508_v19 = vpop.permute.xlu1 %1507 }
 0x331   : > { %v1516_v59 = vsel %vm356_vm4, %v1508_v19, %v3984_v38  ;;  %v4413_v19 = vmul.f32 2.0, %v4216_v10 }
 0x332   : > { %1635 = vrot.lane.b32.xlu1 %v1516_v59, %s2637_s5 }
 0x336   : > { %1655 = vrot.lane.b32.xlu1 %v1510_v8, %s2638_s6 }
 0x33a   : > { %1659 = vrot.lane.b32.xlu1 %v1512_v37, %s2638_s6  ;;  %v4406_v37 = vmul.f32 2.0, %v4207_v56 }
 0x33e   : > { %1663 = vrot.lane.b32.xlu1 %v1514_v20, %s2638_s6 }
 0x341   : > { %v4381_v43 = vpop.permute.xlu1 %1532 }
 0x342   : > { %1667 = vrot.lane.b32.xlu1 %v1516_v59, %s2638_s6 }
 0x345   : > { %v4385_v15 = vpop.permute.xlu1 %1537 }
 0x346   : > { %1916 = vperm.xlu1 %2461, %v1902_v62  }
 0x349   : > { %v4390_v32 = vpop.permute.xlu1 %1547 }
 0x34a   : > { %5488 = vst [vmem:[#allocation115_spill] sm:$0xff] %v4390_v32  ;;  %2462 = vset.pattern.permute.xlu1 %v5333_v23  ;;  %v1262_v32 = vadd.f32 %v4135_v58, %v3286_v0 }
 0x34b   : > { %1958 = vperm.xlu1 %2462, %v4388_v60  }
 0x34d   : > { %v1854_v28 = vpop.permute.xlu1 %1853 }
 0x34e   : > { %v1855_v26 = vsel %vm356_vm4, %v1854_v28, %v4283_v50 }
 0x34f   : > { %1877 = vrot.lane.b32.xlu0 %v1855_v26, %s2636_s20  ;;  %1966 = vperm.xlu1 %2462, %v4395_v45   ;;  %v1509_v26 = vsel %vm356_vm4, %v1494_v61, %v3809_v57  ;;  %v1513_v61 = vsel %vm356_vm4, %v4350_v5, %v3858_v2 }
 0x351   : > { %v1860_v8 = vpop.permute.xlu1 %1859 }
 0x352   : > { %v1861_v21 = vsel %vm356_vm4, %v1860_v8, %v4304_v51 }
 0x353   : > { %1881 = vrot.lane.b32.xlu0 %v1861_v21, %s2636_s20  ;;  %1970 = vperm.xlu1 %2462, %v1904_v4   ;;  %v1511_v21 = vsel %vm356_vm4, %v4348_v44, %v3837_v40  ;;  %v1515_v44 = vsel %vm356_vm4, %v4352_v22, %v3870_v33 }
 0x355   : > { %v1866_v42 = vpop.permute.xlu1 %1865 }
 0x356   : > { %v1867_v20 = vsel %vm356_vm4, %v1866_v42, %v4319_v54 }
 0x357   : > { %1885 = vrot.lane.b32.xlu0 %v1867_v20, %s2636_s20  ;;  %1978 = vperm.xlu1 %2462, %v4406_v37   ;;  %v1905_v20 = vmul.f32 2.0, %v4319_v54 }
 0x359   : > { %v1872_v59 = vpop.permute.xlu1 %1871 }
 0x35a   : > { %v1873_v28 = vsel %vm356_vm4, %v1872_v59, %v4326_v7  ;;  %v1907_v59 = vmul.f32 2.0, %v4326_v7 }
 0x35b   : > { %1889 = vrot.lane.b32.xlu0 %v1873_v28, %s2636_s20  ;;  %1986 = vperm.xlu1 %2462, %v4413_v19  }
 0x35d   : > { %v4421_v8 = vpop.permute.xlu1 %1557 }
 0x35e   : > { %5489 = vst [vmem:[#allocation116_spill] sm:$0xff] %v4421_v8 }
 0x35f   : > { %1621 = vrot.lane.b32.xlu0 %v1509_v26, %s2637_s5  ;;  %2464 = vset.pattern.permute.xlu1 %v5386_v25 }
 0x360   : > { %1926 = vperm.xlu1 %2464, %v1904_v4  }
 0x362   : > { %v4428_v42 = vpop.permute.xlu1 %1574 }
 0x363   : > { %1625 = vrot.lane.b32.xlu0 %v1511_v21, %s2637_s5 }
 0x364   : > { %1931 = vperm.xlu1 %2464, %v1905_v20  }
 0x366   : > { %v4440_v4 = vpop.permute.xlu1 %1582 }
 0x367   : > { %1629 = vrot.lane.b32.xlu0 %v1513_v61, %s2637_s5 }
 0x368   : > { %1941 = vperm.xlu1 %2464, %v1907_v59  }
 0x36a   : > { %v1587_v28 = vpop.permute.xlu1 %1586 }
 0x36b   : > { %1633 = vrot.lane.b32.xlu0 %v1515_v44, %s2637_s5 }
 0x36e   : > { %v4445_v5 = vpop.permute.xlu1 %1594 }
 0x36f   : > { %1653 = vrot.lane.b32.xlu0 %v1509_v26, %s2638_s6 }
 0x372   : > { %v4448_v8 = vpop.permute.xlu1 %1602 }
 0x373   : > { %1657 = vrot.lane.b32.xlu0 %v1511_v21, %s2638_s6 }
 0x377   : > { %1661 = vrot.lane.b32.xlu0 %v1513_v61, %s2638_s6  ;;  %v5490_v61 = vlaneseq }
 0x37b   : > { %1665 = vrot.lane.b32.xlu0 %v1515_v44, %s2638_s6  ;;  %v5491_v44 = vld [vmem:[#allocation40_spill] sm:$0xff] }
 0x37e   : > { %v4451_v22 = vpop.permute.xlu1 %1879 }
 0x37f   : > { %1962 = vperm.xlu0 %2454, %v1902_v62  }
 0x382   : > { %v4453_v33 = vpop.permute.xlu1 %1883 }
 0x383   : > { %1974 = vperm.xlu0 %2454, %v1905_v20   ;;  %v894_v20 = vadd.f32 %v4022_v48, %v3181_v31  ;;  %v5492_v48 = vld [vmem:[#allocation29_spill] sm:$0xff] }
 0x386   : > { %v4457_v26 = vpop.permute.xlu1 %1887 }
 0x387   : > { %1982 = vperm.xlu0 %2454, %v1907_v59   ;;  %v4467_v59 = vand.u32 127, %v5490_v61  ;;  %v494_v61 = vadd.f32 %v5492_v48, %v2957_v13 }
 0x389   : > { %vm233_vm5 = vcmp.eq.s32.totalorder %v4467_v59, 15  ;;  %vm232_vm6 = vcmp.eq.s32.totalorder %v4467_v59, 0 }
 0x38a   : > { %v4460_v21 = vpop.permute.xlu1 %1891 }
 0x38b   : > { %2463 = vset.pattern.permute.xlu0 %v5386_v25  ;;  %v926_v25 = vadd.f32 %v4036_v35, %v894_v20  ;;  %v1294_v35 = vadd.f32 %v4212_v30, %v1262_v32 }
 0x38c   : > { %415 = vperm.xlu0 %2463, %v3111_v24   ;;  %v534_v24 = vadd.f32 %v3994_v17, %v2957_v13 }
 0x390   : > { %430 = vperm.xlu0 %2463, %v3161_v29  }
 0x394   : > { %440 = vperm.xlu0 %2463, %v3174_v14   ;;  %v854_v14 = vadd.f32 %v5491_v44, %v3181_v31  ;;  %v5494_v44 = vld [vmem:[#allocation49_spill] sm:$0xff] }
 0x395   : > { %v814_v2 = vadd.f32 %v5494_v44, %v3181_v31 }
 0x396   : > { %v934_v17 = vsel %vm233_vm5, %v854_v14, %v926_v25  ;;  %v5496_v25 = vld [vmem:[#allocation26_spill] sm:$0xff]  ;;  %v1182_v14 = vadd.f32 %v3917_v6, %v3286_v0  ;;  %v1566_v6 = vadd.f32 %v4381_v43, %v3929_v16 }
 0x397   : > { %v942_v30 = vsel %vm232_vm6, %v814_v2, %v934_v17  ;;  %v5499_v17 = vld [vmem:[#allocation27_spill] sm:$0xff] }
 0x398   : > { %450 = vperm.xlu0 %2463, %v3197_v12   ;;  %v1624_v62 = vpop.permute.xlu1 %1623  ;;  %v566_v12 = vadd.f32 %v4008_v27, %v534_v24  ;;  %v1222_v27 = vadd.f32 %v3800_v63, %v3286_v0  ;;  %v5495_v24 = vld [vmem:[#allocation28_spill] sm:$0xff] }
 0x399   : > { %v454_v48 = vadd.f32 %v5495_v24, %v2957_v13  ;;  %v1646_v2 = vadd.f32 %v1624_v62, %v3929_v16  ;;  %v1608_v24 = vadd.f32 %v1587_v28, %v3954_v49  ;;  %v1610_v28 = vadd.f32 %v4445_v5, %v3973_v18 }
 0x39a   : > { %v574_v58 = vsel %vm233_vm5, %v494_v61, %v566_v12  ;;  %v1302_v32 = vsel %vm233_vm5, %v1222_v27, %v1294_v35  ;;  %v1579_v12 = vpop.permute.xlu0 %1578 }
 0x39b   : > { %v582_v63 = vsel %vm232_vm6, %v454_v48, %v574_v58  ;;  %v1310_v13 = vsel %vm232_vm6, %v1182_v14, %v1302_v32  ;;  %v1606_v44 = vadd.f32 %v1579_v12, %v3929_v16 }
 0x39c   : > { %775 = vperm.xlu0 %2463, %v3289_v9   ;;  %v1628_v29 = vpop.permute.xlu1 %1627  ;;  %v5493_v9 = vld [vmem:[#allocation25_spill] sm:$0xff]  ;;  %v4508_v61 = vmul.f32 0.11111111, %v582_v63  ;;  %v1318_v0 = vmul.f32 0.11111111, %v1310_v13 }
 0x39d   : > { %v1648_v48 = vadd.f32 %v1628_v29, %v3954_v49 }
 0x39e   : > { %5498 = vst [vmem:[#allocation29_spill] sm:$0xff] %v4508_v61 }
 0x3a0   : > { %790 = vperm.xlu0 %2463, %v5493_v9   ;;  %v1632_v20 = vpop.permute.xlu1 %1631  ;;  %v4503_v9 = vmul.f32 0.11111111, %v942_v30  ;;  %v1326_v30 = vmul.f32 %v4508_v61, %v4508_v61 }
 0x3a1   : > { %v1650_v29 = vadd.f32 %v1632_v20, %v3973_v18 }
 0x3a2   : > { %5497 = vst [vmem:[#allocation40_spill] sm:$0xff] %v4503_v9  ;;  %v1710_v58 = vmul.f32 %v4503_v9, %v4503_v9  ;;  %v1334_v14 = vsub.f32 %v1318_v0, %v1326_v30 }
 0x3a4   : > { %800 = vperm.xlu0 %2463, %v5496_v25   ;;  %v1636_v31 = vpop.permute.xlu1 %1635  ;;  %v2158_v63 = vadd.f32 %v1710_v58, %v1326_v30  ;;  %v535_v30 = vadd.f32 %v3849_v55, %v2910_v41 }
 0x3a8   : > { %810 = vperm.xlu0 %2463, %v5499_v17   ;;  %v1656_v35 = vpop.permute.xlu1 %1655 }
 0x3a9   : > { %v1678_v27 = vadd.f32 %v1656_v35, %v1646_v2  ;;  %v2166_v35 = vadd.f32 0.0001, %v2158_v63  ;;  %v5504_v63 = vld [vmem:[#allocation18_spill] sm:$0xff] }
 0x3ab   : > { %v1686_v62 = vsel %vm233_vm5, %v1606_v44, %v1678_v27  ;;  %v1612_v44 = vadd.f32 %v4448_v8, %v3984_v38  ;;  %v1652_v27 = vadd.f32 %v1636_v31, %v3984_v38 }
 0x3ac   : > { %v1694_v32 = vsel %vm232_vm6, %v1566_v6, %v1686_v62  ;;  %1143 = vperm.xlu0 %2463, %v3636_v1   ;;  %v1660_v25 = vpop.permute.xlu1 %1659 }
 0x3ad   : > { %v1702_v16 = vmul.f32 0.11111111, %v1694_v32  ;;  %v1680_v43 = vadd.f32 %v1660_v25, %v1648_v48  ;;  %v5502_v32 = vld [vmem:[#allocation60_spill] sm:$0xff] }
 0x3af   : > { %v1718_v12 = vsub.f32 %v1702_v16, %v1710_v58  ;;  %v4530_v13 = vsel %vm233_vm5, %v1608_v24, %v1680_v43  ;;  %v4543_v58 = vpop.permute.xlu0 %1590  ;;  %v5503_v43 = vld [vmem:[#allocation64_spill] sm:$0xff] }
 0x3b0   : > { %1158 = vperm.xlu0 %2463, %v3712_v34   ;;  %v1664_v2 = vpop.permute.xlu1 %1663 }
 0x3b1   : > { %v2174_v17 = vadd.f32 %v1718_v12, %v1334_v14  ;;  %v1682_v1 = vadd.f32 %v1664_v2, %v1650_v29  ;;  %v567_v14 = vadd.f32 %v5503_v43, %v535_v30  ;;  %v5506_v29 = vld [vmem:[#allocation36_spill] sm:$0xff]  ;;  %v5507_v2 = vld [vmem:[#allocation65_spill] sm:$0xff] }
 0x3b2   : > { %v495_v12 = vadd.f32 %v5506_v29, %v2910_v41  ;;  %v5514_v30 = vld [vmem:[#allocation32_spill] sm:$0xff]  ;;  %v5519_v29 = vld [vmem:[#allocation62_spill] sm:$0xff] }
 0x3b3   : > { %v2182_v0 = vadd.f32 0.0009, %v2174_v17  ;;  %v4538_v5 = vsel %vm233_vm5, %v1610_v28, %v1682_v1  ;;  %v4551_v8 = vpop.permute.xlu0 %1598  ;;  %v5505_v28 = vld [vmem:[#allocation70_spill] sm:$0xff]  ;;  %v5508_v1 = vld [vmem:[#allocation31_spill] sm:$0xff] }
 0x3b4   : > { %1168 = vperm.xlu0 %2463, %v3724_v11   ;;  %v1668_v20 = vpop.permute.xlu1 %1667 }
 0x3b5   : > { %v4541_v6 = vmul.f32 %v2182_v0, %v2166_v35  ;;  %v1684_v34 = vadd.f32 %v1668_v20, %v1652_v27  ;;  %v5510_v0 = vld [vmem:[#allocation77_spill] sm:$0xff] }
 0x3b7   : > { %5500 = vst [vmem:[#allocation25_spill] sm:$0xff] %v4541_v6  ;;  %v4547_v24 = vsel %vm233_vm5, %v1612_v44, %v1684_v34  ;;  %v5509_v44 = vld [vmem:[#allocation30_spill] sm:$0xff]  ;;  %v5598_v6 = vld [vmem:[#allocation113_spill] sm:$0xff] }
 0x3b8   : > { %1178 = vperm.xlu0 %2463, %v3748_v52   ;;  %v455_v27 = vadd.f32 %v5509_v44, %v2910_v41  ;;  %v5511_v34 = vld [vmem:[#allocation54_spill] sm:$0xff]  ;;  %v4602_v41 = vsel %vm356_vm4, %v4451_v22, %v4165_v46  ;;  %v5603_v46 = vld [vmem:[#allocation109_spill] sm:$0xff] }
 0x3b9   : > { %v5520_v22 = vld [vmem:[#allocation50_spill] sm:$0xff] }
 0x3bc   : > { %1527 = vperm.xlu0 %2463, %v4331_v47  }
 0x3c0   : > { %1542 = vperm.xlu0 %2463, %v4336_v53  }
 0x3c1   : > { %v1878_v31 = vpop.permute.xlu0 %1877 }
 0x3c2   : > { %v1893_v11 = vsel %vm356_vm4, %v1878_v31, %v4283_v50  ;;  %v855_v31 = vadd.f32 %v5511_v34, %v5504_v63 }
 0x3c3   : > { %2005 = vrot.lane.b32.xlu1 %v1893_v11, %s2637_s5 }
 0x3c4   : > { %1552 = vperm.xlu0 %2463, %v4340_v3  }
 0x3c5   : > { %v1882_v48 = vpop.permute.xlu0 %1881 }
 0x3c6   : > { %v1895_v62 = vsel %vm356_vm4, %v1882_v48, %v4304_v51  ;;  %v5512_v48 = vld [vmem:[#allocation19_spill] sm:$0xff] }
 0x3c7   : > { %2009 = vrot.lane.b32.xlu1 %v1895_v62, %s2637_s5 }
 0x3c8   : > { %1562 = vperm.xlu0 %2463, %v4344_v36   ;;  %v5501_v36 = vld [vmem:[#allocation14_spill] sm:$0xff] }
 0x3c9   : > { %v1886_v52 = vpop.permute.xlu0 %1885  ;;  %v537_v25 = vadd.f32 %v5502_v32, %v5501_v36  ;;  %v497_v35 = vadd.f32 %v5508_v1, %v5501_v36  ;;  %v457_v32 = vadd.f32 %v5514_v30, %v5501_v36  ;;  %v5521_v1 = vld [vmem:[#allocation20_spill] sm:$0xff] }
 0x3ca   : > { %v1897_v47 = vsel %vm356_vm4, %v1886_v52, %v4319_v54  ;;  %v5513_v52 = vld [vmem:[#allocation72_spill] sm:$0xff] }
 0x3cb   : > { %2013 = vrot.lane.b32.xlu1 %v1897_v47, %s2637_s5  ;;  %v569_v55 = vadd.f32 %v5507_v2, %v537_v25  ;;  %v5516_v25 = vld [vmem:[#allocation90_spill] sm:$0xff] }
 0x3cc   : > { %1911 = vperm.xlu0 %2463, %v4388_v60   ;;  %v895_v60 = vadd.f32 %v5505_v28, %v5504_v63  ;;  %v5518_v28 = vld [vmem:[#allocation33_spill] sm:$0xff] }
 0x3cd   : > { %v1890_v53 = vpop.permute.xlu0 %1889 }
 0x3ce   : > { %v1899_v3 = vsel %vm356_vm4, %v1890_v53, %v4326_v7  ;;  %v927_v20 = vadd.f32 %v5510_v0, %v895_v60  ;;  %v897_v53 = vadd.f32 %v5513_v52, %v5512_v48 }
 0x3cf   : > { %2017 = vrot.lane.b32.xlu1 %v1899_v3, %s2637_s5 }
 0x3d0   : > { %1921 = vperm.xlu0 %2463, %v4395_v45   ;;  %v575_v45 = vsel %vm233_vm5, %v495_v12, %v567_v14  ;;  %v5517_v14 = vld [vmem:[#allocation16_spill] sm:$0xff]  ;;  %v935_v2 = vsel %vm233_vm5, %v855_v31, %v927_v20 }
 0x3d1   : > { %v1622_v16 = vpop.permute.xlu0 %1621  ;;  %v499_v60 = vadd.f32 %v5518_v28, %v5517_v14  ;;  %v539_v12 = vadd.f32 %v5519_v29, %v5517_v14  ;;  %v5524_v20 = vld [vmem:[#allocation80_spill] sm:$0xff]  ;;  %v5530_v29 = vld [vmem:[#allocation51_spill] sm:$0xff] }
 0x3d2   : > { %v929_v34 = vadd.f32 %v5524_v20, %v897_v53  ;;  %v5526_v31 = vld [vmem:[#allocation92_spill] sm:$0xff] }
 0x3d3   : > { %2037 = vrot.lane.b32.xlu1 %v1893_v11, %s2638_s6  ;;  %v577_v11 = vsel %vm233_vm5, %v497_v35, %v569_v55  ;;  %v815_v55 = vadd.f32 %v5520_v22, %v5504_v63  ;;  %v5522_v35 = vld [vmem:[#allocation74_spill] sm:$0xff]  ;;  %v4635_v63 = vsel %vm356_vm4, %v4453_v33, %v4190_v39  ;;  %v817_v22 = vadd.f32 %v5530_v29, %v5512_v48  ;;  %v5531_v33 = vld [vmem:[#allocation45_spill] sm:$0xff] }
 0x3d4   : > { %1936 = vperm.xlu0 %2463, %v4406_v37   ;;  %v583_v37 = vsel %vm232_vm6, %v455_v27, %v575_v45  ;;  %v585_v36 = vsel %vm232_vm6, %v457_v32, %v577_v11  ;;  %v899_v44 = vadd.f32 %v5522_v35, %v5521_v1  ;;  %v5523_v27 = vld [vmem:[#allocation34_spill] sm:$0xff]  ;;  %v5527_v11 = vld [vmem:[#allocation43_spill] sm:$0xff]  ;;  %v859_v35 = vadd.f32 %v5531_v33, %v5521_v1  ;;  %v5537_v29 = vld [vmem:[#allocation93_spill] sm:$0xff] }
 0x3d5   : > { %v1626_v17 = vpop.permute.xlu0 %1625  ;;  %v4619_v45 = vmul.f32 0.11111111, %v583_v37  ;;  %v459_v0 = vadd.f32 %v5523_v27, %v5517_v14  ;;  %v857_v30 = vadd.f32 %v5527_v11, %v5512_v48  ;;  %v943_v32 = vsel %vm232_vm6, %v815_v55, %v935_v2  ;;  %v5529_v14 = vld [vmem:[#allocation100_spill] sm:$0xff]  ;;  %v5534_v55 = vld [vmem:[#allocation81_spill] sm:$0xff] }
 0x3d6   : > { %v4651_v27 = vmul.f32 0.11111111, %v585_v36  ;;  %v1645_v48 = vadd.f32 %v1622_v16, %v3809_v57  ;;  %v4665_v36 = vmul.f32 0.11111111, %v943_v32  ;;  %v1605_v32 = vadd.f32 %v4428_v42, %v3809_v57  ;;  %v5599_v39 = vld [vmem:[#allocation53_spill] sm:$0xff] }
 0x3d7   : > { %2041 = vrot.lane.b32.xlu1 %v1895_v62, %s2638_s6  ;;  %v4660_v11 = vmul.f32 %v4619_v45, %v4619_v45 }
 0x3d8   : > { %1946 = vperm.xlu0 %2463, %v4413_v19   ;;  %v5515_v19 = vld [vmem:[#allocation38_spill] sm:$0xff] }
 0x3d9   : > { %v4604_v62 = vpop.permute.xlu0 %1629  ;;  %v1263_v43 = vadd.f32 %v5516_v25, %v5515_v19  ;;  %v5528_v25 = vld [vmem:[#allocation97_spill] sm:$0xff]  ;;  %v1223_v28 = vadd.f32 %v5529_v14, %v5515_v19  ;;  %v5536_v14 = vld [vmem:[#allocation44_spill] sm:$0xff] }
 0x3da   : > { %v1267_v33 = vadd.f32 %v5537_v29, %v5536_v14 }
 0x3db   : > { %2045 = vrot.lane.b32.xlu1 %v1897_v47, %s2638_s6  ;;  %v5525_v47 = vld [vmem:[#allocation41_spill] sm:$0xff]  ;;  %v1295_v53 = vadd.f32 %v5528_v25, %v1263_v43  ;;  %v931_v43 = vadd.f32 %v5534_v55, %v899_v44  ;;  %v4689_v55 = vmul.f32 %v4651_v27, %v4651_v27 }
 0x3dc   : > { %2007 = vrot.lane.b32.xlu0 %v4602_v41, %s2637_s5  ;;  %v1265_v52 = vadd.f32 %v5526_v31, %v5525_v47  ;;  %v5533_v31 = vld [vmem:[#allocation52_spill] sm:$0xff] }
 0x3dd   : > { %v4637_v37 = vpop.permute.xlu0 %1633  ;;  %2465 = vset.pattern.permute.xlu0 %v5333_v23  ;;  %v5532_v23 = vld [vmem:[#allocation66_spill] sm:$0xff]  ;;  %v819_v2 = vadd.f32 %v5533_v31, %v5521_v1  ;;  %v4673_v1 = vsel %vm356_vm4, %v4457_v26, %v4207_v56  ;;  %v1303_v16 = vsel %vm233_vm5, %v1223_v28, %v1295_v53  ;;  %v5539_v26 = vld [vmem:[#allocation84_spill] sm:$0xff]  ;;  %v939_v42 = vsel %vm233_vm5, %v859_v35, %v931_v43  ;;  %v5540_v43 = vld [vmem:[#allocation69_spill] sm:$0xff] }
 0x3de   : > { %v571_v20 = vadd.f32 %v5532_v23, %v539_v12  ;;  %v937_v12 = vsel %vm233_vm5, %v857_v30, %v929_v34  ;;  %v1225_v31 = vadd.f32 %v5539_v26, %v5525_v47  ;;  %v1647_v28 = vadd.f32 %v1626_v17, %v3837_v40  ;;  %v5544_v26 = vld [vmem:[#allocation71_spill] sm:$0xff] }
 0x3df   : > { %2049 = vrot.lane.b32.xlu1 %v1899_v3, %s2638_s6  ;;  %v5535_v3 = vld [vmem:[#allocation99_spill] sm:$0xff]  ;;  %v945_v53 = vsel %vm232_vm6, %v817_v22, %v937_v12  ;;  %v4709_v22 = vsel %vm356_vm4, %v4460_v21, %v4216_v10  ;;  %v1711_v17 = vmul.f32 %v4665_v36, %v4665_v36  ;;  %v5541_v12 = vld [vmem:[#allocation101_spill] sm:$0xff]  ;;  %v5542_v21 = vld [vmem:[#allocation86_spill] sm:$0xff] }
 0x3e0   : > { %2011 = vrot.lane.b32.xlu0 %v4635_v63, %s2637_s5  ;;  %v1297_v25 = vadd.f32 %v5535_v3, %v1265_v52  ;;  %v579_v34 = vsel %vm233_vm5, %v499_v60, %v571_v20  ;;  %v5538_v52 = vld [vmem:[#allocation67_spill] sm:$0xff]  ;;  %v1299_v3 = vadd.f32 %v5541_v12, %v1267_v33  ;;  %v4718_v29 = vmul.f32 0.11111111, %v945_v53 }
 0x3e1   : > { %v1654_v44 = vpop.permute.xlu0 %1653  ;;  %v1183_v30 = vadd.f32 %v5538_v52, %v5515_v19  ;;  %v5543_v33 = vld [vmem:[#allocation59_spill] sm:$0xff] }
 0x3e2   : > { %v1677_v23 = vadd.f32 %v1654_v44, %v1645_v48  ;;  %v1305_v19 = vsel %vm233_vm5, %v1225_v31, %v1297_v25  ;;  %v1185_v48 = vadd.f32 %v5540_v43, %v5525_v47  ;;  %v1607_v25 = vadd.f32 %v4440_v4, %v3837_v40 }
 0x3e3   : > { %v1311_v20 = vsel %vm232_vm6, %v1183_v30, %v1303_v16  ;;  %v947_v16 = vsel %vm232_vm6, %v819_v2, %v939_v42  ;;  %v1649_v30 = vadd.f32 %v4604_v62, %v5543_v33  ;;  %v587_v2 = vsel %vm232_vm6, %v459_v0, %v579_v34  ;;  %v5546_v34 = vld [vmem:[#allocation115_spill] sm:$0xff] }
 0x3e4   : > { %v4698_v60 = vsel %vm233_vm5, %v1605_v32, %v1677_v23  ;;  %2015 = vrot.lane.b32.xlu0 %v4673_v1, %s2637_s5  ;;  %v1227_v32 = vadd.f32 %v5542_v21, %v5536_v14  ;;  %v1567_v23 = vadd.f32 %v4385_v15, %v3837_v40  ;;  %v1313_v47 = vsel %vm232_vm6, %v1185_v48, %v1305_v19  ;;  %v5547_v48 = vld [vmem:[#allocation61_spill] sm:$0xff] }
 0x3e5   : > { %v1658_v35 = vpop.permute.xlu0 %1657  ;;  %v1319_v52 = vmul.f32 0.11111111, %v1311_v20  ;;  %v1187_v31 = vadd.f32 %v5544_v26, %v5536_v14  ;;  %v2159_v40 = vadd.f32 %v1711_v17, %v4660_v11  ;;  %v1609_v42 = vadd.f32 %v4543_v58, %v5543_v33 }
 0x3e6   : > { %v1679_v44 = vadd.f32 %v1658_v35, %v1647_v28  ;;  %v1307_v62 = vsel %vm233_vm5, %v1227_v32, %v1299_v3  ;;  %v4745_v20 = vmul.f32 0.11111111, %v947_v16  ;;  %v1321_v0 = vmul.f32 0.11111111, %v1313_v47 }
 0x3e7   : > { %v1569_v14 = vadd.f32 %v5546_v34, %v5543_v33  ;;  %v1713_v35 = vmul.f32 %v4718_v29, %v4718_v29  ;;  %v1335_v43 = vsub.f32 %v1319_v52, %v4660_v11  ;;  %v1651_v12 = vadd.f32 %v4637_v37, %v5547_v48 }
 0x3e8   : > { %v1687_v4 = vsel %vm233_vm5, %v1607_v25, %v1679_v44  ;;  %2019 = vrot.lane.b32.xlu0 %v4709_v22, %s2637_s5  ;;  %5545 = vst [vmem:[#allocation49_spill] sm:$0xff] %v4745_v20  ;;  %v4758_v25 = vmul.f32 0.11111111, %v587_v2  ;;  %v1315_v44 = vsel %vm232_vm6, %v1187_v31, %v1307_v62  ;;  %v2167_v16 = vadd.f32 0.0001, %v2159_v40 }
 0x3e9   : > { %v1695_v15 = vsel %vm232_vm6, %v1567_v23, %v1687_v4  ;;  %v1662_v53 = vpop.permute.xlu0 %1661  ;;  %v1611_v37 = vadd.f32 %v4551_v8, %v5547_v48  ;;  %v1337_v47 = vsub.f32 %v1321_v0, %v4689_v55  ;;  %v2161_v33 = vadd.f32 %v1713_v35, %v4689_v55 }
 0x3ea   : > { %v1703_v28 = vmul.f32 0.11111111, %v1695_v15  ;;  %v1681_v19 = vadd.f32 %v1662_v53, %v1649_v30  ;;  %v1715_v30 = vmul.f32 %v4745_v20, %v4745_v20  ;;  %v1323_v4 = vmul.f32 0.11111111, %v1315_v44 }
 0x3eb   : > { %v1331_v8 = vmul.f32 %v4758_v25, %v4758_v25 }
 0x3ec   : > { %v1719_v3 = vsub.f32 %v1703_v28, %v1711_v17  ;;  %v1689_v58 = vsel %vm233_vm5, %v1609_v42, %v1681_v19  ;;  %2039 = vrot.lane.b32.xlu0 %v4602_v41, %s2638_s6  ;;  %v5548_v41 = vld [vmem:[#allocation116_spill] sm:$0xff]  ;;  %v2169_v28 = vadd.f32 0.0001, %v2161_v33 }
 0x3ed   : > { %v1697_v21 = vsel %vm232_vm6, %v1569_v14, %v1689_v58  ;;  %v1666_v11 = vpop.permute.xlu0 %1665  ;;  %v1571_v52 = vadd.f32 %v5548_v41, %v5547_v48  ;;  %v2163_v62 = vadd.f32 %v1715_v30, %v1331_v8  ;;  %v1339_v42 = vsub.f32 %v1323_v4, %v1331_v8  ;;  %v5556_v41 = vld [vmem:[#allocation78_spill] sm:$0xff] }
 0x3ee   : > { %v2175_v17 = vadd.f32 %v1719_v3, %v1335_v43  ;;  %v1705_v32 = vmul.f32 0.11111111, %v1697_v21  ;;  %v1683_v23 = vadd.f32 %v1666_v11, %v1651_v12  ;;  %v4792_v12 = vpop.permute.xlu1 %1916 }
 0x3ef   : > { %v2171_v14 = vadd.f32 0.0001, %v2163_v62  ;;  %5550 = vst [vmem:[#allocation26_spill] sm:$0xff] %v4792_v12  ;;  %v5561_v62 = vld [vmem:[#allocation79_spill] sm:$0xff] }
 0x3f0   : > { %v2183_v2 = vadd.f32 0.0009, %v2175_v17  ;;  %v1721_v26 = vsub.f32 %v1705_v32, %v1713_v35  ;;  %v1691_v31 = vsel %vm233_vm5, %v1611_v37, %v1683_v23  ;;  %2043 = vrot.lane.b32.xlu0 %v4635_v63, %s2638_s6  ;;  %v5554_v32 = vld [vmem:[#allocation37_spill] sm:$0xff] }
 0x3f1   : > { %v1699_v40 = vsel %vm232_vm6, %v1571_v52, %v1691_v31 }
 0x3f2   : > { %v4780_v15 = vmul.f32 %v2183_v2, %v2167_v16  ;;  %v2177_v55 = vadd.f32 %v1721_v26, %v1337_v47  ;;  %v1707_v53 = vmul.f32 0.11111111, %v1699_v40  ;;  %v4796_v58 = vpop.permute.xlu1 %1958  ;;  %v5552_v16 = vld [vmem:[#allocation76_spill] sm:$0xff]  ;;  %v5555_v47 = vld [vmem:[#allocation13_spill] sm:$0xff]  ;;  %v5557_v2 = vld [vmem:[#allocation83_spill] sm:$0xff] }
 0x3f3   : > { %v538_v52 = vadd.f32 %v5556_v41, %v5555_v47  ;;  %v5559_v40 = vld [vmem:[#allocation39_spill] sm:$0xff] }
 0x3f4   : > { %v2185_v19 = vadd.f32 0.0009, %v2177_v55  ;;  %v1723_v0 = vsub.f32 %v1707_v53, %v1715_v30  ;;  %2047 = vrot.lane.b32.xlu0 %v4673_v1, %s2638_s6  ;;  %v5551_v1 = vld [vmem:[#allocation12_spill] sm:$0xff]  ;;  %v498_v55 = vadd.f32 %v5559_v40, %v5555_v47  ;;  %v5560_v53 = vld [vmem:[#allocation15_spill] sm:$0xff]  ;;  %v5570_v40 = vld [vmem:[#allocation89_spill] sm:$0xff]  ;;  %2466 = vrcp.f32 %v4780_v15 }
 0x3f5   : > { %v536_v21 = vadd.f32 %v5552_v16, %v5551_v1  ;;  %v496_v23 = vadd.f32 %v5554_v32, %v5551_v1  ;;  %v570_v26 = vadd.f32 %v5557_v2, %v538_v52  ;;  %v5566_v41 = vld [vmem:[#allocation87_spill] sm:$0xff] }
 0x3f6   : > { %v4784_v34 = vmul.f32 %v2185_v19, %v2169_v28  ;;  %v2179_v63 = vadd.f32 %v1723_v0, %v1339_v42  ;;  %v4804_v37 = vpop.permute.xlu1 %1966  ;;  %v540_v42 = vadd.f32 %v5561_v62, %v5560_v53 }
 0x3f7   : > { %v578_v0 = vsel %vm233_vm5, %v498_v55, %v570_v26  ;;  %v5569_v26 = vld [vmem:[#allocation23_spill] sm:$0xff] }
 0x3f8   : > { %v2187_v35 = vadd.f32 0.0009, %v2179_v63  ;;  %2051 = vrot.lane.b32.xlu0 %v4709_v22, %s2638_s6  ;;  %v5553_v22 = vld [vmem:[#allocation82_spill] sm:$0xff]  ;;  %v5562_v63 = vld [vmem:[#allocation85_spill] sm:$0xff]  ;;  %v898_v55 = vadd.f32 %v5570_v40, %v5569_v26  ;;  %2468 = vrcp.f32 %v4784_v34 }
 0x3f9   : > { %v568_v17 = vadd.f32 %v5553_v22, %v536_v21 }
 0x3fa   : > { %v4788_v43 = vmul.f32 %v2187_v35, %v2171_v14  ;;  %v4815_v31 = vpop.permute.xlu1 %1970  ;;  %v572_v14 = vadd.f32 %v5562_v63, %v540_v42 }
 0x3fb   : > { %v576_v4 = vsel %vm233_vm5, %v496_v23, %v568_v17  ;;  %5558 = vst [vmem:[#allocation27_spill] sm:$0xff] %v4815_v31  ;;  %v5597_v31 = vld [vmem:[#allocation88_spill] sm:$0xff] }
 0x3fe   : > { %v4790_v48 = vpop.permute.xlu0 %1962  ;;  %v4831_v22 = vpop.permute.xlu1 %1978 }
 0x3ff   : > { %5549 = vst [vmem:[#allocation28_spill] sm:$0xff] %v4790_v48  ;;  %5564 = vst [vmem:[#allocation14_spill] sm:$0xff] %v4831_v22  ;;  %v5592_v22 = vld [vmem:[#allocation107_spill] sm:$0xff] }
 0x402   : > { %v4794_v3 = vpop.permute.xlu0 %1974  ;;  %v4843_v2 = vpop.permute.xlu1 %1986 }
 0x403   : > { %5568 = vst [vmem:[#allocation60_spill] sm:$0xff] %v4843_v2  ;;  %v1993_v15 = vadd.f32 %v4794_v3, %v4319_v54 }
 0x406   : > { %v4798_v44 = vpop.permute.xlu0 %1982 }
 0x40b   : > { %v4802_v11 = vpop.permute.xlu0 %415 }
 0x40f   : > { %v431_v33 = vpop.permute.xlu0 %430 }
 0x410   : > { %v456_v30 = vadd.f32 %v431_v33, %v5551_v1  ;;  %v5563_v1 = vld [vmem:[#allocation42_spill] sm:$0xff] }
 0x411   : > { %v500_v16 = vadd.f32 %v5563_v1, %v5560_v53  ;;  %v5573_v1 = vld [vmem:[#allocation56_spill] sm:$0xff] }
 0x412   : > { %v584_v8 = vsel %vm232_vm6, %v456_v30, %v576_v4  ;;  %v5567_v30 = vld [vmem:[#allocation94_spill] sm:$0xff] }
 0x413   : > { %v441_v28 = vpop.permute.xlu0 %440  ;;  %v580_v32 = vsel %vm233_vm5, %v500_v16, %v572_v14  ;;  %v592_v42 = vmul.f32 0.11111111, %v584_v8  ;;  %v858_v16 = vadd.f32 %v5573_v1, %v5569_v26 }
 0x414   : > { %v458_v19 = vadd.f32 %v441_v28, %v5555_v47  ;;  %v5565_v47 = vld [vmem:[#allocation21_spill] sm:$0xff] }
 0x415   : > { %v896_v52 = vadd.f32 %v5566_v41, %v5565_v47  ;;  %v4869_v1 = vmul.f32 %v592_v42, %v592_v42 }
 0x416   : > { %v586_v35 = vsel %vm232_vm6, %v458_v19, %v578_v0  ;;  %v5572_v19 = vld [vmem:[#allocation96_spill] sm:$0xff] }
 0x417   : > { %v451_v21 = vpop.permute.xlu0 %450  ;;  %v928_v4 = vadd.f32 %v5567_v30, %v896_v52  ;;  %v930_v0 = vadd.f32 %v5572_v19, %v898_v55  ;;  %v2112_v52 = vmul.f32 2.0, %v592_v42  ;;  %v594_v30 = vmul.f32 0.11111111, %v586_v35  ;;  %v5577_v55 = vld [vmem:[#allocation98_spill] sm:$0xff]  ;;  %v5580_v35 = vld [vmem:[#allocation57_spill] sm:$0xff] }
 0x418   : > { %v460_v17 = vadd.f32 %v451_v21, %v5560_v53  ;;  %v5571_v53 = vld [vmem:[#allocation55_spill] sm:$0xff]  ;;  %v5574_v21 = vld [vmem:[#allocation24_spill] sm:$0xff] }
 0x419   : > { %v856_v62 = vadd.f32 %v5571_v53, %v5565_v47  ;;  %v4859_v53 = vpop.permute.xlu1 %1926 }
 0x41a   : > { %v588_v23 = vsel %vm232_vm6, %v460_v17, %v580_v32  ;;  %v5575_v17 = vld [vmem:[#allocation91_spill] sm:$0xff]  ;;  %5576 = vst [vmem:[#allocation64_spill] sm:$0xff] %v4859_v53 }
 0x41b   : > { %v4840_v33 = vpop.permute.xlu0 %775  ;;  %v936_v14 = vsel %vm233_vm5, %v856_v62, %v928_v4  ;;  %v900_v32 = vadd.f32 %v5575_v17, %v5574_v21 }
 0x41d   : > { %v932_v4 = vadd.f32 %v5577_v55, %v900_v32  ;;  %v4888_v55 = vpop.permute.xlu1 %1931 }
 0x41f   : > { %v791_v28 = vpop.permute.xlu0 %790 }
 0x420   : > { %v816_v63 = vadd.f32 %v791_v28, %v5565_v47  ;;  %v938_v47 = vsel %vm233_vm5, %v858_v16, %v930_v0  ;;  %v596_v0 = vmul.f32 0.11111111, %v588_v23 }
 0x421   : > { %v4917_v9 = vpop.permute.xlu1 %1941 }
 0x422   : > { %v944_v41 = vsel %vm232_vm6, %v816_v63, %v936_v14  ;;  %v860_v14 = vadd.f32 %v5580_v35, %v5574_v21  ;;  %v5584_v35 = vld [vmem:[#allocation105_spill] sm:$0xff]  ;;  %v2116_v2 = vmul.f32 2.0, %v596_v0 }
 0x423   : > { %v952_v8 = vmul.f32 0.11111111, %v944_v41  ;;  %v801_v40 = vpop.permute.xlu0 %800  ;;  %v2114_v41 = vmul.f32 2.0, %v594_v30 }
 0x424   : > { %v818_v62 = vadd.f32 %v801_v40, %v5569_v26 }
 0x425   : > { %v4865_v28 = vmul.f32 %v952_v8, %v592_v42  ;;  %v4867_v19 = vmul.f32 %v2112_v52, %v952_v8  ;;  %v4871_v63 = vmul.f32 %v952_v8, %v952_v8  ;;  %v940_v42 = vsel %vm233_vm5, %v860_v14, %v932_v4 }
 0x426   : > { %v946_v17 = vsel %vm232_vm6, %v818_v62, %v938_v47  ;;  %v4890_v47 = vmul.f32 %v594_v30, %v594_v30  ;;  %v5583_v62 = vld [vmem:[#allocation46_spill] sm:$0xff] }
 0x427   : > { %5578 = vst [vmem:[#allocation18_spill] sm:$0xff] %v4865_v28  ;;  %5579 = vst [vmem:[#allocation70_spill] sm:$0xff] %v4867_v19  ;;  %v954_v16 = vmul.f32 0.11111111, %v946_v17  ;;  %v811_v32 = vpop.permute.xlu0 %810  ;;  %v4879_v26 = vadd.f32 %v4871_v63, %v4869_v1  ;;  %v1264_v17 = vadd.f32 %v5584_v35, %v5583_v62  ;;  %v4909_v35 = vmul.f32 %v596_v0, %v596_v0 }
 0x428   : > { %v820_v52 = vadd.f32 %v811_v32, %v5574_v21  ;;  %v5586_v32 = vld [vmem:[#allocation68_spill] sm:$0xff] }
 0x429   : > { %v4884_v8 = vmul.f32 %v954_v16, %v594_v30  ;;  %v4886_v40 = vmul.f32 %v2114_v41, %v954_v16  ;;  %v4892_v23 = vmul.f32 %v954_v16, %v954_v16  ;;  %v5585_v41 = vld [vmem:[#allocation17_spill] sm:$0xff]  ;;  %v5587_v30 = vld [vmem:[#allocation112_spill] sm:$0xff] }
 0x42a   : > { %v948_v19 = vsel %vm232_vm6, %v820_v52, %v940_v42  ;;  %v5591_v52 = vld [vmem:[#allocation47_spill] sm:$0xff]  ;;  %v853_v12 = vadd.f32 %v5599_v39, %v5585_v41  ;;  %v813_v48 = vadd.f32 %v4840_v33, %v5585_v41 }
 0x42b   : > { %5581 = vst [vmem:[#allocation36_spill] sm:$0xff] %v4884_v8  ;;  %5582 = vst [vmem:[#allocation65_spill] sm:$0xff] %v4886_v40  ;;  %v956_v4 = vmul.f32 0.11111111, %v948_v19  ;;  %v1144_v14 = vpop.permute.xlu0 %1143  ;;  %v4900_v21 = vadd.f32 %v4892_v23, %v4890_v47  ;;  %v893_v40 = vadd.f32 %v5586_v32, %v5585_v41  ;;  %v1296_v8 = vadd.f32 %v5587_v30, %v1264_v17  ;;  %v5590_v19 = vld [vmem:[#allocation102_spill] sm:$0xff]  ;;  %v5593_v32 = vld [vmem:[#allocation75_spill] sm:$0xff] }
 0x42c   : > { %v1224_v42 = vadd.f32 %v5590_v19, %v5583_v62  ;;  %v1266_v56 = vadd.f32 %v5592_v22, %v5591_v52  ;;  %v5594_v30 = vld [vmem:[#allocation11_spill] sm:$0xff] }
 0x42d   : > { %v4905_v16 = vmul.f32 %v956_v4, %v596_v0  ;;  %v4907_v28 = vmul.f32 %v2116_v2, %v956_v4  ;;  %v4911_v10 = vmul.f32 %v956_v4, %v956_v4  ;;  %v925_v2 = vadd.f32 %v5593_v32, %v893_v40  ;;  %v5595_v4 = vld [vmem:[#allocation58_spill] sm:$0xff]  ;;  %v5600_v40 = vld [vmem:[#allocation63_spill] sm:$0xff] }
 0x42e   : > { %v1304_v22 = vsel %vm233_vm5, %v1224_v42, %v1296_v8  ;;  %v1298_v61 = vadd.f32 %v5598_v6, %v1266_v56  ;;  %v5601_v32 = vld [vmem:[#allocation103_spill] sm:$0xff]  ;;  %v453_v41 = vadd.f32 %v4802_v11, %v5594_v30  ;;  %v2170_v3 = vadd.f32 0.0001, %v4900_v21 }
 0x42f   : > { %5588 = vst [vmem:[#allocation31_spill] sm:$0xff] %v4905_v16  ;;  %5589 = vst [vmem:[#allocation30_spill] sm:$0xff] %v4907_v28  ;;  %v1159_v53 = vpop.permute.xlu0 %1158  ;;  %v4921_v17 = vadd.f32 %v4911_v10, %v4909_v35  ;;  %v533_v28 = vadd.f32 %v5595_v4, %v5594_v30  ;;  %v5596_v16 = vld [vmem:[#allocation22_spill] sm:$0xff]  ;;  %v1226_v4 = vadd.f32 %v5601_v32, %v5591_v52  ;;  %v5604_v6 = vld [vmem:[#allocation35_spill] sm:$0xff] }
 0x430   : > { %v1184_v0 = vadd.f32 %v1159_v53, %v5583_v62  ;;  %v1261_v19 = vadd.f32 %v5597_v31, %v5596_v16  ;;  %v5602_v31 = vld [vmem:[#allocation48_spill] sm:$0xff]  ;;  %v493_v39 = vadd.f32 %v5604_v6, %v5594_v30  ;;  %v933_v33 = vsel %vm233_vm5, %v853_v12, %v925_v2  ;;  %v5605_v42 = vld [vmem:[#allocation95_spill] sm:$0xff]  ;;  %v5607_v2 = vld [vmem:[#allocation73_spill] sm:$0xff] }
 0x431   : > { %v565_v62 = vadd.f32 %v5600_v40, %v533_v28  ;;  %v1268_v20 = vadd.f32 %v5603_v46, %v5602_v31  ;;  %v5606_v46 = vld [vmem:[#allocation114_spill] sm:$0xff]  ;;  %v941_v6 = vsel %vm232_vm6, %v813_v48, %v933_v33  ;;  %v1181_v12 = vadd.f32 %v1144_v14, %v5596_v16 }
 0x432   : > { %v1312_v53 = vsel %vm232_vm6, %v1184_v0, %v1304_v22  ;;  %v1293_v0 = vadd.f32 %v5605_v42, %v1261_v19  ;;  %v1306_v22 = vsel %vm233_vm5, %v1226_v4, %v1298_v61  ;;  %v1221_v61 = vadd.f32 %v5607_v2, %v5596_v16 }
 0x433   : > { %v4943_v8 = vmul.f32 0.11111111, %v1312_v53  ;;  %v1169_v56 = vpop.permute.xlu0 %1168  ;;  %v1300_v53 = vadd.f32 %v5606_v46, %v1268_v20  ;;  %v5608_v20 = vld [vmem:[#allocation104_spill] sm:$0xff] }
 0x434   : > { %v1186_v28 = vadd.f32 %v1169_v56, %v5591_v52  ;;  %v573_v52 = vsel %vm233_vm5, %v493_v39, %v565_v62  ;;  %v1228_v30 = vadd.f32 %v5608_v20, %v5602_v31  ;;  %v1301_v4 = vsel %vm233_vm5, %v1221_v61, %v1293_v0 }
 0x435   : > { %v1336_v40 = vsub.f32 %v4943_v8, %v4869_v1  ;;  %v2006_v32 = vpop.permute.xlu1 %2005  ;;  %v581_v48 = vsel %vm232_vm6, %v453_v41, %v573_v52  ;;  %v4978_v8 = vmul.f32 0.11111111, %v941_v6  ;;  %v1309_v39 = vsel %vm232_vm6, %v1181_v12, %v1301_v4 }
 0x436   : > { %v1314_v11 = vsel %vm232_vm6, %v1186_v28, %v1306_v22  ;;  %v1308_v62 = vsel %vm233_vm5, %v1228_v30, %v1300_v53  ;;  %v4986_v41 = vmul.f32 0.11111111, %v581_v48  ;;  %v1317_v0 = vmul.f32 0.11111111, %v1309_v39 }
 0x437   : > { %v4969_v19 = vmul.f32 0.11111111, %v1314_v11  ;;  %v1179_v1 = vpop.permute.xlu0 %1178  ;;  %v5007_v4 = vmul.f32 2.0, %v4619_v45 }
 0x438   : > { %v1188_v14 = vadd.f32 %v1179_v1, %v5602_v31  ;;  %v1325_v6 = vmul.f32 %v4986_v41, %v4986_v41  ;;  %v2093_v21 = vmul.f32 %v4978_v8, %v4986_v41 }
 0x439   : > { %v1338_v16 = vsub.f32 %v4969_v19, %v4890_v47  ;;  %v2010_v56 = vpop.permute.xlu1 %2009  ;;  %v1709_v47 = vmul.f32 %v4978_v8, %v4978_v8 }
 0x43a   : > { %v1316_v33 = vsel %vm232_vm6, %v1188_v14, %v1308_v62 }
 0x43b   : > { %v4988_v31 = vmul.f32 0.11111111, %v1316_v33  ;;  %v1528_v28 = vpop.permute.xlu0 %1527  ;;  %v2157_v2 = vadd.f32 %v1709_v47, %v1325_v6 }
 0x43c   : > { %v1565_v42 = vadd.f32 %v1528_v28, %v3809_v57  ;;  %v1333_v57 = vsub.f32 %v1317_v0, %v1325_v6  ;;  %v2029_v0 = vadd.f32 %v2006_v32, %v4283_v50 }
 0x43d   : > { %v1340_v22 = vsub.f32 %v4988_v31, %v4909_v35  ;;  %v2014_v46 = vpop.permute.xlu1 %2013  ;;  %v2165_v62 = vadd.f32 0.0001, %v2157_v2  ;;  %v2109_v2 = vmul.f32 2.0, %v4986_v41  ;;  %v2467_v41 = vpop.eup %2466 }
 0x43e   : > { %v1693_v53 = vsel %vm232_vm6, %v1565_v42, %v4698_v60  ;;  %v2113_v60 = vmul.f32 2.0, %v4651_v27  ;;  %v5018_v42 = vmul.f32 %v4718_v29, %v4651_v27  ;;  %v2033_v34 = vadd.f32 %v2014_v46, %v4319_v54 }
 0x43f   : > { %v1701_v12 = vmul.f32 0.11111111, %v1693_v53  ;;  %v1543_v11 = vpop.permute.xlu0 %1542 }
 0x440   : > { %v1568_v52 = vadd.f32 %v1543_v11, %v3954_v49  ;;  %v5011_v28 = vmul.f32 %v2113_v60, %v4718_v29  ;;  %v2168_v29 = vadd.f32 0.0001, %v4879_v26 }
 0x441   : > { %v1717_v61 = vsub.f32 %v1701_v12, %v1709_v47  ;;  %v2018_v20 = vpop.permute.xlu1 %2017  ;;  %v1989_v12 = vadd.f32 %v4796_v58, %v4283_v50  ;;  %v1953_v58 = vadd.f32 %v4888_v55, %v4319_v54 }
 0x442   : > { %v1696_v30 = vsel %vm232_vm6, %v1568_v52, %v4530_v13  ;;  %v2035_v60 = vadd.f32 %v2018_v20, %v4326_v7 }
 0x443   : > { %v2173_v19 = vadd.f32 %v1717_v61, %v1333_v57  ;;  %v1704_v1 = vmul.f32 0.11111111, %v1696_v30  ;;  %v1553_v48 = vpop.permute.xlu0 %1552 }
 0x444   : > { %v1570_v14 = vadd.f32 %v1553_v48, %v3973_v18  ;;  %v5022_v18 = vmul.f32 %v4665_v36, %v4619_v45 }
 0x445   : > { %v2181_v49 = vadd.f32 0.0009, %v2173_v19  ;;  %v1720_v39 = vsub.f32 %v1704_v1, %v4871_v63  ;;  %v2038_v33 = vpop.permute.xlu1 %2037 }
 0x446   : > { %v1698_v13 = vsel %vm232_vm6, %v1570_v14, %v4538_v5  ;;  %v1991_v5 = vadd.f32 %v4804_v37, %v4304_v51  ;;  %v2061_v32 = vadd.f32 %v2038_v33, %v2029_v0  ;;  %v2172_v14 = vadd.f32 0.0001, %v4921_v17 }
 0x447   : > { %v2189_v47 = vmul.f32 %v2181_v49, %v2165_v62  ;;  %v2176_v63 = vadd.f32 %v1720_v39, %v1336_v40  ;;  %v1706_v53 = vmul.f32 0.11111111, %v1698_v13  ;;  %v1563_v6 = vpop.permute.xlu0 %1562 }
 0x448   : > { %v1572_v27 = vadd.f32 %v1563_v6, %v3984_v38  ;;  %v2031_v38 = vadd.f32 %v2010_v56, %v4304_v51  ;;  %v2069_v30 = vsel %vm233_vm5, %v1989_v12, %v2061_v32  ;;  %v2469_v6 = vpop.eup %2468 }
 0x449   : > { %v2184_v45 = vadd.f32 0.0009, %v2176_v63  ;;  %v1722_v11 = vsub.f32 %v1706_v53, %v4892_v23  ;;  %v2042_v52 = vpop.permute.xlu1 %2041  ;;  %2470 = vrcp.f32 %v2189_v47 }
 0x44a   : > { %v1700_v37 = vsel %vm232_vm6, %v1572_v27, %v4547_v24  ;;  %v2063_v56 = vadd.f32 %v2042_v52, %v2031_v38  ;;  %2472 = vrcp.f32 %v4788_v43  ;;  %v5609_v43 = vld [vmem:[#allocation49_spill] sm:$0xff] }
 0x44b   : > { %v5042_v26 = vmul.f32 %v2184_v45, %v2168_v29  ;;  %v2178_v40 = vadd.f32 %v1722_v11, %v1338_v16  ;;  %v1708_v23 = vmul.f32 0.11111111, %v1700_v37  ;;  %v1912_v57 = vpop.permute.xlu0 %1911  ;;  %v2117_v16 = vmul.f32 %v2109_v2, %v4978_v8 }
 0x44c   : > { %v1949_v61 = vadd.f32 %v1912_v57, %v4283_v50  ;;  %v2071_v33 = vsel %vm233_vm5, %v1991_v5, %v2063_v56  ;;  %v2115_v45 = vmul.f32 2.0, %v4758_v25  ;;  %v2099_v32 = vmul.f32 %v5609_v43, %v4758_v25 }
 0x44d   : > { %v2186_v55 = vadd.f32 0.0009, %v2178_v40  ;;  %v1724_v24 = vsub.f32 %v1708_v23, %v4911_v10  ;;  %v2046_v19 = vpop.permute.xlu1 %2045  ;;  %v2125_v27 = vadd.f32 0.0001, %v2117_v16 }
 0x44e   : > { %v2077_v1 = vsel %vm232_vm6, %v1949_v61, %v2069_v30  ;;  %v2065_v48 = vadd.f32 %v2046_v19, %v2033_v34  ;;  %v2123_v37 = vmul.f32 %v2115_v45, %v5609_v43  ;;  %v5615_v45 = vld [vmem:[#allocation25_spill] sm:$0xff] }
 0x44f   : > { %v5054_v54 = vmul.f32 %v2186_v55, %v2170_v3  ;;  %v2180_v50 = vadd.f32 %v1724_v24, %v1340_v22  ;;  %v2085_v46 = vmul.f32 0.11111111, %v2077_v1  ;;  %v1922_v10 = vpop.permute.xlu0 %1921  ;;  %v1995_v22 = vadd.f32 %v4798_v44, %v4326_v7 }
 0x450   : > { %v2073_v62 = vsel %vm233_vm5, %v1993_v15, %v2065_v48  ;;  %v1951_v49 = vadd.f32 %v1922_v10, %v4304_v51  ;;  %v1955_v51 = vadd.f32 %v4917_v9, %v4326_v7  ;;  %v2119_v44 = vmul.f32 %v5007_v4, %v4665_v36 }
 0x451   : > { %v2188_v39 = vadd.f32 0.0009, %v2180_v50  ;;  %v2101_v35 = vsub.f32 %v2085_v46, %v2093_v21  ;;  %v2081_v31 = vsel %vm232_vm6, %v1953_v58, %v2073_v62  ;;  %v2050_v8 = vpop.permute.xlu1 %2049  ;;  %v2129_v58 = vadd.f32 0.0001, %v5011_v28 }
 0x452   : > { %v2089_v20 = vmul.f32 0.11111111, %v2081_v31  ;;  %v2079_v17 = vsel %vm232_vm6, %v1951_v49, %v2071_v33  ;;  %v2067_v13 = vadd.f32 %v2050_v8, %v2035_v60  ;;  %v2127_v23 = vadd.f32 0.0001, %v2119_v44 }
 0x453   : > { %v5076_v0 = vmul.f32 %v2188_v39, %v2172_v14  ;;  %v2133_v47 = vmul.f32 2.0, %v2101_v35  ;;  %v2087_v63 = vmul.f32 0.11111111, %v2079_v17  ;;  %v5078_v53 = vpop.permute.xlu0 %1936  ;;  %v2471_v4 = vpop.eup %2470  ;;  %v2131_v55 = vadd.f32 0.0001, %v2123_v37  ;;  %v5610_v17 = vld [vmem:[#allocation106_spill] sm:$0xff] }
 0x454   : > { %v2105_v12 = vsub.f32 %v2089_v20, %v5018_v42  ;;  %v2075_v5 = vsel %vm233_vm5, %v1995_v22, %v2067_v13  ;;  %v2473_v16 = vpop.eup %2472  ;;  %2474 = vrcp.f32 %v5615_v45 }
 0x455   : > { %v2141_v29 = vadd.f32 0.0009, %v2133_v47  ;;  %v2103_v7 = vsub.f32 %v2087_v63, %v5022_v18  ;;  %v2083_v9 = vsel %vm232_vm6, %v1955_v51, %v2075_v5  ;;  %v5611_v47 = vld [vmem:[#allocation28_spill] sm:$0xff]  ;;  %2476 = vrcp.f32 %v5042_v26 }
 0x456   : > { %v2137_v11 = vmul.f32 2.0, %v2105_v12  ;;  %v2091_v42 = vmul.f32 0.11111111, %v2083_v9  ;;  %v1990_v63 = vadd.f32 %v5611_v47, %v5610_v17  ;;  %v5612_v12 = vld [vmem:[#allocation26_spill] sm:$0xff]  ;;  %v5613_v5 = vld [vmem:[#allocation108_spill] sm:$0xff]  ;;  %2478 = vrcp.f32 %v5054_v54 }
 0x457   : > { %v2149_v52 = vmul.f32 %v2141_v29, %v2125_v27  ;;  %v2135_v15 = vmul.f32 2.0, %v2103_v7  ;;  %v5092_v36 = vpop.permute.xlu0 %1946  ;;  %v1950_v44 = vadd.f32 %v5612_v12, %v5610_v17  ;;  %v5614_v7 = vld [vmem:[#allocation29_spill] sm:$0xff]  ;;  %2480 = vrcp.f32 %v5076_v0 }
 0x458   : > { %v2145_v18 = vadd.f32 0.0009, %v2137_v11  ;;  %v2107_v38 = vsub.f32 %v2091_v42, %v2099_v32  ;;  %v2110_v9 = vmul.f32 2.0, %v5614_v7  ;;  %v5616_v32 = vld [vmem:[#allocation27_spill] sm:$0xff]  ;;  %v5626_v12 = vld [vmem:[#allocation65_spill] sm:$0xff] }
 0x459   : > { %v2198_v40 = vmul.f32 %v2471_v4, %v2149_v52  ;;  %v2143_v57 = vadd.f32 0.0009, %v2135_v15  ;;  %v1992_v42 = vadd.f32 %v5616_v32, %v5613_v5  ;;  %v5617_v52 = vld [vmem:[#allocation40_spill] sm:$0xff] }
 0x45a   : > { %v2153_v2 = vmul.f32 %v2145_v18, %v2129_v58  ;;  %v2139_v34 = vmul.f32 2.0, %v2107_v38  ;;  %v2094_v15 = vmul.f32 %v5617_v52, %v5614_v7  ;;  %v2118_v37 = vmul.f32 %v2110_v9, %v5617_v52  ;;  %v5618_v18 = vld [vmem:[#allocation64_spill] sm:$0xff] }
 0x45b   : > { %v2213_v3 = vsub.f32 1.0, %v2198_v40  ;;  %v2151_v61 = vmul.f32 %v2143_v57, %v2127_v23  ;;  %v2008_v25 = vpop.permute.xlu0 %2007  ;;  %v1952_v38 = vadd.f32 %v5618_v18, %v5613_v5  ;;  %v5619_v40 = vld [vmem:[#allocation110_spill] sm:$0xff] }
 0x45c   : > { %v2206_v30 = vmul.f32 %v2469_v6, %v2153_v2  ;;  %v2147_v24 = vadd.f32 0.0009, %v2139_v34  ;;  %v2030_v13 = vadd.f32 %v2008_v25, %v5610_v17 }
 0x45d   : > { %v2221_v56 = vmul.f32 0.5, %v2213_v3  ;;  %v2202_v19 = vmul.f32 %v2467_v41, %v2151_v61  ;;  %v5620_v61 = vld [vmem:[#allocation14_spill] sm:$0xff] }
 0x45e   : > { %v2217_v28 = vsub.f32 1.0, %v2206_v30  ;;  %v2155_v1 = vmul.f32 %v2147_v24, %v2131_v55  ;;  %v1994_v25 = vadd.f32 %v5620_v61, %v5619_v40 }
 0x45f   : > { %v2229_v48 = vmax.f32 %v2221_v56, 0.0  ;;  %v2215_v50 = vsub.f32 1.0, %v2202_v19  ;;  %v2012_v21 = vpop.permute.xlu0 %2011  ;;  %v2126_v56 = vadd.f32 0.0001, %v2118_v37  ;;  %v1954_v19 = vadd.f32 %v5078_v53, %v5619_v40 }
 0x460   : > { %v2225_v46 = vmul.f32 0.5, %v2217_v28  ;;  %v2210_v10 = vmul.f32 %v2473_v16, %v2155_v1  ;;  %v2032_v27 = vadd.f32 %v2012_v21, %v5613_v5  ;;  %v5621_v16 = vld [vmem:[#allocation111_spill] sm:$0xff]  ;;  %v5623_v21 = vld [vmem:[#allocation60_spill] sm:$0xff] }
 0x461   : > { %v2237_v60 = vmin.f32 %v2229_v48, 1.0  ;;  %v2223_v14 = vmul.f32 0.5, %v2215_v50  ;;  %v5622_v48 = vld [vmem:[#allocation18_spill] sm:$0xff] }
 0x462   : > { %v2233_v62 = vmax.f32 %v2225_v46, 0.0  ;;  %v2219_v49 = vsub.f32 1.0, %v2210_v10  ;;  %v1996_v46 = vadd.f32 %v5623_v21, %v5621_v16 }
 0x463   : > { %2246 = vst.msk [vmem:[%s5097_s14] sm:$0xff] %vm2245_vm7, %v2237_v60  ;;  %v2231_v39 = vmax.f32 %v2223_v14, 0.0  ;;  %v2016_v33 = vpop.permute.xlu0 %2015 }
 0x464   : > { %v2241_v35 = vmin.f32 %v2233_v62, 1.0  ;;  %v2227_v31 = vmul.f32 0.5, %v2219_v49  ;;  %v2034_v23 = vadd.f32 %v2016_v33, %v5619_v40  ;;  %v5624_v33 = vld [vmem:[#allocation70_spill] sm:$0xff] }
 0x465   : > { %v2239_v8 = vmin.f32 %v2231_v39, 1.0  ;;  %v2475_v39 = vpop.eup %2474 }
 0x466   : > { %2250 = vst.msk [vmem:[%s5097_s14 + $0x20] sm:$0xff] %vm2245_vm7, %v2241_v35  ;;  %v2235_v41 = vmax.f32 %v2227_v31, 0.0  ;;  %v2128_v35 = vadd.f32 0.0001, %v5624_v33  ;;  %v1956_v31 = vadd.f32 %v5092_v36, %v5621_v16  ;;  %v2130_v36 = vadd.f32 0.0001, %v5626_v12 }
 0x467   : > { %2248 = vst.msk [vmem:[%s5097_s14 + $0x10] sm:$0xff] %vm2245_vm7, %v2239_v8  ;;  %v2020_v22 = vpop.permute.xlu0 %2019 }
 0x468   : > { %v2243_v20 = vmin.f32 %v2235_v41, 1.0  ;;  %v2036_v28 = vadd.f32 %v2020_v22, %v5621_v16  ;;  %v5625_v22 = vld [vmem:[#allocation36_spill] sm:$0xff] }
 0x46a   : > { %2252 = vst.msk [vmem:[%s5097_s14 + $0x30] sm:$0xff] %vm2245_vm7, %v2243_v20 }
 0x46b   : > { %v2040_v51 = vpop.permute.xlu0 %2039 }
 0x46c   : > { %v2062_v6 = vadd.f32 %v2040_v51, %v2030_v13 }
 0x46e   : > { %v2070_v29 = vsel %vm233_vm5, %v1990_v63, %v2062_v6  ;;  %v2477_v6 = vpop.eup %2476 }
 0x46f   : > { %v2078_v11 = vsel %vm232_vm6, %v1950_v44, %v2070_v29  ;;  %v2044_v43 = vpop.permute.xlu0 %2043  ;;  %v5627_v29 = vld [vmem:[#allocation31_spill] sm:$0xff]  ;;  %v2479_v59 = vpop.eup %2478 }
 0x470   : > { %v2086_v4 = vmul.f32 0.11111111, %v2078_v11  ;;  %v2064_v58 = vadd.f32 %v2044_v43, %v2032_v27  ;;  %v5628_v43 = vld [vmem:[#allocation30_spill] sm:$0xff] }
 0x471   : > { %v2132_v32 = vadd.f32 0.0001, %v5628_v43 }
 0x472   : > { %v2102_v57 = vsub.f32 %v2086_v4, %v2094_v15  ;;  %v2072_v2 = vsel %vm233_vm5, %v1992_v42, %v2064_v58 }
 0x473   : > { %v2080_v34 = vsel %vm232_vm6, %v1952_v38, %v2072_v2  ;;  %v2048_v3 = vpop.permute.xlu0 %2047  ;;  %v2481_v38 = vpop.eup %2480 }
 0x474   : > { %v2134_v55 = vmul.f32 2.0, %v2102_v57  ;;  %v2088_v30 = vmul.f32 0.11111111, %v2080_v34  ;;  %v2066_v24 = vadd.f32 %v2048_v3, %v2034_v23 }
 0x476   : > { %v2142_v1 = vadd.f32 0.0009, %v2134_v55  ;;  %v2104_v50 = vsub.f32 %v2088_v30, %v5622_v48  ;;  %v2074_v26 = vsel %vm233_vm5, %v1994_v25, %v2066_v24 }
 0x477   : > { %v2082_v10 = vsel %vm232_vm6, %v1954_v19, %v2074_v26  ;;  %v2052_v60 = vpop.permute.xlu0 %2051 }
 0x478   : > { %v2150_v14 = vmul.f32 %v2142_v1, %v2126_v56  ;;  %v2136_v62 = vmul.f32 2.0, %v2104_v50  ;;  %v2090_v53 = vmul.f32 0.11111111, %v2082_v10  ;;  %v2068_v49 = vadd.f32 %v2052_v60, %v2036_v28 }
 0x47a   : > { %v2200_v8 = vmul.f32 %v2475_v39, %v2150_v14  ;;  %v2144_v41 = vadd.f32 0.0009, %v2136_v62  ;;  %v2106_v20 = vsub.f32 %v2090_v53, %v5625_v22  ;;  %v2076_v54 = vsel %vm233_vm5, %v1996_v46, %v2068_v49 }
 0x47b   : > { %v2084_v17 = vsel %vm232_vm6, %v1956_v31, %v2076_v54 }
 0x47c   : > { %v2214_v13 = vsub.f32 1.0, %v2200_v8  ;;  %v2152_v51 = vmul.f32 %v2144_v41, %v2128_v35  ;;  %v2138_v47 = vmul.f32 2.0, %v2106_v20  ;;  %v2092_v63 = vmul.f32 0.11111111, %v2084_v17 }
 0x47e   : > { %v2222_v44 = vmul.f32 0.5, %v2214_v13  ;;  %v2204_v5 = vmul.f32 %v2477_v6, %v2152_v51  ;;  %v2146_v27 = vadd.f32 0.0009, %v2138_v47  ;;  %v2108_v7 = vsub.f32 %v2092_v63, %v5627_v29 }
 0x480   : > { %v2230_v9 = vmax.f32 %v2222_v44, 0.0  ;;  %v2216_v45 = vsub.f32 1.0, %v2204_v5  ;;  %v2154_v11 = vmul.f32 %v2146_v27, %v2130_v36  ;;  %v2140_v0 = vmul.f32 2.0, %v2108_v7 }
 0x482   : > { %v2238_v42 = vmin.f32 %v2230_v9, 1.0  ;;  %v2224_v52 = vmul.f32 0.5, %v2216_v45  ;;  %v2208_v15 = vmul.f32 %v2479_v59, %v2154_v11  ;;  %v2148_v4 = vadd.f32 0.0009, %v2140_v0 }
 0x484   : > { %2247 = vst.msk [vmem:[%s5097_s14 + $0x8] sm:$0xff] %vm2245_vm7, %v2238_v42  ;;  %v2232_v58 = vmax.f32 %v2224_v52, 0.0  ;;  %v2218_v37 = vsub.f32 1.0, %v2208_v15  ;;  %v2156_v18 = vmul.f32 %v2148_v4, %v2132_v32 }
 0x486   : > { %v2240_v40 = vmin.f32 %v2232_v58, 1.0  ;;  %v2226_v23 = vmul.f32 0.5, %v2218_v37  ;;  %v2212_v57 = vmul.f32 %v2481_v38, %v2156_v18 }
 0x488   : > { %2249 = vst.msk [vmem:[%s5097_s14 + $0x18] sm:$0xff] %vm2245_vm7, %v2240_v40  ;;  %v2234_v2 = vmax.f32 %v2226_v23, 0.0  ;;  %v2220_v34 = vsub.f32 1.0, %v2212_v57 }
 0x48a   : > { %v2242_v3 = vmin.f32 %v2234_v2, 1.0  ;;  %v2228_v61 = vmul.f32 0.5, %v2220_v34 }
 0x48c   : > { %2251 = vst.msk [vmem:[%s5097_s14 + $0x28] sm:$0xff] %vm2245_vm7, %v2242_v3  ;;  %v2236_v25 = vmax.f32 %v2228_v61, 0.0 }
 0x48e   : > { %v2244_v55 = vmin.f32 %v2236_v25, 1.0 }
 0x490   : > { %2253 = vst.msk [vmem:[%s5097_s14 + $0x38] sm:$0xff] %vm2245_vm7, %v2244_v55 }
 0x491   : > { %2571 = shalt.err (!%p2568_p11)
}
 0x492   : > { %s2572_s4 = scalar_lea.hbm %s5168_s27, 1024  ;;  %s2576_s23 = scalar_lea.hbm %s5218_s2, 2048 }
 0x493   : > { %p2573_p3 = scmp.ne.s32.totalorder %s5168_s27, %s2572_s4  ;;  %p2577_p2 = scmp.lt.u32.totalorder %s5168_s27, %s5218_s2 }
 0x494   : > { %p2578_p4 = scmp.lt.u32.totalorder %s2576_s23, %s2572_s4  ;;  %p2580_p13 = scmp.lt.u32.totalorder %s2572_s4, %s5168_s27 }
 0x495   : > { %p2574_p8 = pnand %p2573_p3, %p5629_p1 }
 0x496   : > { %p2579_p6 = por %p2578_p4, %p2577_p2 }
 0x497   : > { %p2575_p0 = pneg %p2574_p8 }
 0x498   : > { %p2581_p12 = por %p2580_p13, %p2579_p6 }
 0x49a   : > { %p2582_p10 = pnand %p2581_p12, %p2575_p0 }
 0x49c   : > { %2585 = shalt.err (!%p2582_p10)
}
 0x49d   : > { %s2640_s5 = smov 128   ;;  %s2641_s6 = smov 8  }
 0x49e   : > { %2396 = dma.vmem_to_hbm [thread:$0]  (%p5629_p1), %s5170_s28, 1024, %s5168_s27, %s2255_s25, %s2640_s5, %s2640_s5, %s2641_s6  }
 0x49f PF: > { %s2284_s14 = sand.u32 1, %s2616_s9   ;;  %p5630_p5 = scmp.ne.s32.totalorder %s5313_s22, 0 }
 0x4a0   : > { %p5631_p7 = scmp.ge.s32.totalorder %s2628_s12, 2  ;;  %s2285_s17 = scalar_lea.sflag [#allocation4], %s2284_s14 }
 0x4a2   : > { %p2406_p9 = pnand %p5631_p7, %p5630_p5 }
 0x4a4   : > { %2611 = dma.done.wait (!%p2406_p9), %s2285_s17, 1024  }
 0x4a5   : > { %2613 = vsyncadd (!%p2406_p9), %s2285_s17, 4294966272  ;;  %p18_p11 = scmp.ge.s32.totalorder %s2682_s15, 4   ;;  %s5632_s9 = smov %s2620_s10 }
 0x4a6   : > { %s5633_s10 = smov %s2624_s11  ;;  %s5634_s11 = smov %s2694_s18 }
 0x4a7   : > { %s5635_s12 = smov %s2682_s15  ;;  %20 = sbr.rel (!%p18_p11) target bundleno = 7 (0x7), region = 86 }
 0x4ae   :  { %2290 = vsyncpa [#allocation3], 1 }
 0x4af   :  { %2292 = vsyncpa [#allocation3 + $0x1], 1 }
 0x4b0   :  { %2293 = vsyncpa [#allocation6], 1 }
 0x4b1   :  { %2295 = vsyncpa [#allocation6 + $0x1], 1 }
 0x4b2   :  { %2296 = vsyncpa [#allocation4], 1 }
 0x4b3   :  { %2298 = vsyncpa [#allocation4 + $0x1], 1 }

</bundles_post_ra>
